<compile_context>
chip_gen: v7x
topology: tpu7x:2x2x1
jax: 0.10.0
libtpu: 0.0.40
codegen_flags: <defaults>
</compile_context>

<pallas_src>
import functools

import jax
import jax.numpy as jnp
from jax import lax
from jax.experimental import pallas as pl
from jax.experimental.pallas import tpu as pltpu


def _round_up(n, m):
    return ((n + m - 1) // m) * m


_VMEM_LIMIT = 48 * 1024 * 1024   # safe on v7x (64 MiB physical) and v5e/v6e (128 MiB)
_VMEM_BUDGET = 40 * 1024 * 1024  # target for the tiling chooser (headroom for temps)


def _vmem_estimate(TH, W, TK, nK, Cin, Cmid_p, Cout_p):
    """Rough per-step VMEM footprint (bytes) used to pick (TH, TK)."""
    x_main = 2 * TH * (W + 2) * TK * 2            # double-buffered bf16 activations
    x_halo = 2 * 2 * (W + 2) * TK * 2
    if nK == 1:
        w1 = 9 * Cin * Cmid_p * 2                 # resident whole-array, single buffer
    else:
        w1 = 2 * 9 * TK * Cmid_p * 2              # pipelined over Cin chunks
    w2b = Cmid_p * Cout_p * 2 + (Cmid_p + Cout_p) * 4
    out = 2 * TH * W * Cout_p * 2                 # double-buffered bf16 output
    acc = TH * W * Cmid_p * 4                     # f32 accumulator scratch
    temps = TH * W * TK * 2 + 2 * TH * W * Cmid_p * 4  # column-slice + matmul temps
    return x_main + x_halo + w1 + w2b + out + acc + temps


def _select_tiling(B, Cin, H, W, Cmid_p, Cout_p, row_tile, cin_chunk):
    """Pick (row tile TH, Cin chunk TK) preferring a fully resident folded w1."""
    th_cands = [t for t in range(H, 0, -1) if H % t == 0 and t % 2 == 0]
    assert th_cands, "H must be even"

    def fits(th, tk):
        return _vmem_estimate(th, W, tk, Cin // tk, Cin, Cmid_p, Cout_p) <= _VMEM_BUDGET

    if row_tile is not None:
        assert H % row_tile == 0 and row_tile % 2 == 0, \
            "row_tile must evenly divide H and be even"
    if cin_chunk is not None:
        assert Cin % cin_chunk == 0 and (cin_chunk == Cin or cin_chunk % 128 == 0), \
            "cin_chunk must divide Cin and be a multiple of 128 (or Cin itself)"

    if cin_chunk is not None:
        tk = cin_chunk
        th = row_tile if row_tile is not None else \
            next((t for t in th_cands if fits(t, tk)), th_cands[-1])
        return th, tk

    if row_tile is not None:
        th = row_tile
        tk_cands = [Cin]
        if Cin % 128 == 0 and Cin > 128:
            tk_cands += [c for c in (512, 384, 256, 128) if c < Cin and Cin % c == 0]
        tk = next((c for c in tk_cands if fits(th, c)), tk_cands[-1])
        return th, tk

    th = tk = None
    # 1) Prefer a fully resident folded w1 (streamed from HBM exactly once).
    for t in th_cands:
        if fits(t, Cin):
            th, tk = t, Cin
            break
    # 2) Otherwise chunk Cin, keeping the row tile as large as possible (w1 HBM
    #    traffic scales with the number of row tiles when chunked).
    if th is None and Cin % 128 == 0 and Cin > 128:
        done = False
        for t in th_cands:
            for c in (512, 384, 256, 128):
                if c < Cin and Cin % c == 0 and fits(t, c):
                    th, tk, done = t, c, True
                    break
            if done:
                break
    if th is None:  # last resort: smallest tiles, let vmem_limit_bytes decide
        th = th_cands[-1]
        tk = 128 if (Cin % 128 == 0 and Cin > 128) else Cin
    # 3) Megacore (v7x has 2 TensorCores): keep B * nR >= 2 so both cores get work.
    if B == 1 and H // th == 1:
        for t in th_cands:
            if t < th and fits(t, tk):
                th = t
                break
    return th, tk


def _make_fcn_head_kernel(TH, W, Cout_p):
    HW = TH * W

    def kernel(x_ref, xh_ref, w1_ref, b1_ref, w2_ref, b2_ref, o_ref, acc_ref):
        """One (batch, row-tile, Cin-chunk) grid step.

        x_ref:   (TH, W+2, TK)      main padded rows of this row tile (bf16)
        xh_ref:  (2,  W+2, TK)      2 halo rows just below the tile (bf16)
        w1_ref:  (3, 3, TK, Cmid_p) conv3x3 weights with BN scale folded in (bf16)
        b1_ref:  (1, Cmid_p)        folded BN bias (f32)
        w2_ref:  (Cmid_p, Cout_p)   conv1x1 weights (bf16)
        b2_ref:  (1, Cout_p)        conv1x1 bias (f32)
        o_ref:   (TH, W, Cout_p)    output tile (bf16)
        acc_ref: (TH*W, Cmid_p)     f32 conv accumulator (also across Cin chunks)
        """
        k = pl.program_id(2)

        @pl.when(k == 0)
        def _init():
            acc_ref[...] = jnp.zeros_like(acc_ref)

        tk = x_ref.shape[-1]
        # 3x3 conv as 9 (+6 tiny halo) MXU matmuls, bf16 in / f32 accumulate.  The
        # unaligned dx column shift is applied once per dx on the narrow input; per-dy
        # patches are leading-dim slices + layout-clean reshapes (W % 8 == 0).  No
        # main+halo concatenate is materialized: halo taps go straight into the tail
        # rows of the accumulator.
        for dx in range(3):
            cols_m = x_ref[:, dx:dx + W, :]       # (TH, W, TK)
            cols_h = xh_ref[:, dx:dx + W, :]      # (2,  W, TK)
            for dy in range(3):
                w = w1_ref[dy, dx]                # (TK, Cmid_p)
                nm = (TH - dy) * W                # output rows fed by the main block
                pm = cols_m[dy:, :, :].reshape(nm, tk)
                acc_ref[0:nm, :] += jnp.dot(pm, w, preferred_element_type=jnp.float32)
                if dy:                            # bottom rows fed by the 2 halo rows
                    ph = cols_h[0:dy, :, :].reshape(dy * W, tk)
                    acc_ref[nm:HW, :] += jnp.dot(ph, w,
                                                 preferred_element_type=jnp.float32)

        @pl.when(k == pl.num_programs(2) - 1)
        def _finalize():
            # BN scale already folded into w1; bias add + ReLU.  Dropout2d(0.1, False)
            # is identity in eval mode.
            # TODO(synk): training-mode Dropout2d (per-channel Bernoulli) not implemented.
            h = jnp.maximum(acc_ref[...] + b1_ref[...], 0.0).astype(jnp.bfloat16)
            y = jnp.dot(h, w2_ref[...], preferred_element_type=jnp.float32) + b2_ref[...]
            o_ref[...] = y.reshape(TH, W, Cout_p).astype(o_ref.dtype)

    return kernel


@functools.partial(jax.jit, static_argnames=("eps", "row_tile", "cin_chunk"))
def fcn_head_forward(x_nchw, w1_hwio, bn_gamma, bn_beta, bn_mean, bn_var, w2, b2,
                     *, eps=1e-5, row_tile=None, cin_chunk=None):
    """FCNHead forward. x_nchw: (B, Cin, H, W) f32 -> (B, Cout, H, W) f32."""
    B, Cin, H, W = x_nchw.shape
    Cmid = w1_hwio.shape[-1]
    Cout = w2.shape[-1]
    assert H % 2 == 0, "even H required by the 2-row halo blocks"
    assert W % 8 == 0, "W must be sublane-aligned (multiple of 8) for copy-free reshapes"

    f32, bf16 = jnp.float32, jnp.bfloat16

    # Lane-dense channel padding (full-lane matmul N dims and unmasked output stores).
    Cmid_p = _round_up(Cmid, 128)
    Cout_p = _round_up(Cout, 128)

    TH, TK = _select_tiling(B, Cin, H, W, Cmid_p, Cout_p, row_tile, cin_chunk)
    nR = H // TH
    nK = Cin // TK

    # Fold BN (inference running stats): the scale folds exactly into the conv1
    # weights, leaving only a per-channel bias add before the ReLU.
    scale = bn_gamma.astype(f32) / jnp.sqrt(bn_var.astype(f32) + eps)
    w1_folded = w1_hwio.astype(f32) * scale[None, None, None, :]
    b1_folded = bn_beta.astype(f32) - bn_mean.astype(f32) * scale

    w1_p = jnp.pad(w1_folded, ((0, 0), (0, 0), (0, 0), (0, Cmid_p - Cmid))).astype(bf16)
    b1_p = jnp.pad(b1_folded, (0, Cmid_p - Cmid)).reshape(1, Cmid_p).astype(f32)
    w2_p = jnp.pad(w2.astype(f32), ((0, Cmid_p - Cmid), (0, Cout_p - Cout))).astype(bf16)
    b2_p = jnp.pad(b2.astype(f32), (0, Cout_p - Cout)).reshape(1, Cout_p).astype(f32)

    # NCHW -> NHWC (channels on lanes), bf16 activations, 1-pixel zero halo for 3x3.
    # TODO(synk): fold this transpose+pad into the pallas_call prologue
    # (allow_input_fusion / in-kernel edge masking) to avoid an extra HBM round trip.
    x_nhwc = jnp.transpose(x_nchw, (0, 2, 3, 1)).astype(bf16)
    x_pad = jnp.pad(x_nhwc, ((0, 0), (1, 1), (1, 1), (0, 0)))

    # Grid-invariant operands live whole in VMEM (single buffer, streamed once).
    vmem_whole = pl.BlockSpec(memory_space=pltpu.MemorySpace.VMEM)
    if nK == 1:
        w1_spec = vmem_whole                                 # resident folded w1
    else:
        w1_spec = pl.BlockSpec((3, 3, TK, Cmid_p), lambda b, r, k: (0, 0, k, 0))

    out_p = pl.pallas_call(
        _make_fcn_head_kernel(TH, W, Cout_p),
        out_shape=jax.ShapeDtypeStruct((B, H, W, Cout_p), bf16),
        grid_spec=pltpu.PrefetchScalarGridSpec(
            num_scalar_prefetch=0,
            grid=(B, nR, nK),
            in_specs=[
                # TH "main" padded rows of this row tile.
                pl.BlockSpec((None, TH, W + 2, TK), lambda b, r, k: (b, r, 0, k)),
                # 2 halo rows immediately below (same padded array, 2-row blocks).
                pl.BlockSpec((None, 2, W + 2, TK),
                             lambda b, r, k: (b, (r + 1) * (TH // 2), 0, k)),
                w1_spec,
                vmem_whole,   # b1
                vmem_whole,   # w2
                vmem_whole,   # b2
            ],
            out_specs=pl.BlockSpec((None, TH, W, Cout_p),
                                   lambda b, r, k: (b, r, 0, 0)),
            scratch_shapes=[pltpu.VMEM((TH * W, Cmid_p), f32)],
        ),
        compiler_params=pltpu.CompilerParams(
            dimension_semantics=("parallel", "parallel", "arbitrary"),
            vmem_limit_bytes=_VMEM_LIMIT,
        ),
    )(x_pad, x_pad, w1_p, b1_p, w2_p, b2_p)

    # Drop lane padding, restore f32 and NCHW (one fused XLA slice+cast+transpose).
    return jnp.transpose(out_p[..., :Cout].astype(f32), (0, 3, 1, 2))


def _reference_forward(x_nchw, w1_hwio, bn_gamma, bn_beta, bn_mean, bn_var, w2, b2,
                       eps=1e-5):
    """Pure-JAX f32 reference (lax.conv) for correctness checking."""
    x_nhwc = jnp.transpose(x_nchw, (0, 2, 3, 1))
    y = lax.conv_general_dilated(
        x_nhwc, w1_hwio, window_strides=(1, 1), padding=((1, 1), (1, 1)),
        dimension_numbers=("NHWC", "HWIO", "NHWC"))
    scale = bn_gamma / jnp.sqrt(bn_var + eps)
    y = y * scale + (bn_beta - bn_mean * scale)
    y = jnp.maximum(y, 0.0)
    y = jnp.einsum("bhwc,cd->bhwd", y, w2) + b2
    return jnp.transpose(y, (0, 3, 1, 2))


def _check(name, out, ref):
    assert out.shape == ref.shape, (name, out.shape, ref.shape)
    err = float(jnp.max(jnp.abs(out - ref)))
    # bf16 activations/weights with f32 MXU accumulation -> scale-aware tolerance.
    tol = 5e-2 + 2e-2 * float(jnp.max(jnp.abs(ref)))
    assert err <= tol, f"{name}: max_err={err} tol={tol}"


if __name__ == "__main__":
    def make_inputs(key, B, Cin, Cmid, Cout, H, W):
        ks = jax.random.split(key, 8)
        x = jax.random.normal(ks[0], (B, Cin, H, W), jnp.float32)
        w1 = jax.random.normal(ks[1], (3, 3, Cin, Cmid), jnp.float32) * 0.1   # HWIO, no bias
        bn_gamma = jax.random.uniform(ks[2], (Cmid,), jnp.float32, 0.5, 1.5)
        bn_beta = jax.random.normal(ks[3], (Cmid,), jnp.float32) * 0.1
        bn_mean = jax.random.normal(ks[4], (Cmid,), jnp.float32) * 0.1
        bn_var = jax.random.uniform(ks[5], (Cmid,), jnp.float32, 0.5, 1.5)
        w2 = jax.random.normal(ks[6], (Cmid, Cout), jnp.float32) * 0.1        # 1x1 conv
        b2 = jax.random.normal(ks[7], (Cout,), jnp.float32) * 0.1
        return (x, w1, bn_gamma, bn_beta, bn_mean, bn_var, w2, b2)

    k1, k2 = jax.random.split(jax.random.PRNGKey(0))

    # 1) FCNHead(in_channels=16, out_channels=8), default tiling (resident w1, nR=1).
    args = make_inputs(k1, B=2, Cin=16, Cmid=4, Cout=8, H=16, W=16)
    out = jax.block_until_ready(fcn_head_forward(*args))
    ref = _reference_forward(*args)
    assert out.shape == (2, 8, 16, 16), out.shape
    _check("default", out, ref)

    # 2) Same inputs with forced row tiling (nR=2) -> exercises the halo matmul path.
    out_t = jax.block_until_ready(fcn_head_forward(*args, row_tile=8))
    _check("row_tiled", out_t, ref)

    # 3) FCNHead(in_channels=256, out_channels=8) with forced Cin chunking (nK=2) and
    #    row tiling -> exercises the cross-chunk accumulator (pl.when init/finalize).
    args2 = make_inputs(k2, B=1, Cin=256, Cmid=64, Cout=8, H=8, W=16)
    out2 = jax.block_until_ready(fcn_head_forward(*args2, row_tile=4, cin_chunk=128))
    ref2 = _reference_forward(*args2)
    _check("cin_chunked", out2, ref2)

    print("KERNEL_OK")
</pallas_src>

<mosaic_0001>
module attributes {stable_mosaic.version = 11 : i64} {
  func.func @kernel(%arg0: i32, %arg1: i32, %arg2: i32, %arg3: memref<1x16x18x16xbf16, #tpu.memory_space<vmem>>, %arg4: memref<1x2x18x16xbf16, #tpu.memory_space<vmem>>, %arg5: memref<3x3x16x128xbf16, #tpu.memory_space<vmem>>, %arg6: memref<1x128xf32, #tpu.memory_space<vmem>>, %arg7: memref<128x128xbf16, #tpu.memory_space<vmem>>, %arg8: memref<1x128xf32, #tpu.memory_space<vmem>>, %arg9: memref<1x16x16x128xbf16, #tpu.memory_space<vmem>>, %arg10: memref<256x128xf32, #tpu.memory_space<vmem>>) attributes {dimension_semantics = [#tpu.dimension_semantics<parallel>, #tpu.dimension_semantics<parallel>, #tpu.dimension_semantics<arbitrary>], iteration_bounds = array<i64: 2, 1, 1>, scalar_prefetch = 0 : i64, scratch_operands = 1 : i64, tpu.core_type = #tpu.core_type<tc>, window_params = [{transform_indices = @transform_0, window_bounds = array<i64: 1, 16, 18, 16>}, {transform_indices = @transform_1, window_bounds = array<i64: 1, 2, 18, 16>}, {pipeline_mode = #tpu.pipeline_mode<synchronous>, transform_indices = @transform_2, window_bounds = array<i64: 3, 3, 16, 128>}, {pipeline_mode = #tpu.pipeline_mode<synchronous>, transform_indices = @transform_3, window_bounds = array<i64: 1, 128>}, {pipeline_mode = #tpu.pipeline_mode<synchronous>, transform_indices = @transform_4, window_bounds = array<i64: 128, 128>}, {pipeline_mode = #tpu.pipeline_mode<synchronous>, transform_indices = @transform_5, window_bounds = array<i64: 1, 128>}, {transform_indices = @transform_6, window_bounds = array<i64: 1, 16, 16, 128>}]} {
    %c0_i32 = arith.constant 0 : i32
    %0 = arith.cmpi eq, %arg2, %c0_i32 : i32
    %1 = arith.extui %0 : i1 to i32
    %c0_i32_0 = arith.constant 0 : i32
    %2 = arith.cmpi ne, %1, %c0_i32_0 : i32
    scf.if %2 {
      %cst_132 = arith.constant 0.000000e+00 : f32
      %120 = vector.broadcast %cst_132 : f32 to vector<256x128xf32>
      %c0_133 = arith.constant 0 : index
      %c0_134 = arith.constant 0 : index
      %121 = vector.load %arg10[%c0_133, %c0_134] : memref<256x128xf32, #tpu.memory_space<vmem>>, vector<256x128xf32>
      tpu.vector_store %arg10[%c0_133, %c0_134], %120 {strides = array<i32>} : memref<256x128xf32, #tpu.memory_space<vmem>>, vector<256x128xf32>,
    } else {
    }
    %c0 = arith.constant 0 : index
    %c0_1 = arith.constant 0 : index
    %c0_2 = arith.constant 0 : index
    %c0_3 = arith.constant 0 : index
    %3 = vector.load %arg3[%c0, %c0_1, %c0_2, %c0_3] : memref<1x16x18x16xbf16, #tpu.memory_space<vmem>>, vector<1x16x16x16xbf16>
    %4 = vector.shape_cast %3 : vector<1x16x16x16xbf16> to vector<16x16x16xbf16>
    %c0_4 = arith.constant 0 : index
    %c0_5 = arith.constant 0 : index
    %c0_6 = arith.constant 0 : index
    %c0_7 = arith.constant 0 : index
    %5 = vector.load %arg4[%c0_4, %c0_5, %c0_6, %c0_7] : memref<1x2x18x16xbf16, #tpu.memory_space<vmem>>, vector<1x2x16x16xbf16>
    %6 = vector.shape_cast %5 : vector<1x2x16x16xbf16> to vector<2x16x16xbf16>
    %c0_8 = arith.constant 0 : index
    %c0_9 = arith.constant 0 : index
    %c0_10 = arith.constant 0 : index
    %c0_11 = arith.constant 0 : index
    %7 = vector.load %arg5[%c0_8, %c0_9, %c0_10, %c0_11] : memref<3x3x16x128xbf16, #tpu.memory_space<vmem>>, vector<1x1x16x128xbf16>
    %8 = vector.shape_cast %7 : vector<1x1x16x128xbf16> to vector<16x128xbf16>
    %9 = vector.shape_cast %4 : vector<16x16x16xbf16> to vector<256x16xbf16>
    %c0_12 = arith.constant 0 : index
    %c0_13 = arith.constant 0 : index
    %10 = vector.load %arg10[%c0_12, %c0_13] : memref<256x128xf32, #tpu.memory_space<vmem>>, vector<256x128xf32>
    %cst = arith.constant dense<0.000000e+00> : vector<256x128xf32>
    %11 = tpu.matmul %9, %8, %cst {dimension_numbers = #tpu.dot_dimension_numbers<[1], [0], [0], [1], [0, 0, 1, 1], [], []>} : vector<256x16xbf16>, vector<16x128xbf16>, vector<256x128xf32> -> vector<256x128xf32>
    %12 = arith.addf %10, %11 : vector<256x128xf32>
    %c0_14 = arith.constant 0 : index
    %c0_15 = arith.constant 0 : index
    %13 = vector.load %arg10[%c0_14, %c0_15] : memref<256x128xf32, #tpu.memory_space<vmem>>, vector<256x128xf32>
    tpu.vector_store %arg10[%c0_14, %c0_15], %12 {strides = array<i32>} : memref<256x128xf32, #tpu.memory_space<vmem>>, vector<256x128xf32>,
    %c1 = arith.constant 1 : index
    %c0_16 = arith.constant 0 : index
    %c0_17 = arith.constant 0 : index
    %c0_18 = arith.constant 0 : index
    %14 = vector.load %arg5[%c1, %c0_16, %c0_17, %c0_18] : memref<3x3x16x128xbf16, #tpu.memory_space<vmem>>, vector<1x1x16x128xbf16>
    %15 = vector.shape_cast %14 : vector<1x1x16x128xbf16> to vector<16x128xbf16>
    %16 = vector.extract_strided_slice %4 {offsets = [1, 0, 0], sizes = [15, 16, 16], strides = [1, 1, 1]} : vector<16x16x16xbf16> to vector<15x16x16xbf16>
    %17 = vector.shape_cast %16 : vector<15x16x16xbf16> to vector<240x16xbf16>
    %c0_19 = arith.constant 0 : index
    %c0_20 = arith.constant 0 : index
    %18 = vector.load %arg10[%c0_19, %c0_20] : memref<256x128xf32, #tpu.memory_space<vmem>>, vector<240x128xf32>
    %cst_21 = arith.constant dense<0.000000e+00> : vector<240x128xf32>
    %19 = tpu.matmul %17, %15, %cst_21 {dimension_numbers = #tpu.dot_dimension_numbers<[1], [0], [0], [1], [0, 0, 1, 1], [], []>} : vector<240x16xbf16>, vector<16x128xbf16>, vector<240x128xf32> -> vector<240x128xf32>
    %20 = arith.addf %18, %19 : vector<240x128xf32>
    %c0_22 = arith.constant 0 : index
    %c0_23 = arith.constant 0 : index
    %21 = vector.load %arg10[%c0_22, %c0_23] : memref<256x128xf32, #tpu.memory_space<vmem>>, vector<240x128xf32>
    tpu.vector_store %arg10[%c0_22, %c0_23], %20 {strides = array<i32>} : memref<256x128xf32, #tpu.memory_space<vmem>>, vector<240x128xf32>,
    %22 = vector.extract_strided_slice %6 {offsets = [0, 0, 0], sizes = [1, 16, 16], strides = [1, 1, 1]} : vector<2x16x16xbf16> to vector<1x16x16xbf16>
    %23 = vector.shape_cast %22 : vector<1x16x16xbf16> to vector<16x16xbf16>
    %c240 = arith.constant 240 : index
    %c0_24 = arith.constant 0 : index
    %24 = vector.load %arg10[%c240, %c0_24] : memref<256x128xf32, #tpu.memory_space<vmem>>, vector<16x128xf32>
    %cst_25 = arith.constant dense<0.000000e+00> : vector<16x128xf32>
    %25 = tpu.matmul %23, %15, %cst_25 {dimension_numbers = #tpu.dot_dimension_numbers<[1], [0], [0], [1], [0, 0, 1, 1], [], []>} : vector<16x16xbf16>, vector<16x128xbf16>, vector<16x128xf32> -> vector<16x128xf32>
    %26 = arith.addf %24, %25 : vector<16x128xf32>
    %c240_26 = arith.constant 240 : index
    %c0_27 = arith.constant 0 : index
    %27 = vector.load %arg10[%c240_26, %c0_27] : memref<256x128xf32, #tpu.memory_space<vmem>>, vector<16x128xf32>
    tpu.vector_store %arg10[%c240_26, %c0_27], %26 {strides = array<i32>} : memref<256x128xf32, #tpu.memory_space<vmem>>, vector<16x128xf32>,
    %c2 = arith.constant 2 : index
    %c0_28 = arith.constant 0 : index
    %c0_29 = arith.constant 0 : index
    %c0_30 = arith.constant 0 : index
    %28 = vector.load %arg5[%c2, %c0_28, %c0_29, %c0_30] : memref<3x3x16x128xbf16, #tpu.memory_space<vmem>>, vector<1x1x16x128xbf16>
    %29 = vector.shape_cast %28 : vector<1x1x16x128xbf16> to vector<16x128xbf16>
    %30 = vector.extract_strided_slice %4 {offsets = [2, 0, 0], sizes = [14, 16, 16], strides = [1, 1, 1]} : vector<16x16x16xbf16> to vector<14x16x16xbf16>
    %31 = vector.shape_cast %30 : vector<14x16x16xbf16> to vector<224x16xbf16>
    %c0_31 = arith.constant 0 : index
    %c0_32 = arith.constant 0 : index
    %32 = vector.load %arg10[%c0_31, %c0_32] : memref<256x128xf32, #tpu.memory_space<vmem>>, vector<224x128xf32>
    %cst_33 = arith.constant dense<0.000000e+00> : vector<224x128xf32>
    %33 = tpu.matmul %31, %29, %cst_33 {dimension_numbers = #tpu.dot_dimension_numbers<[1], [0], [0], [1], [0, 0, 1, 1], [], []>} : vector<224x16xbf16>, vector<16x128xbf16>, vector<224x128xf32> -> vector<224x128xf32>
    %34 = arith.addf %32, %33 : vector<224x128xf32>
    %c0_34 = arith.constant 0 : index
    %c0_35 = arith.constant 0 : index
    %35 = vector.load %arg10[%c0_34, %c0_35] : memref<256x128xf32, #tpu.memory_space<vmem>>, vector<224x128xf32>
    tpu.vector_store %arg10[%c0_34, %c0_35], %34 {strides = array<i32>} : memref<256x128xf32, #tpu.memory_space<vmem>>, vector<224x128xf32>,
    %36 = vector.shape_cast %6 : vector<2x16x16xbf16> to vector<32x16xbf16>
    %c224 = arith.constant 224 : index
    %c0_36 = arith.constant 0 : index
    %37 = vector.load %arg10[%c224, %c0_36] : memref<256x128xf32, #tpu.memory_space<vmem>>, vector<32x128xf32>
    %cst_37 = arith.constant dense<0.000000e+00> : vector<32x128xf32>
    %38 = tpu.matmul %36, %29, %cst_37 {dimension_numbers = #tpu.dot_dimension_numbers<[1], [0], [0], [1], [0, 0, 1, 1], [], []>} : vector<32x16xbf16>, vector<16x128xbf16>, vector<32x128xf32> -> vector<32x128xf32>
    %39 = arith.addf %37, %38 : vector<32x128xf32>
    %c224_38 = arith.constant 224 : index
    %c0_39 = arith.constant 0 : index
    %40 = vector.load %arg10[%c224_38, %c0_39] : memref<256x128xf32, #tpu.memory_space<vmem>>, vector<32x128xf32>
    tpu.vector_store %arg10[%c224_38, %c0_39], %39 {strides = array<i32>} : memref<256x128xf32, #tpu.memory_space<vmem>>, vector<32x128xf32>,
    %c0_40 = arith.constant 0 : index
    %c0_41 = arith.constant 0 : index
    %c1_42 = arith.constant 1 : index
    %c0_43 = arith.constant 0 : index
    %41 = vector.load %arg3[%c0_40, %c0_41, %c1_42, %c0_43] : memref<1x16x18x16xbf16, #tpu.memory_space<vmem>>, vector<1x16x16x16xbf16>
    %42 = vector.shape_cast %41 : vector<1x16x16x16xbf16> to vector<16x16x16xbf16>
    %c0_44 = arith.constant 0 : index
    %c0_45 = arith.constant 0 : index
    %c1_46 = arith.constant 1 : index
    %c0_47 = arith.constant 0 : index
    %43 = vector.load %arg4[%c0_44, %c0_45, %c1_46, %c0_47] : memref<1x2x18x16xbf16, #tpu.memory_space<vmem>>, vector<1x2x16x16xbf16>
    %44 = vector.shape_cast %43 : vector<1x2x16x16xbf16> to vector<2x16x16xbf16>
    %c0_48 = arith.constant 0 : index
    %c1_49 = arith.constant 1 : index
    %c0_50 = arith.constant 0 : index
    %c0_51 = arith.constant 0 : index
    %45 = vector.load %arg5[%c0_48, %c1_49, %c0_50, %c0_51] : memref<3x3x16x128xbf16, #tpu.memory_space<vmem>>, vector<1x1x16x128xbf16>
    %46 = vector.shape_cast %45 : vector<1x1x16x128xbf16> to vector<16x128xbf16>
    %47 = vector.shape_cast %42 : vector<16x16x16xbf16> to vector<256x16xbf16>
    %c0_52 = arith.constant 0 : index
    %c0_53 = arith.constant 0 : index
    %48 = vector.load %arg10[%c0_52, %c0_53] : memref<256x128xf32, #tpu.memory_space<vmem>>, vector<256x128xf32>
    %cst_54 = arith.constant dense<0.000000e+00> : vector<256x128xf32>
    %49 = tpu.matmul %47, %46, %cst_54 {dimension_numbers = #tpu.dot_dimension_numbers<[1], [0], [0], [1], [0, 0, 1, 1], [], []>} : vector<256x16xbf16>, vector<16x128xbf16>, vector<256x128xf32> -> vector<256x128xf32>
    %50 = arith.addf %48, %49 : vector<256x128xf32>
    %c0_55 = arith.constant 0 : index
    %c0_56 = arith.constant 0 : index
    %51 = vector.load %arg10[%c0_55, %c0_56] : memref<256x128xf32, #tpu.memory_space<vmem>>, vector<256x128xf32>
    tpu.vector_store %arg10[%c0_55, %c0_56], %50 {strides = array<i32>} : memref<256x128xf32, #tpu.memory_space<vmem>>, vector<256x128xf32>,
    %c1_57 = arith.constant 1 : index
    %c1_58 = arith.constant 1 : index
    %c0_59 = arith.constant 0 : index
    %c0_60 = arith.constant 0 : index
    %52 = vector.load %arg5[%c1_57, %c1_58, %c0_59, %c0_60] : memref<3x3x16x128xbf16, #tpu.memory_space<vmem>>, vector<1x1x16x128xbf16>
    %53 = vector.shape_cast %52 : vector<1x1x16x128xbf16> to vector<16x128xbf16>
    %54 = vector.extract_strided_slice %42 {offsets = [1, 0, 0], sizes = [15, 16, 16], strides = [1, 1, 1]} : vector<16x16x16xbf16> to vector<15x16x16xbf16>
    %55 = vector.shape_cast %54 : vector<15x16x16xbf16> to vector<240x16xbf16>
    %c0_61 = arith.constant 0 : index
    %c0_62 = arith.constant 0 : index
    %56 = vector.load %arg10[%c0_61, %c0_62] : memref<256x128xf32, #tpu.memory_space<vmem>>, vector<240x128xf32>
    %cst_63 = arith.constant dense<0.000000e+00> : vector<240x128xf32>
    %57 = tpu.matmul %55, %53, %cst_63 {dimension_numbers = #tpu.dot_dimension_numbers<[1], [0], [0], [1], [0, 0, 1, 1], [], []>} : vector<240x16xbf16>, vector<16x128xbf16>, vector<240x128xf32> -> vector<240x128xf32>
    %58 = arith.addf %56, %57 : vector<240x128xf32>
    %c0_64 = arith.constant 0 : index
    %c0_65 = arith.constant 0 : index
    %59 = vector.load %arg10[%c0_64, %c0_65] : memref<256x128xf32, #tpu.memory_space<vmem>>, vector<240x128xf32>
    tpu.vector_store %arg10[%c0_64, %c0_65], %58 {strides = array<i32>} : memref<256x128xf32, #tpu.memory_space<vmem>>, vector<240x128xf32>,
    %60 = vector.extract_strided_slice %44 {offsets = [0, 0, 0], sizes = [1, 16, 16], strides = [1, 1, 1]} : vector<2x16x16xbf16> to vector<1x16x16xbf16>
    %61 = vector.shape_cast %60 : vector<1x16x16xbf16> to vector<16x16xbf16>
    %c240_66 = arith.constant 240 : index
    %c0_67 = arith.constant 0 : index
    %62 = vector.load %arg10[%c240_66, %c0_67] : memref<256x128xf32, #tpu.memory_space<vmem>>, vector<16x128xf32>
    %cst_68 = arith.constant dense<0.000000e+00> : vector<16x128xf32>
    %63 = tpu.matmul %61, %53, %cst_68 {dimension_numbers = #tpu.dot_dimension_numbers<[1], [0], [0], [1], [0, 0, 1, 1], [], []>} : vector<16x16xbf16>, vector<16x128xbf16>, vector<16x128xf32> -> vector<16x128xf32>
    %64 = arith.addf %62, %63 : vector<16x128xf32>
    %c240_69 = arith.constant 240 : index
    %c0_70 = arith.constant 0 : index
    %65 = vector.load %arg10[%c240_69, %c0_70] : memref<256x128xf32, #tpu.memory_space<vmem>>, vector<16x128xf32>
    tpu.vector_store %arg10[%c240_69, %c0_70], %64 {strides = array<i32>} : memref<256x128xf32, #tpu.memory_space<vmem>>, vector<16x128xf32>,
    %c2_71 = arith.constant 2 : index
    %c1_72 = arith.constant 1 : index
    %c0_73 = arith.constant 0 : index
    %c0_74 = arith.constant 0 : index
    %66 = vector.load %arg5[%c2_71, %c1_72, %c0_73, %c0_74] : memref<3x3x16x128xbf16, #tpu.memory_space<vmem>>, vector<1x1x16x128xbf16>
    %67 = vector.shape_cast %66 : vector<1x1x16x128xbf16> to vector<16x128xbf16>
    %68 = vector.extract_strided_slice %42 {offsets = [2, 0, 0], sizes = [14, 16, 16], strides = [1, 1, 1]} : vector<16x16x16xbf16> to vector<14x16x16xbf16>
    %69 = vector.shape_cast %68 : vector<14x16x16xbf16> to vector<224x16xbf16>
    %c0_75 = arith.constant 0 : index
    %c0_76 = arith.constant 0 : index
    %70 = vector.load %arg10[%c0_75, %c0_76] : memref<256x128xf32, #tpu.memory_space<vmem>>, vector<224x128xf32>
    %cst_77 = arith.constant dense<0.000000e+00> : vector<224x128xf32>
    %71 = tpu.matmul %69, %67, %cst_77 {dimension_numbers = #tpu.dot_dimension_numbers<[1], [0], [0], [1], [0, 0, 1, 1], [], []>} : vector<224x16xbf16>, vector<16x128xbf16>, vector<224x128xf32> -> vector<224x128xf32>
    %72 = arith.addf %70, %71 : vector<224x128xf32>
    %c0_78 = arith.constant 0 : index
    %c0_79 = arith.constant 0 : index
    %73 = vector.load %arg10[%c0_78, %c0_79] : memref<256x128xf32, #tpu.memory_space<vmem>>, vector<224x128xf32>
    tpu.vector_store %arg10[%c0_78, %c0_79], %72 {strides = array<i32>} : memref<256x128xf32, #tpu.memory_space<vmem>>, vector<224x128xf32>,
    %74 = vector.shape_cast %44 : vector<2x16x16xbf16> to vector<32x16xbf16>
    %c224_80 = arith.constant 224 : index
    %c0_81 = arith.constant 0 : index
    %75 = vector.load %arg10[%c224_80, %c0_81] : memref<256x128xf32, #tpu.memory_space<vmem>>, vector<32x128xf32>
    %cst_82 = arith.constant dense<0.000000e+00> : vector<32x128xf32>
    %76 = tpu.matmul %74, %67, %cst_82 {dimension_numbers = #tpu.dot_dimension_numbers<[1], [0], [0], [1], [0, 0, 1, 1], [], []>} : vector<32x16xbf16>, vector<16x128xbf16>, vector<32x128xf32> -> vector<32x128xf32>
    %77 = arith.addf %75, %76 : vector<32x128xf32>
    %c224_83 = arith.constant 224 : index
    %c0_84 = arith.constant 0 : index
    %78 = vector.load %arg10[%c224_83, %c0_84] : memref<256x128xf32, #tpu.memory_space<vmem>>, vector<32x128xf32>
    tpu.vector_store %arg10[%c224_83, %c0_84], %77 {strides = array<i32>} : memref<256x128xf32, #tpu.memory_space<vmem>>, vector<32x128xf32>,
    %c0_85 = arith.constant 0 : index
    %c0_86 = arith.constant 0 : index
    %c2_87 = arith.constant 2 : index
    %c0_88 = arith.constant 0 : index
    %79 = vector.load %arg3[%c0_85, %c0_86, %c2_87, %c0_88] : memref<1x16x18x16xbf16, #tpu.memory_space<vmem>>, vector<1x16x16x16xbf16>
    %80 = vector.shape_cast %79 : vector<1x16x16x16xbf16> to vector<16x16x16xbf16>
    %c0_89 = arith.constant 0 : index
    %c0_90 = arith.constant 0 : index
    %c2_91 = arith.constant 2 : index
    %c0_92 = arith.constant 0 : index
    %81 = vector.load %arg4[%c0_89, %c0_90, %c2_91, %c0_92] : memref<1x2x18x16xbf16, #tpu.memory_space<vmem>>, vector<1x2x16x16xbf16>
    %82 = vector.shape_cast %81 : vector<1x2x16x16xbf16> to vector<2x16x16xbf16>
    %c0_93 = arith.constant 0 : index
    %c2_94 = arith.constant 2 : index
    %c0_95 = arith.constant 0 : index
    %c0_96 = arith.constant 0 : index
    %83 = vector.load %arg5[%c0_93, %c2_94, %c0_95, %c0_96] : memref<3x3x16x128xbf16, #tpu.memory_space<vmem>>, vector<1x1x16x128xbf16>
    %84 = vector.shape_cast %83 : vector<1x1x16x128xbf16> to vector<16x128xbf16>
    %85 = vector.shape_cast %80 : vector<16x16x16xbf16> to vector<256x16xbf16>
    %c0_97 = arith.constant 0 : index
    %c0_98 = arith.constant 0 : index
    %86 = vector.load %arg10[%c0_97, %c0_98] : memref<256x128xf32, #tpu.memory_space<vmem>>, vector<256x128xf32>
    %cst_99 = arith.constant dense<0.000000e+00> : vector<256x128xf32>
    %87 = tpu.matmul %85, %84, %cst_99 {dimension_numbers = #tpu.dot_dimension_numbers<[1], [0], [0], [1], [0, 0, 1, 1], [], []>} : vector<256x16xbf16>, vector<16x128xbf16>, vector<256x128xf32> -> vector<256x128xf32>
    %88 = arith.addf %86, %87 : vector<256x128xf32>
    %c0_100 = arith.constant 0 : index
    %c0_101 = arith.constant 0 : index
    %89 = vector.load %arg10[%c0_100, %c0_101] : memref<256x128xf32, #tpu.memory_space<vmem>>, vector<256x128xf32>
    tpu.vector_store %arg10[%c0_100, %c0_101], %88 {strides = array<i32>} : memref<256x128xf32, #tpu.memory_space<vmem>>, vector<256x128xf32>,
    %c1_102 = arith.constant 1 : index
    %c2_103 = arith.constant 2 : index
    %c0_104 = arith.constant 0 : index
    %c0_105 = arith.constant 0 : index
    %90 = vector.load %arg5[%c1_102, %c2_103, %c0_104, %c0_105] : memref<3x3x16x128xbf16, #tpu.memory_space<vmem>>, vector<1x1x16x128xbf16>
    %91 = vector.shape_cast %90 : vector<1x1x16x128xbf16> to vector<16x128xbf16>
    %92 = vector.extract_strided_slice %80 {offsets = [1, 0, 0], sizes = [15, 16, 16], strides = [1, 1, 1]} : vector<16x16x16xbf16> to vector<15x16x16xbf16>
    %93 = vector.shape_cast %92 : vector<15x16x16xbf16> to vector<240x16xbf16>
    %c0_106 = arith.constant 0 : index
    %c0_107 = arith.constant 0 : index
    %94 = vector.load %arg10[%c0_106, %c0_107] : memref<256x128xf32, #tpu.memory_space<vmem>>, vector<240x128xf32>
    %cst_108 = arith.constant dense<0.000000e+00> : vector<240x128xf32>
    %95 = tpu.matmul %93, %91, %cst_108 {dimension_numbers = #tpu.dot_dimension_numbers<[1], [0], [0], [1], [0, 0, 1, 1], [], []>} : vector<240x16xbf16>, vector<16x128xbf16>, vector<240x128xf32> -> vector<240x128xf32>
    %96 = arith.addf %94, %95 : vector<240x128xf32>
    %c0_109 = arith.constant 0 : index
    %c0_110 = arith.constant 0 : index
    %97 = vector.load %arg10[%c0_109, %c0_110] : memref<256x128xf32, #tpu.memory_space<vmem>>, vector<240x128xf32>
    tpu.vector_store %arg10[%c0_109, %c0_110], %96 {strides = array<i32>} : memref<256x128xf32, #tpu.memory_space<vmem>>, vector<240x128xf32>,
    %98 = vector.extract_strided_slice %82 {offsets = [0, 0, 0], sizes = [1, 16, 16], strides = [1, 1, 1]} : vector<2x16x16xbf16> to vector<1x16x16xbf16>
    %99 = vector.shape_cast %98 : vector<1x16x16xbf16> to vector<16x16xbf16>
    %c240_111 = arith.constant 240 : index
    %c0_112 = arith.constant 0 : index
    %100 = vector.load %arg10[%c240_111, %c0_112] : memref<256x128xf32, #tpu.memory_space<vmem>>, vector<16x128xf32>
    %cst_113 = arith.constant dense<0.000000e+00> : vector<16x128xf32>
    %101 = tpu.matmul %99, %91, %cst_113 {dimension_numbers = #tpu.dot_dimension_numbers<[1], [0], [0], [1], [0, 0, 1, 1], [], []>} : vector<16x16xbf16>, vector<16x128xbf16>, vector<16x128xf32> -> vector<16x128xf32>
    %102 = arith.addf %100, %101 : vector<16x128xf32>
    %c240_114 = arith.constant 240 : index
    %c0_115 = arith.constant 0 : index
    %103 = vector.load %arg10[%c240_114, %c0_115] : memref<256x128xf32, #tpu.memory_space<vmem>>, vector<16x128xf32>
    tpu.vector_store %arg10[%c240_114, %c0_115], %102 {strides = array<i32>} : memref<256x128xf32, #tpu.memory_space<vmem>>, vector<16x128xf32>,
    %c2_116 = arith.constant 2 : index
    %c2_117 = arith.constant 2 : index
    %c0_118 = arith.constant 0 : index
    %c0_119 = arith.constant 0 : index
    %104 = vector.load %arg5[%c2_116, %c2_117, %c0_118, %c0_119] : memref<3x3x16x128xbf16, #tpu.memory_space<vmem>>, vector<1x1x16x128xbf16>
    %105 = vector.shape_cast %104 : vector<1x1x16x128xbf16> to vector<16x128xbf16>
    %106 = vector.extract_strided_slice %80 {offsets = [2, 0, 0], sizes = [14, 16, 16], strides = [1, 1, 1]} : vector<16x16x16xbf16> to vector<14x16x16xbf16>
    %107 = vector.shape_cast %106 : vector<14x16x16xbf16> to vector<224x16xbf16>
    %c0_120 = arith.constant 0 : index
    %c0_121 = arith.constant 0 : index
    %108 = vector.load %arg10[%c0_120, %c0_121] : memref<256x128xf32, #tpu.memory_space<vmem>>, vector<224x128xf32>
    %cst_122 = arith.constant dense<0.000000e+00> : vector<224x128xf32>
    %109 = tpu.matmul %107, %105, %cst_122 {dimension_numbers = #tpu.dot_dimension_numbers<[1], [0], [0], [1], [0, 0, 1, 1], [], []>} : vector<224x16xbf16>, vector<16x128xbf16>, vector<224x128xf32> -> vector<224x128xf32>
    %110 = arith.addf %108, %109 : vector<224x128xf32>
    %c0_123 = arith.constant 0 : index
    %c0_124 = arith.constant 0 : index
    %111 = vector.load %arg10[%c0_123, %c0_124] : memref<256x128xf32, #tpu.memory_space<vmem>>, vector<224x128xf32>
    tpu.vector_store %arg10[%c0_123, %c0_124], %110 {strides = array<i32>} : memref<256x128xf32, #tpu.memory_space<vmem>>, vector<224x128xf32>,
    %112 = vector.shape_cast %82 : vector<2x16x16xbf16> to vector<32x16xbf16>
    %c224_125 = arith.constant 224 : index
    %c0_126 = arith.constant 0 : index
    %113 = vector.load %arg10[%c224_125, %c0_126] : memref<256x128xf32, #tpu.memory_space<vmem>>, vector<32x128xf32>
    %cst_127 = arith.constant dense<0.000000e+00> : vector<32x128xf32>
    %114 = tpu.matmul %112, %105, %cst_127 {dimension_numbers = #tpu.dot_dimension_numbers<[1], [0], [0], [1], [0, 0, 1, 1], [], []>} : vector<32x16xbf16>, vector<16x128xbf16>, vector<32x128xf32> -> vector<32x128xf32>
    %115 = arith.addf %113, %114 : vector<32x128xf32>
    %c224_128 = arith.constant 224 : index
    %c0_129 = arith.constant 0 : index
    %116 = vector.load %arg10[%c224_128, %c0_129] : memref<256x128xf32, #tpu.memory_space<vmem>>, vector<32x128xf32>
    tpu.vector_store %arg10[%c224_128, %c0_129], %115 {strides = array<i32>} : memref<256x128xf32, #tpu.memory_space<vmem>>, vector<32x128xf32>,
    %c0_i32_130 = arith.constant 0 : i32
    %117 = arith.cmpi eq, %arg2, %c0_i32_130 : i32
    %118 = arith.extui %117 : i1 to i32
    %c0_i32_131 = arith.constant 0 : i32
    %119 = arith.cmpi ne, %118, %c0_i32_131 : i32
    scf.if %119 {
      %c0_132 = arith.constant 0 : index
      %c0_133 = arith.constant 0 : index
      %120 = vector.load %arg10[%c0_132, %c0_133] : memref<256x128xf32, #tpu.memory_space<vmem>>, vector<256x128xf32>
      %c0_134 = arith.constant 0 : index
      %c0_135 = arith.constant 0 : index
      %121 = vector.load %arg6[%c0_134, %c0_135] : memref<1x128xf32, #tpu.memory_space<vmem>>, vector<1x128xf32>
      %122 = vector.broadcast %121 : vector<1x128xf32> to vector<256x128xf32>
      %123 = arith.addf %120, %122 : vector<256x128xf32>
      %cst_136 = arith.constant 0.000000e+00 : f32
      %124 = vector.broadcast %cst_136 : f32 to vector<256x128xf32>
      %125 = arith.maximumf %123, %124 : vector<256x128xf32>
      %126 = arith.truncf %125 : vector<256x128xf32> to vector<256x128xbf16>
      %c0_137 = arith.constant 0 : index
      %c0_138 = arith.constant 0 : index
      %127 = vector.load %arg7[%c0_137, %c0_138] : memref<128x128xbf16, #tpu.memory_space<vmem>>, vector<128x128xbf16>
      %cst_139 = arith.constant dense<0.000000e+00> : vector<256x128xf32>
      %128 = tpu.matmul %126, %127, %cst_139 {dimension_numbers = #tpu.dot_dimension_numbers<[1], [0], [0], [1], [0, 0, 1, 1], [], []>} : vector<256x128xbf16>, vector<128x128xbf16>, vector<256x128xf32> -> vector<256x128xf32>
      %c0_140 = arith.constant 0 : index
      %c0_141 = arith.constant 0 : index
      %129 = vector.load %arg8[%c0_140, %c0_141] : memref<1x128xf32, #tpu.memory_space<vmem>>, vector<1x128xf32>
      %130 = vector.broadcast %129 : vector<1x128xf32> to vector<256x128xf32>
      %131 = arith.addf %128, %130 : vector<256x128xf32>
      %132 = vector.shape_cast %131 : vector<256x128xf32> to vector<16x16x128xf32>
      %133 = arith.truncf %132 : vector<16x16x128xf32> to vector<16x16x128xbf16>
      %c0_142 = arith.constant 0 : index
      %c0_143 = arith.constant 0 : index
      %c0_144 = arith.constant 0 : index
      %c0_145 = arith.constant 0 : index
      %134 = vector.load %arg9[%c0_142, %c0_143, %c0_144, %c0_145] : memref<1x16x16x128xbf16, #tpu.memory_space<vmem>>, vector<1x16x16x128xbf16>
      %135 = vector.shape_cast %134 : vector<1x16x16x128xbf16> to vector<16x16x128xbf16>
      %136 = vector.shape_cast %133 : vector<16x16x128xbf16> to vector<1x16x16x128xbf16>
      tpu.vector_store %arg9[%c0_142, %c0_143, %c0_144, %c0_145], %136 {strides = array<i32>} : memref<1x16x16x128xbf16, #tpu.memory_space<vmem>>, vector<1x16x16x128xbf16>,
    } else {
    }
    return
  }
  func.func @transform_0(%arg0: i32, %arg1: i32, %arg2: i32) -> (i32, i32, i32, i32) {
    %c0_i32 = arith.constant 0 : i32
    %c0_i32_0 = arith.constant 0 : i32
    return %arg0, %arg1, %c0_i32, %arg2 : i32, i32, i32, i32
  }
  func.func @transform_1(%arg0: i32, %arg1: i32, %arg2: i32) -> (i32, i32, i32, i32) {
    %c1_i32 = arith.constant 1 : i32
    %0 = arith.addi %arg1, %c1_i32 : i32
    %c8_i32 = arith.constant 8 : i32
    %1 = arith.muli %0, %c8_i32 : i32
    %c0_i32 = arith.constant 0 : i32
    %c0_i32_0 = arith.constant 0 : i32
    return %arg0, %1, %c0_i32, %arg2 : i32, i32, i32, i32
  }
  func.func @transform_2(%arg0: i32, %arg1: i32, %arg2: i32) -> (i32, i32, i32, i32) {
    %c0_i32 = arith.constant 0 : i32
    %c0_i32_0 = arith.constant 0 : i32
    %c0_i32_1 = arith.constant 0 : i32
    %c0_i32_2 = arith.constant 0 : i32
    %c0_i32_3 = arith.constant 0 : i32
    return %c0_i32, %c0_i32_0, %c0_i32_1, %c0_i32_2 : i32, i32, i32, i32
  }
  func.func @transform_3(%arg0: i32, %arg1: i32, %arg2: i32) -> (i32, i32) {
    %c0_i32 = arith.constant 0 : i32
    %c0_i32_0 = arith.constant 0 : i32
    %c0_i32_1 = arith.constant 0 : i32
    return %c0_i32, %c0_i32_0 : i32, i32
  }
  func.func @transform_4(%arg0: i32, %arg1: i32, %arg2: i32) -> (i32, i32) {
    %c0_i32 = arith.constant 0 : i32
    %c0_i32_0 = arith.constant 0 : i32
    %c0_i32_1 = arith.constant 0 : i32
    return %c0_i32, %c0_i32_0 : i32, i32
  }
  func.func @transform_5(%arg0: i32, %arg1: i32, %arg2: i32) -> (i32, i32) {
    %c0_i32 = arith.constant 0 : i32
    %c0_i32_0 = arith.constant 0 : i32
    %c0_i32_1 = arith.constant 0 : i32
    return %c0_i32, %c0_i32_0 : i32, i32
  }
  func.func @transform_6(%arg0: i32, %arg1: i32, %arg2: i32) -> (i32, i32, i32, i32) {
    %c0_i32 = arith.constant 0 : i32
    %c0_i32_0 = arith.constant 0 : i32
    %c0_i32_1 = arith.constant 0 : i32
    return %arg0, %arg1, %c0_i32, %c0_i32_0 : i32, i32, i32, i32
  }
}

</mosaic_0001>

<bundles_post_ra>
// kernel: fcn_head_forward.1
= control target key start
LH: loop header
LB: loop body
LE: loop exit
PB: predicated region body
PF: predicated region fallthrough
CT: control target
= control target key end

     0   :  { %s6034_s21 = smov 0   ;;  %s6036_s22 = smov 0   ;;  %s7540_s0 = inlined_call_operand.vmem [shape: bf16[2,18,18,16], index: 0, kind: input, shape index: {}, may-alias: {0,1}]   ;;  %s7541_s1 = inlined_call_operand.vmem [shape: bf16[2,18,18,16], index: 1, kind: input, shape index: {}, may-alias: {0,1}]   ;;  %s7542_s2 = inlined_call_operand.vmem [shape: bf16[3,3,16,128], index: 2, kind: input, shape index: {}]   ;;  %s7543_s3 = inlined_call_operand.vmem [shape: f32[1,128], index: 3, kind: input, shape index: {}]   ;;  %s7544_s4 = inlined_call_operand.vmem [shape: bf16[128,128], index: 4, kind: input, shape index: {}]   ;;  %s7545_s5 = inlined_call_operand.vmem [shape: f32[1,128], index: 5, kind: input, shape index: {}]   ;;  %s7546_s6 = inlined_call_operand.vmem [shape: bf16[2,16,16,128], index: 6, kind: output, shape index: {}]  }
   0x1   :  { %s6038_s23 = smov 0  }
   0x2 LB: > { %s35_s24 = sadd.s32 1, %s5991_s22  ;;  %p4834_p0 = scmp.ge.s32.totalorder %s5995_s23, 1  ;;  %s5995_s23 = sphi %s6038_s23, %s16_s23   ;;  %s5991_s22 = sphi %s6036_s22, %s7599_s22   ;;  %s5987_s21 = sphi %s6034_s21, %s7598_s21  }
   0x3   : > { %p37_p1 = scmp.ge.s32.totalorder %s35_s24, 2  ;;  %p287_p2 = scmp.lt.s32.totalorder %s5995_s23, 3 }
   0x5   : > { %s7601_s24 = smov (%p37_p1, %s35_s24), 0  ;;  %p288_p3 = pnand %p4834_p0, %p287_p2 }
   0x7   : > { %291 = sbr.rel (%p288_p3) target bundleno = 875 (0x36b), region = 44 }
   0xe   : > { %v5934_v0 = vld [vmem:[%s7542_s2] sm:$0xff]   ;;  %p356_p4 = scmp.lt.s32.totalorder %s5987_s21, 1  ;;  %v7547_v1 = vmov 0.0   ;;  %vm596_vm0 = vcmask 130048   ;;  %v5939_v2 = vld [vmem:[%s7542_s2 + $0x18] sm:$0xff]   ;;  %v5952_v6 = vld [vmem:[%s7542_s2 + $0x30] sm:$0xff]  }
   0xf   : > { %5903 = vmatprep.subr.bf16.mxu1 %v5934_v0  ;;  %5441 = vmatprep.subr.bf16.mxu0 %v5934_v0  ;;  %vm5998_vm1 = vmmov 0   ;;  %v5954_v21 = vld [vmem:[%s7542_s2 + $0x8] sm:$0xff]   ;;  %vm1541_vm2 = vsmask.f32 3328  ;;  %vm1542_vm3 = vsmask.f32 7440 }
  0x10   : > { %s7603_s21 = smov (!%p356_p4, %s5987_s21), 1  ;;  %5904 = vmatpush3.bf16.msra.mxu1 %v5934_v0  ;;  %5442 = vmatpush3.bf16.msra.mxu0 %v5934_v0  ;;  %vm6210_vm4 = vmor %vm1541_vm2, %vm1542_vm3  ;;  %vm2549_vm5 = vsmask.f32 7424  ;;  %vm3074_vm6 = vcmask 1042432   ;;  %vm3075_vm7 = vcmask 1046532   ;;  %vm3810_vm9 = vcmask 1046528  }
  0x11   : > { %s5905_s27 = smul.u32 216, %s7603_s21  ;;  %5475 = vmatprep.subr.bf16.mxu1 %v7547_v1  ;;  %5537 = vmatprep.subr.bf16.mxu0 %v7547_v1  ;;  %vm6563_vm8 = vmor %vm3074_vm6, %vm3075_vm7 }
  0x13   : > { %s6063_s30 = scalar_lea.vmem %s7540_s0, %s5905_s27  ;;  %s5129_s11 = sadd.s32 192, %s5905_s27 }
  0x14   : > { %v5935_v3 = vld [vmem:[%s6063_s30] sm:$0xff]   ;;  %v5937_v5 = vld [vmem:[%s6063_s30 + $0xc] sm:$0xff]   ;;  %v5940_v8 = vld [vmem:[%s6063_s30 + $0x18] sm:$0xff]   ;;  %s6109_s14 = scalar_lea.vmem %s7541_s1, %s5129_s11 }
  0x15   : > { %v6070_v4 = vld [vmem:[%s6063_s30 + $0x60] sm:$0xff]   ;;  %5443 = vmatprep.mubr.msk.bf16.mxu0 %vm596_vm0, %v5935_v3  ;;  %v6080_v7 = vld [vmem:[%s6063_s30 + $0x6c] sm:$0xff]   ;;  %v6087_v9 = vld [vmem:[%s6063_s30 + $0x78] sm:$0xff]  }
  0x16   : > { %5459 = vmatprep.mubr.msk.bf16.mxu1 %vm596_vm0, %v6070_v4  ;;  %5444 = vmatmul.mubr.msk.bf16.vlgmr.msra.gmra.mrb[0].mxu0 %vm596_vm0, %v5937_v5  ;;  %v5942_v10 = vld [vmem:[%s6063_s30 + $0x24] sm:$0xff]   ;;  %v5944_v12 = vld [vmem:[%s6063_s30 + $0x30] sm:$0xff]   ;;  %v5946_v14 = vld [vmem:[%s6063_s30 + $0x3c] sm:$0xff]  }
  0x17   : > { %5460 = vmatmul.mubr.msk.bf16.vlgmr.msra.gmra.mrb[0].mxu1 %vm596_vm0, %v6080_v7  ;;  %5538 = vmatpush3.bf16.msra.mxu0 %v5939_v2  ;;  %v6094_v11 = vld [vmem:[%s6063_s30 + $0x84] sm:$0xff]   ;;  %v6098_v13 = vld [vmem:[%s6063_s30 + $0x90] sm:$0xff]   ;;  %v6113_v15 = vld [vmem:[%s6063_s30 + $0x9c] sm:$0xff]  }
  0x18   : > { %5476 = vmatpush3.bf16.msra.mxu1 %v5939_v2  ;;  %5447 = vmatprep.mubr.msk.bf16.mxu0 %vm596_vm0, %v5940_v8  ;;  %v6116_v16 = vld [vmem:[%s6063_s30 + $0x48] sm:$0xff]   ;;  %v6129_v18 = vld [vmem:[%s6063_s30 + $0x54] sm:$0xff]   ;;  %v6143_v20 = vld [vmem:[%s6109_s14] sm:$0xff]  }
  0x19   : > { %5463 = vmatprep.mubr.msk.bf16.mxu1 %vm596_vm0, %v6087_v9  ;;  %5573 = vmatprep.subr.bf16.mxu1 %v5952_v6  ;;  %v6119_v17 = vld [vmem:[%s6063_s30 + $0xa8] sm:$0xff]   ;;  %v6132_v19 = vld [vmem:[%s6063_s30 + $0xb4] sm:$0xff]   ;;  %v1484_v22 = vld [vmem:[%s6063_s30] sm:$0xf] }
  0x1a   : > { %5543 = vmatprep.subr.bf16.mxu0 %v5952_v6  ;;  %v1485_v23 = vld [vmem:[%s6063_s30 + $0x4] sm:$0xf]  ;;  %v1545_v24 = vshrl.u32 %v1484_v22, 16  ;;  %v1548_v25 = vshll.u32 %v1484_v22, 16  ;;  %v1487_v26 = vld [vmem:[%s6063_s30 + $0xc] sm:$0xf] }
  0x1b   : > { %v1488_v27 = vld [vmem:[%s6063_s30 + $0x10] sm:$0xf]  ;;  %v1554_v28 = vshll.u32 %v1485_v23, 16  ;;  %v1558_v29 = vshrl.u32 %v1485_v23, 16  ;;  %v1569_v30 = vshrl.u32 %v1487_v26, 16  ;;  %v1572_v31 = vshll.u32 %v1487_v26, 16 }
  0x1c   : > { %v1578_v32 = vshll.u32 %v1488_v27, 16  ;;  %v1582_v33 = vshrl.u32 %v1488_v27, 16  ;;  %v1490_v34 = vld [vmem:[%s6063_s30 + $0x18] sm:$0xf]  ;;  %v1547_v35 = vrot.slane %v1545_v24, 4  ;;  %v1550_v36 = vrot.slane %v1548_v25, 5 }
  0x1d   : > { %v6181_v37 = vrot.slane %v1554_v28, 5  ;;  %v1560_v38 = vrot.slane %v1558_v29, 4  ;;  %v1486_v39 = vld [vmem:[%s6063_s30 + $0x8] sm:$0x1]  ;;  %v1489_v40 = vld [vmem:[%s6063_s30 + $0x14] sm:$0x1] }
  0x1e   : > { %5448 = vmatmul.mubr.msk.bf16.gmra.mrb[4].mxu0 %vm596_vm0, %v5942_v10  ;;  %v1491_v41 = vld [vmem:[%s6063_s30 + $0x1c] sm:$0xf]  ;;  %v1571_v42 = vrot.slane %v1569_v30, 4  ;;  %v1574_v43 = vrot.slane %v1572_v31, 5  ;;  %v6191_v44 = vrot.slane %v1578_v32, 5  ;;  %v1593_v45 = vshrl.u32 %v1490_v34, 16 }
  0x1f   : > { %5464 = vmatmul.mubr.msk.bf16.gmra.mrb[4].mxu1 %vm596_vm0, %v6094_v11  ;;  %5451 = vmatprep.mubr.msk.bf16.mxu0 %vm596_vm0, %v5944_v12  ;;  %v1584_v46 = vrot.slane %v1582_v33, 4  ;;  %v1596_v47 = vshll.u32 %v1490_v34, 16  ;;  %v1602_v48 = vshll.u32 %v1491_v41, 16  ;;  %v1606_v49 = vshrl.u32 %v1491_v41, 16  ;;  %v1492_v58 = vld [vmem:[%s6063_s30 + $0x20] sm:$0x1] }
  0x20   : > { %5467 = vmatprep.mubr.msk.bf16.mxu1 %vm596_vm0, %v6098_v13  ;;  %v1551_v50 = vor.u32 %v1550_v36, %v1547_v35  ;;  %v1561_v51 = vor.u32 %v1560_v38, %v6181_v37  ;;  %v1564_v52 = vshll.u32 %v1486_v39, 16  ;;  %v1588_v53 = vshll.u32 %v1489_v40, 16  ;;  %v1493_v61 = vld [vmem:[%s6063_s30 + $0x24] sm:$0xf]  ;;  %v1494_v62 = vld [vmem:[%s6063_s30 + $0x28] sm:$0xf] }
  0x21   : > { %v1575_v54 = vor.u32 %v1574_v43, %v1571_v42  ;;  %v1585_v55 = vor.u32 %v1584_v46, %v6191_v44  ;;  %v1595_v56 = vrot.slane %v1593_v45, 4  ;;  %v1598_v57 = vrot.slane %v1596_v47, 5  ;;  %v1495_v24 = vld [vmem:[%s6063_s30 + $0x2c] sm:$0x1]  ;;  %v1499_v38 = vld [vmem:[%s6063_s30 + $0x3c] sm:$0xf] }
  0x22   : > { %v6198_v59 = vrot.slane %v1602_v48, 5  ;;  %v1608_v60 = vrot.slane %v1606_v49, 4  ;;  %v1552_v63 = vrot.slane %v1551_v50, 4  ;;  %v1562_v0 = vrot.slane %v1561_v51, 4  ;;  %v1500_v49 = vld [vmem:[%s6063_s30 + $0x40] sm:$0xf] }
  0x23   : > { %v1566_v2 = vrot.slane %v1564_v52, 5  ;;  %v1590_v3 = vrot.slane %v1588_v53, 5  ;;  %v1617_v22 = vshrl.u32 %v1493_v61, 16  ;;  %v1620_v23 = vshll.u32 %v1493_v61, 16 }
  0x24   : > { %v1626_v25 = vshll.u32 %v1494_v62, 16  ;;  %v1630_v26 = vshrl.u32 %v1494_v62, 16  ;;  %v1557_v29 = vsel %vm6210_vm4, %v1552_v63, %v6181_v37  ;;  %v1636_v41 = vshll.u32 %v1495_v24, 16 }
  0x25   : > { %v1567_v30 = vsel %vm6210_vm4, %v1562_v0, %v1566_v2  ;;  %v1619_v39 = vrot.slane %v1617_v22, 4  ;;  %v1622_v40 = vrot.slane %v1620_v23, 5  ;;  %v1668_v50 = vshll.u32 %v1499_v38, 16  ;;  %v1505_v0 = vld [vmem:[%s6063_s30 + $0x54] sm:$0xf] }
  0x26   : > { %5452 = vmatmul.mubr.msk.bf16.gmra.mrb[8].mxu0 %vm596_vm0, %v5946_v14  ;;  %v6240_v42 = vrot.slane %v1626_v25, 5  ;;  %v1632_v43 = vrot.slane %v1630_v26, 4  ;;  %v4914_v51 = vcombine.low %v1557_v29, %v1567_v30  ;;  %v1674_v63 = vshll.u32 %v1500_v49, 16  ;;  %v1506_v2 = vld [vmem:[%s6063_s30 + $0x58] sm:$0xf] }
  0x27   : > { %5468 = vmatmul.mubr.msk.bf16.gmra.mrb[8].mxu1 %vm596_vm0, %v6113_v15  ;;  %5455 = vmatprep.mubr.msk.bf16.mxu0 %vm596_vm0, %v6116_v16  ;;  %v1716_v22 = vshll.u32 %v1505_v0, 16  ;;  %v1722_v23 = vshll.u32 %v1506_v2, 16  ;;  %v1726_v24 = vshrl.u32 %v1506_v2, 16  ;;  %v1501_v30 = vld [vmem:[%s6063_s30 + $0x44] sm:$0x1] }
  0x28   : > { %5471 = vmatprep.mubr.msk.bf16.mxu1 %vm596_vm0, %v6119_v17 }
  0x2e   : > { %5456 = vmatmul.mubr.msk.bf16.gmra.mrb[12].mxu0 %vm596_vm0, %v6129_v18 }
  0x2f   : > { %5472 = vmatmul.mubr.msk.bf16.gmra.mrb[12].mxu1 %vm596_vm0, %v6132_v19  ;;  %5539 = vmatprep.mubr.msk.bf16.mxu0 %vm5998_vm1, %v7547_v1 }
  0x30   : > { %5477 = vmatprep.mubr.msk.bf16.mxu1 %vm5998_vm1, %v7547_v1 }
  0x36   : > { %5540 = vmatmul.mubr.msk.bf16.vlgmr.msra.gmra.mrb[16].mxu0 %vm596_vm0, %v6143_v20 }
  0x37   : > { %5478 = vmatmul.mubr.msk.bf16.vlgmr.msra.gmra.mrb[16].mxu1 %vm596_vm0, %v5937_v5  ;;  %5544 = vmatpush3.bf16.msra.mxu0 %v5952_v6  ;;  %v1496_v5 = vld [vmem:[%s6063_s30 + $0x30] sm:$0xf] }
  0x38   : > { %5574 = vmatpush3.bf16.msra.mxu1 %v5952_v6  ;;  %5481 = vmatprep.mubr.msk.bf16.mxu1 %vm5998_vm1, %v7547_v1  ;;  %v1641_v27 = vshrl.u32 %v1496_v5, 16  ;;  %v1644_v28 = vshll.u32 %v1496_v5, 16  ;;  %v1670_v5 = vrot.slane %v1668_v50, 5 }
  0x39   : > { %5545 = vmatprep.mubr.msk.bf16.mxu0 %vm596_vm0, %v5940_v8  ;;  %5579 = vmatprep.subr.bf16.mxu0 %v5954_v21 }
  0x3a   : > { %5613 = vmatprep.subr.bf16.mxu1 %v7547_v1  ;;  %v1643_v45 = vrot.slane %v1641_v27, 4  ;;  %v1646_v46 = vrot.slane %v1644_v28, 5 }
  0x3c   : > { %v1647_v61 = vor.u32 %v1646_v46, %v1643_v45 }
  0x3e   : > { %5546 = vmatmul.mubr.msk.bf16.vlgmr.msra.gmra.mrb[20].mxu0 %vm596_vm0, %v5942_v10  ;;  %v1648_v27 = vrot.slane %v1647_v61, 4 }
  0x3f   : > { %5482 = vmatmul.mubr.msk.bf16.gmra.mrb[20].mxu1 %vm596_vm0, %v5940_v8  ;;  %5549 = vmatprep.mubr.msk.bf16.mxu0 %vm596_vm0, %v5944_v12  ;;  %v1576_v8 = vrot.slane %v1575_v54, 4 }
  0x40   : > { %5485 = vmatprep.mubr.msk.bf16.mxu1 %vm5998_vm1, %v7547_v1  ;;  %5580 = vmatpush3.bf16.msra.mxu0 %v5954_v21  ;;  %v1609_v21 = vor.u32 %v1608_v60, %v6198_v59  ;;  %v1633_v60 = vor.u32 %v1632_v43, %v6240_v42  ;;  %v1728_v43 = vrot.slane %v1726_v24, 4 }
  0x41   : > { %5675 = vmatprep.subr.bf16.mxu0 %v7547_v1  ;;  %v1581_v33 = vsel %vm6210_vm4, %v1576_v8, %v6191_v44  ;;  %v1498_v44 = vld [vmem:[%s6063_s30 + $0x38] sm:$0x1]  ;;  %v1678_v8 = vshrl.u32 %v1500_v49, 16  ;;  %v1508_v49 = vld [vmem:[%s6063_s30 + $0x60] sm:$0xf] }
  0x42   : > { %v6234_v37 = vrot.slane %v1609_v21, 4  ;;  %v1660_v62 = vshll.u32 %v1498_v44, 16  ;;  %v1713_v21 = vshrl.u32 %v1505_v0, 16  ;;  %v1634_v26 = vrot.slane %v1633_v60, 4 }
  0x44   : > { %v1662_v28 = vrot.slane %v1660_v62, 5  ;;  %v1737_v62 = vshrl.u32 %v1508_v49, 16 }
  0x46   : > { %5550 = vmatmul.mubr.msk.bf16.gmra.mrb[24].mxu0 %vm596_vm0, %v5946_v14 }
  0x47   : > { %5486 = vmatmul.mubr.msk.bf16.gmra.mrb[24].mxu1 %vm596_vm0, %v5942_v10  ;;  %5553 = vmatprep.mubr.msk.bf16.mxu0 %vm596_vm0, %v6116_v16  ;;  %v1586_v10 = vrot.slane %v1585_v55, 4  ;;  %v1623_v55 = vor.u32 %v1622_v40, %v1619_v39  ;;  %v1715_v39 = vrot.slane %v1713_v21, 4  ;;  %v1718_v40 = vrot.slane %v1716_v22, 5 }
  0x48   : > { %5489 = vmatprep.mubr.msk.bf16.mxu1 %vm5998_vm1, %v7547_v1 }
  0x49   : > { %v1591_v34 = vsel %vm6210_vm4, %v1586_v10, %v1590_v3  ;;  %v1624_v25 = vrot.slane %v1623_v55, 4  ;;  %v1719_v60 = vor.u32 %v1718_v40, %v1715_v39 }
  0x4a   : > { %v6248_v52 = vcombine.low %v1581_v33, %v1591_v34  ;;  %v1680_v33 = vrot.slane %v1678_v8, 4  ;;  %v1504_v34 = vld [vmem:[%s6063_s30 + $0x50] sm:$0x1] }
  0x4b   : > { %v1629_v45 = vsel %vm6210_vm4, %v1624_v25, %v6240_v42  ;;  %v6303_v42 = vld [vmem:[%s7542_s2 + $0x20] sm:$0xff]   ;;  %v1720_v24 = vrot.slane %v1719_v60, 4 }
  0x4e   : > { %5554 = vmatmul.mubr.msk.bf16.gmra.mrb[28].mxu0 %vm596_vm0, %v6129_v18 }
  0x4f   : > { %5490 = vmatmul.mubr.msk.bf16.gmra.mrb[28].mxu1 %vm596_vm0, %v5944_v12  ;;  %5557 = vmatprep.mubr.msk.bf16.mxu0 %vm596_vm0, %v6070_v4  ;;  %v1599_v12 = vor.u32 %v1598_v57, %v1595_v56  ;;  %v6258_v56 = vrot.slane %v1636_v41, 5  ;;  %v1502_v57 = vld [vmem:[%s6063_s30 + $0x48] sm:$0xf]  ;;  %v6280_v41 = vrot.slane %v1722_v23, 5  ;;  %v1514_v23 = vld [vmem:[%s6063_s30 + $0x78] sm:$0xf] }
  0x50   : > { %5493 = vmatprep.mubr.msk.bf16.mxu1 %vm5998_vm1, %v7547_v1  ;;  %v1689_v10 = vshrl.u32 %v1502_v57, 16 }
  0x51   : > { %v6227_v35 = vrot.slane %v1599_v12, 4  ;;  %v1692_v12 = vshll.u32 %v1502_v57, 16  ;;  %v1639_v46 = vsel %vm6210_vm4, %v1634_v26, %v6258_v56  ;;  %v1708_v57 = vshll.u32 %v1504_v34, 16  ;;  %v1510_v26 = vld [vmem:[%s6063_s30 + $0x68] sm:$0x1] }
  0x52   : > { %v1729_v61 = vor.u32 %v1728_v43, %v6280_v41  ;;  %v6318_v0 = vcombine.low %v1629_v45, %v1639_v46  ;;  %v1756_v43 = vshll.u32 %v1510_v26, 16  ;;  %v1725_v45 = vsel %vm6210_vm4, %v1720_v24, %v6280_v41  ;;  %v1513_v41 = vld [vmem:[%s6063_s30 + $0x74] sm:$0x1] }
  0x53   : > { %v1605_v53 = vsel %vm6210_vm4, %v6227_v35, %v6198_v59  ;;  %v1691_v35 = vrot.slane %v1689_v10, 4  ;;  %v1511_v10 = vld [vmem:[%s6063_s30 + $0x6c] sm:$0xf]  ;;  %v1710_v21 = vrot.slane %v1708_v57, 5 }
  0x54   : > { %v1730_v25 = vrot.slane %v1729_v61, 4 }
  0x56   : > { %5558 = vmatmul.mubr.msk.bf16.gmra.mrb[32].mxu0 %vm596_vm0, %v6080_v7 }
  0x57   : > { %5494 = vmatmul.mubr.msk.bf16.gmra.mrb[32].mxu1 %vm596_vm0, %v5946_v14  ;;  %5561 = vmatprep.mubr.msk.bf16.mxu0 %vm596_vm0, %v6087_v9  ;;  %v1612_v14 = vshll.u32 %v1492_v58, 16  ;;  %v1503_v58 = vld [vmem:[%s6063_s30 + $0x4c] sm:$0xf] }
  0x58   : > { %5497 = vmatprep.mubr.msk.bf16.mxu1 %vm5998_vm1, %v7547_v1 }
  0x59   : > { %v6229_v36 = vrot.slane %v1612_v14, 5  ;;  %v1698_v14 = vshll.u32 %v1503_v58, 16 }
  0x5b   : > { %v1615_v54 = vsel %vm6210_vm4, %v6234_v37, %v6229_v36  ;;  %v6277_v36 = vrot.slane %v1698_v14, 5  ;;  %v1507_v37 = vld [vmem:[%s6063_s30 + $0x5c] sm:$0x1] }
  0x5c   : > { %v6282_v44 = vcombine.low %v1605_v53, %v1615_v54  ;;  %v1509_v54 = vld [vmem:[%s6063_s30 + $0x64] sm:$0xf] }
  0x5d   : > { %v1746_v2 = vshll.u32 %v1509_v54, 16 }
  0x5e   : > { %5562 = vmatmul.mubr.msk.bf16.gmra.mrb[36].mxu0 %vm596_vm0, %v6094_v11 }
  0x5f   : > { %5498 = vmatmul.mubr.msk.bf16.gmra.mrb[36].mxu1 %vm596_vm0, %v6116_v16  ;;  %5565 = vmatprep.mubr.msk.bf16.mxu0 %vm596_vm0, %v6098_v13  ;;  %v1497_v16 = vld [vmem:[%s6063_s30 + $0x34] sm:$0xf] }
  0x60   : > { %5501 = vmatprep.mubr.msk.bf16.mxu1 %vm5998_vm1, %v7547_v1  ;;  %v1650_v31 = vshll.u32 %v1497_v16, 16  ;;  %v1654_v32 = vshrl.u32 %v1497_v16, 16  ;;  %v1702_v16 = vshrl.u32 %v1503_v58, 16  ;;  %v1732_v58 = vshll.u32 %v1507_v37, 16 }
  0x62   : > { %v6245_v47 = vrot.slane %v1650_v31, 5  ;;  %v1656_v48 = vrot.slane %v1654_v32, 4  ;;  %v6274_v32 = vrot.slane %v1674_v63, 5  ;;  %v1740_v63 = vshll.u32 %v1508_v49, 16 }
  0x63   : > { %v1734_v22 = vrot.slane %v1732_v58, 5 }
  0x64   : > { %v1657_v3 = vor.u32 %v1656_v48, %v6245_v47  ;;  %v1684_v48 = vshll.u32 %v1501_v30, 16  ;;  %v1681_v53 = vor.u32 %v1680_v33, %v6274_v32  ;;  %v1515_v33 = vld [vmem:[%s6063_s30 + $0x7c] sm:$0xf] }
  0x65   : > { %v1798_v49 = vshrl.u32 %v1515_v33, 16 }
  0x66   : > { %5566 = vmatmul.mubr.msk.bf16.gmra.mrb[40].mxu0 %vm596_vm0, %v6113_v15  ;;  %v1658_v29 = vrot.slane %v1657_v3, 4  ;;  %v1750_v3 = vshrl.u32 %v1509_v54, 16  ;;  %v1686_v8 = vrot.slane %v1684_v48, 5  ;;  %v1794_v48 = vshll.u32 %v1515_v33, 16 }
  0x67   : > { %5502 = vmatmul.mubr.msk.bf16.gmra.mrb[40].mxu1 %vm596_vm0, %v6129_v18  ;;  %5569 = vmatprep.mubr.msk.bf16.mxu0 %vm596_vm0, %v6119_v17  ;;  %v1665_v18 = vshrl.u32 %v1499_v38, 16  ;;  %v1704_v38 = vrot.slane %v1702_v16, 4  ;;  %v1800_v61 = vrot.slane %v1798_v49, 4 }
  0x68   : > { %5505 = vmatprep.mubr.msk.bf16.mxu1 %vm5998_vm1, %v7547_v1  ;;  %v1663_v50 = vsel %vm6210_vm4, %v1658_v29, %v1662_v28  ;;  %v1742_v28 = vrot.slane %v1740_v63, 5  ;;  %v6334_v29 = vrot.slane %v1746_v2, 5  ;;  %v1752_v30 = vrot.slane %v1750_v3, 4  ;;  %v1518_v63 = vld [vmem:[%s6063_s30 + $0x88] sm:$0xf] }
  0x69   : > { %v1667_v59 = vrot.slane %v1665_v18, 4  ;;  %v1653_v18 = vsel %vm6210_vm4, %v1648_v27, %v6245_v47  ;;  %v1705_v56 = vor.u32 %v1704_v38, %v6277_v36  ;;  %v6309_v47 = vld [vmem:[%s7542_s2 + $0x38] sm:$0xff]   ;;  %v1739_v27 = vrot.slane %v1737_v62, 4  ;;  %v1517_v62 = vld [vmem:[%s6063_s30 + $0x84] sm:$0xf] }
  0x6a   : > { %v1788_v38 = vshll.u32 %v1514_v23, 16  ;;  %v6366_v60 = vrot.slane %v1794_v48, 5  ;;  %v1818_v24 = vshll.u32 %v1518_v63, 16 }
  0x6b   : > { %v1671_v31 = vor.u32 %v1670_v5, %v1667_v59  ;;  %v6322_v59 = vcombine.low %v1653_v18, %v1663_v50  ;;  %v1706_v16 = vrot.slane %v1705_v56, 4  ;;  %v1743_v46 = vor.u32 %v1742_v28, %v1739_v27  ;;  %v1516_v56 = vld [vmem:[%s6063_s30 + $0x80] sm:$0x1] }
  0x6c   : > { %v1753_v18 = vor.u32 %v1752_v30, %v6334_v29  ;;  %v1801_v26 = vor.u32 %v1800_v61, %v6366_v60  ;;  %v1804_v27 = vshll.u32 %v1516_v56, 16 }
  0x6d   : > { %v1711_v40 = vsel %vm6210_vm4, %v1706_v16, %v1710_v21  ;;  %v1744_v3 = vrot.slane %v1743_v46, 4  ;;  %v1519_v46 = vld [vmem:[%s6063_s30 + $0x8c] sm:$0x1] }
  0x6e   : > { %5570 = vmatmul.mubr.msk.bf16.gmra.mrb[44].mxu0 %vm596_vm0, %v6132_v19 }
  0x6f   : > { %5506 = vmatmul.mubr.msk.bf16.gmra.mrb[44].mxu1 %vm596_vm0, %v6070_v4  ;;  %5581 = vmatprep.mubr.msk.bf16.mxu0 %vm596_vm0, %v4914_v51  ;;  %v1694_v4 = vrot.slane %v1692_v12, 5  ;;  %v6296_v51 = vrot.slane %v1671_v31, 4  ;;  %v1512_v12 = vld [vmem:[%s6063_s30 + $0x70] sm:$0xf]  ;;  %v1761_v31 = vshrl.u32 %v1511_v10, 16 }
  0x70   : > { %5509 = vmatprep.mubr.msk.bf16.mxu1 %vm5998_vm1, %v7547_v1  ;;  %v1770_v34 = vshll.u32 %v1512_v12, 16 }
  0x71   : > { %v1695_v55 = vor.u32 %v1694_v4, %v1691_v35  ;;  %v1677_v5 = vsel %vm6210_vm4, %v6296_v51, %v6274_v32  ;;  %v1764_v32 = vshll.u32 %v1511_v10, 16  ;;  %v1774_v35 = vshrl.u32 %v1512_v12, 16  ;;  %v1520_v10 = vld [vmem:[%s6063_s30 + $0x90] sm:$0xf] }
  0x72   : > { %v1785_v4 = vshrl.u32 %v1514_v23, 16  ;;  %v1763_v50 = vrot.slane %v1761_v31, 4  ;;  %v1754_v12 = vrot.slane %v1753_v18, 4  ;;  %v1812_v23 = vshll.u32 %v1517_v62, 16 }
  0x73   : > { %v1696_v14 = vrot.slane %v1695_v55, 4  ;;  %v1766_v51 = vrot.slane %v1764_v32, 5  ;;  %v1790_v55 = vrot.slane %v1788_v38, 5  ;;  %v1833_v28 = vshrl.u32 %v1520_v10, 16 }
  0x74   : > { %v1787_v54 = vrot.slane %v1785_v4, 4  ;;  %v1836_v30 = vshll.u32 %v1520_v10, 16  ;;  %v1749_v31 = vsel %vm6210_vm4, %v1744_v3, %v6334_v29  ;;  %v1526_v3 = vld [vmem:[%s6063_s30 + $0xa8] sm:$0xf] }
  0x75   : > { %v1701_v39 = vsel %vm6210_vm4, %v1696_v14, %v6277_v36  ;;  %v1735_v36 = vsel %vm6210_vm4, %v1730_v25, %v1734_v22  ;;  %v1767_v14 = vor.u32 %v1766_v51, %v1763_v50  ;;  %v1809_v22 = vshrl.u32 %v1517_v62, 16  ;;  %v1523_v51 = vld [vmem:[%s6063_s30 + $0x9c] sm:$0xf] }
  0x76   : > { %5582 = vmatmul.mubr.msk.bf16.vlgmr.msra.gmra.mrb[48].mxu0 %vm596_vm0, %v6248_v52  ;;  %v6364_v58 = vcombine.low %v1701_v39, %v1711_v40  ;;  %v6370_v2 = vcombine.low %v1725_v45, %v1735_v36  ;;  %v1791_v21 = vor.u32 %v1790_v55, %v1787_v54  ;;  %v1822_v25 = vshrl.u32 %v1518_v63, 16  ;;  %v1522_v54 = vld [vmem:[%s6063_s30 + $0x98] sm:$0x1]  ;;  %v1524_v55 = vld [vmem:[%s6063_s30 + $0xa0] sm:$0xf] }
  0x77   : > { %5510 = vmatmul.mubr.msk.bf16.gmra.mrb[48].mxu1 %vm596_vm0, %v6080_v7  ;;  %5585 = vmatprep.mubr.msk.bf16.mxu0 %vm596_vm0, %v6282_v44  ;;  %v1682_v7 = vrot.slane %v1681_v53, 4  ;;  %v6359_v53 = vrot.slane %v1770_v34, 5  ;;  %v1768_v4 = vrot.slane %v1767_v14, 4  ;;  %v1814_v39 = vrot.slane %v1812_v23, 5 }
  0x78   : > { %5513 = vmatprep.mubr.msk.bf16.mxu1 %vm5998_vm1, %v7547_v1  ;;  %5676 = vmatpush3.bf16.msra.mxu0 %v6303_v42  ;;  %v1792_v38 = vrot.slane %v1791_v21, 4  ;;  %v6389_v40 = vrot.slane %v1818_v24, 5  ;;  %v1824_v29 = vrot.slane %v1822_v25, 4  ;;  %v1806_v45 = vrot.slane %v1804_v27, 5 }
  0x79   : > { %5681 = vmatprep.subr.bf16.mxu0 %v6309_v47  ;;  %v1687_v37 = vsel %vm6210_vm4, %v1682_v7, %v1686_v8  ;;  %v1758_v7 = vrot.slane %v1756_v43, 5  ;;  %v1780_v8 = vshll.u32 %v1513_v41, 16  ;;  %v1802_v43 = vrot.slane %v1801_v26, 4 }
  0x7a   : > { %v6362_v57 = vcombine.low %v1677_v5, %v1687_v37  ;;  %v1521_v5 = vld [vmem:[%s6063_s30 + $0x94] sm:$0xf]  ;;  %v1811_v37 = vrot.slane %v1809_v22, 4  ;;  %v1835_v48 = vrot.slane %v1833_v28, 4  ;;  %v1838_v49 = vrot.slane %v1836_v30, 5 }
  0x7b   : > { %v1782_v32 = vrot.slane %v1780_v8, 5  ;;  %v1842_v33 = vshll.u32 %v1521_v5, 16  ;;  %v1846_v34 = vshrl.u32 %v1521_v5, 16  ;;  %v1773_v41 = vsel %vm6210_vm4, %v1768_v4, %v6359_v53 }
  0x7c   : > { %v1797_v56 = vsel %vm6210_vm4, %v1792_v38, %v6366_v60  ;;  %v1815_v61 = vor.u32 %v1814_v39, %v1811_v37  ;;  %v1825_v62 = vor.u32 %v1824_v29, %v6389_v40  ;;  %v1828_v63 = vshll.u32 %v1519_v46, 16  ;;  %v1529_v38 = vld [vmem:[%s6063_s30 + $0xb4] sm:$0xf] }
  0x7d   : > { %v6394_v18 = vrot.slane %v1842_v33, 5  ;;  %v1848_v50 = vrot.slane %v1846_v34, 4  ;;  %v1839_v8 = vor.u32 %v1838_v49, %v1835_v48  ;;  %v1857_v10 = vshrl.u32 %v1523_v51, 16 }
  0x7e   : > { %5586 = vmatmul.mubr.msk.bf16.gmra.mrb[52].mxu0 %vm596_vm0, %v6318_v0  ;;  %v1852_v14 = vshll.u32 %v1522_v54, 16  ;;  %v1870_v21 = vshrl.u32 %v1524_v55, 16  ;;  %v1881_v5 = vshrl.u32 %v1526_v3, 16  ;;  %v1884_v22 = vshll.u32 %v1526_v3, 16 }
  0x7f   : > { %5514 = vmatmul.mubr.msk.bf16.gmra.mrb[52].mxu1 %vm596_vm0, %v6087_v9  ;;  %5589 = vmatprep.mubr.msk.bf16.mxu0 %vm596_vm0, %v6322_v59  ;;  %v1776_v9 = vrot.slane %v1774_v35, 4  ;;  %v1759_v35 = vsel %vm6210_vm4, %v1754_v12, %v1758_v7  ;;  %v1527_v7 = vld [vmem:[%s6063_s30 + $0xac] sm:$0xf]  ;;  %v1860_v12 = vshll.u32 %v1523_v51, 16  ;;  %v1849_v60 = vor.u32 %v1848_v50, %v6394_v18  ;;  %v1528_v50 = vld [vmem:[%s6063_s30 + $0xb0] sm:$0x1] }
  0x80   : > { %5517 = vmatprep.mubr.msk.bf16.mxu1 %vm5998_vm1, %v7547_v1  ;;  %v6392_v36 = vcombine.low %v1749_v31, %v1759_v35  ;;  %v1890_v23 = vshll.u32 %v1527_v7, 16  ;;  %v1894_v24 = vshrl.u32 %v1527_v7, 16  ;;  %v1826_v26 = vrot.slane %v1825_v62, 4  ;;  %v1525_v31 = vld [vmem:[%s6063_s30 + $0xa4] sm:$0x1] }
  0x81   : > { %v1777_v16 = vor.u32 %v1776_v9, %v6359_v53  ;;  %v1807_v53 = vsel %vm6210_vm4, %v1802_v43, %v1806_v45  ;;  %v1830_v27 = vrot.slane %v1828_v63, 5  ;;  %v1840_v30 = vrot.slane %v1839_v8, 4  ;;  %v1530_v45 = vld [vmem:[%s6063_s30 + $0xb8] sm:$0xf] }
  0x82   : > { %v6423_v28 = vcombine.low %v1797_v56, %v1807_v53  ;;  %v1862_v33 = vrot.slane %v1860_v12, 5  ;;  %v1850_v34 = vrot.slane %v1849_v60, 4  ;;  %v1854_v35 = vrot.slane %v1852_v14, 5 }
  0x83   : > { %v1883_v37 = vrot.slane %v1881_v5, 4  ;;  %v1886_v39 = vrot.slane %v1884_v22, 5  ;;  %v1892_v29 = vrot.slane %v1890_v23, 5  ;;  %v1896_v43 = vrot.slane %v1894_v24, 4  ;;  %v1531_v22 = vld [vmem:[%s6063_s30 + $0xbc] sm:$0x1] }
  0x84   : > { %v1831_v48 = vsel %vm6210_vm4, %v1826_v26, %v1830_v27  ;;  %v1876_v49 = vshll.u32 %v1525_v31, 16  ;;  %v1845_v51 = vsel %vm6210_vm4, %v1840_v30, %v6394_v18  ;;  %v1908_v54 = vshll.u32 %v1529_v38, 16  ;;  %v1532_v30 = vld [vmem:[%s6109_s14] sm:$0xf]  ;;  %v1533_v31 = vld [vmem:[%s6109_s14 + $0x4] sm:$0xf] }
  0x85   : > { %v1914_v56 = vshll.u32 %v1530_v45, 16  ;;  %v1887_v18 = vor.u32 %v1886_v39, %v1883_v37  ;;  %v1897_v62 = vor.u32 %v1896_v43, %v1892_v29  ;;  %v1900_v63 = vshll.u32 %v1528_v50, 16  ;;  %v1534_v37 = vld [vmem:[%s6109_s14 + $0x8] sm:$0x1] }
  0x86   : > { %5590 = vmatmul.mubr.msk.bf16.gmra.mrb[56].mxu0 %vm596_vm0, %v6362_v57  ;;  %v1910_v8 = vrot.slane %v1908_v54, 5  ;;  %v1924_v27 = vshll.u32 %v1531_v22, 16  ;;  %v2849_v39 = vshrl.u32 %v1532_v30, 16  ;;  %v2852_v43 = vshll.u32 %v1532_v30, 16  ;;  %v2976_v22 = vld [vmem:[%s6063_s30 + $0x1c] sm:$0xf] }
  0x87   : > { %5518 = vmatmul.mubr.msk.bf16.gmra.mrb[56].mxu1 %vm596_vm0, %v6094_v11  ;;  %5593 = vmatprep.mubr.msk.bf16.mxu0 %vm596_vm0, %v6364_v58  ;;  %v1778_v11 = vrot.slane %v1777_v16, 4  ;;  %v1866_v16 = vshll.u32 %v1524_v55, 16  ;;  %v1916_v60 = vrot.slane %v1914_v56, 5  ;;  %v1902_v5 = vrot.slane %v1900_v63, 5 }
  0x88   : > { %5521 = vmatprep.mubr.msk.bf16.mxu1 %vm5998_vm1, %v7547_v1  ;;  %v2854_v50 = vrot.slane %v2852_v43, 5 }
  0x89   : > { %v1783_v9 = vsel %vm6210_vm4, %v1778_v11, %v1782_v32  ;;  %v1859_v32 = vrot.slane %v1857_v10, 4  ;;  %v1868_v4 = vrot.slane %v1866_v16, 5  ;;  %v1872_v11 = vrot.slane %v1870_v21, 4 }
  0x8a   : > { %v6421_v25 = vcombine.low %v1773_v41, %v1783_v9  ;;  %v1905_v9 = vshrl.u32 %v1529_v38, 16  ;;  %v1888_v16 = vrot.slane %v1887_v18, 4  ;;  %v1898_v21 = vrot.slane %v1897_v62, 4  ;;  %v5955_v62 = vld [vmem:[%s6109_s14 + $0xc] sm:$0xff]  }
  0x8b   : > { %v1863_v41 = vor.u32 %v1862_v33, %v1859_v32  ;;  %v1873_v55 = vor.u32 %v1872_v11, %v1868_v4  ;;  %v1926_v38 = vrot.slane %v1924_v27, 5  ;;  %v2974_v27 = vld [vmem:[%s6063_s30 + $0x14] sm:$0x1] }
  0x8c   : > { %v1907_v53 = vrot.slane %v1905_v9, 4  ;;  %v1903_v32 = vsel %vm6210_vm4, %v1898_v21, %v1902_v5  ;;  %v5960_v21 = vld [vmem:[%s7542_s2 + $0x10] sm:$0xff]  }
  0x8d   : > { %v1864_v10 = vrot.slane %v1863_v41, 4  ;;  %v1874_v12 = vrot.slane %v1873_v55, 4 }
  0x8e   : > { %5594 = vmatmul.mubr.msk.bf16.gmra.mrb[60].mxu0 %vm596_vm0, %v6370_v2  ;;  %v1911_v23 = vor.u32 %v1910_v8, %v1907_v53 }
  0x8f   : > { %5522 = vmatmul.mubr.msk.bf16.gmra.mrb[60].mxu1 %vm596_vm0, %v6098_v13  ;;  %5597 = vmatprep.mubr.msk.bf16.mxu0 %vm596_vm0, %v6392_v36  ;;  %v1816_v13 = vrot.slane %v1815_v61, 4  ;;  %v1918_v61 = vshrl.u32 %v1530_v45, 16  ;;  %v1869_v24 = vsel %vm6210_vm4, %v1864_v10, %v1868_v4  ;;  %v2858_v45 = vshll.u32 %v1533_v31, 16 }
  0x90   : > { %5525 = vmatprep.mubr.msk.bf16.mxu1 %vm5998_vm1, %v7547_v1 }
  0x91   : > { %v1821_v46 = vsel %vm6210_vm4, %v1816_v13, %v6389_v40  ;;  %v1855_v40 = vsel %vm6210_vm4, %v1850_v34, %v1854_v35  ;;  %v1920_v14 = vrot.slane %v1918_v61, 4  ;;  %v1912_v34 = vrot.slane %v1911_v23, 4 }
  0x92   : > { %v6447_v3 = vcombine.low %v1821_v46, %v1831_v48  ;;  %v6449_v7 = vcombine.low %v1845_v51, %v1855_v40  ;;  %v4965_v35 = vcombine.low %v1532_v30, %v1533_v31  ;;  %v2851_v46 = vrot.slane %v2849_v39, 4 }
  0x93   : > { %v1921_v26 = vor.u32 %v1920_v14, %v1916_v60  ;;  %v2862_v48 = vshrl.u32 %v1533_v31, 16  ;;  %v2860_v51 = vrot.slane %v2858_v45, 5  ;;  %v1917_v41 = vsel %vm6210_vm4, %v1912_v34, %v1916_v60  ;;  %v2979_v45 = vld [vmem:[%s6063_s30 + $0x28] sm:$0xf] }
  0x94   : > { %v2868_v40 = vshll.u32 %v1534_v37, 16  ;;  %v2855_v55 = vor.u32 %v2854_v50, %v2851_v46  ;;  %v2551_v63 = vshrl.u32 %v4965_v35, 16  ;;  %v3093_v30 = vrot.slane %v2976_v22, 5 }
  0x95   : > { %v1922_v11 = vrot.slane %v1921_v26, 4  ;;  %v2864_v54 = vrot.slane %v2862_v48, 4  ;;  %v2972_v26 = vld [vmem:[%s6063_s30 + $0xc] sm:$0xe]  ;;  %v3089_v39 = vrot.slane %v2974_v27, 5 }
  0x96   : > { %5598 = vmatmul.mubr.msk.bf16.gmra.mrb[64].mxu0 %vm596_vm0, %v6421_v25  ;;  %v2870_v61 = vrot.slane %v2868_v40, 5  ;;  %v2978_v40 = vld [vmem:[%s6063_s30 + $0x24] sm:$0xe] }
  0x97   : > { %5526 = vmatmul.mubr.msk.bf16.gmra.mrb[64].mxu1 %vm596_vm0, %v6113_v15  ;;  %5601 = vmatprep.mubr.msk.bf16.mxu0 %vm596_vm0, %v6423_v28  ;;  %v1878_v15 = vrot.slane %v1876_v49, 5  ;;  %v2553_v49 = vshll.u32 %v4965_v35, 16  ;;  %v1927_v9 = vsel %vm6210_vm4, %v1922_v11, %v1926_v38  ;;  %v2865_v56 = vor.u32 %v2864_v54, %v2860_v51 }
  0x98   : > { %5529 = vmatprep.mubr.msk.bf16.mxu1 %vm5998_vm1, %v7547_v1  ;;  %v6487_v18 = vcombine.low %v1917_v41, %v1927_v9  ;;  %v2982_v41 = vld [vmem:[%s6063_s30 + $0x34] sm:$0xf] }
  0x99   : > { %v1879_v13 = vsel %vm6210_vm4, %v1874_v12, %v1878_v15  ;;  %v2555_v15 = vrot.slane %v2553_v49, 1  ;;  %v2866_v8 = vrot.slane %v2865_v56, 4  ;;  %v3095_v49 = vrot.slane %v3093_v30, 4 }
  0x9a   : > { %v6470_v33 = vcombine.low %v1869_v24, %v1879_v13 }
  0x9b   : > { %v2871_v12 = vsel %vm6210_vm4, %v2866_v8, %v2870_v61  ;;  %v2556_v60 = vor.u32 %v2555_v15, %v2551_v63  ;;  %v2980_v61 = vld [vmem:[%s6063_s30 + $0x2c] sm:$0x1]  ;;  %v2981_v63 = vld [vmem:[%s6063_s30 + $0x30] sm:$0xe]  ;;  %v2983_v15 = vld [vmem:[%s6063_s30 + $0x38] sm:$0x1] }
  0x9e   : > { %5602 = vmatmul.mubr.msk.bf16.gmra.mrb[68].mxu0 %vm596_vm0, %v6447_v3 }
  0x9f   : > { %5530 = vmatmul.mubr.msk.bf16.gmra.mrb[68].mxu1 %vm596_vm0, %v6119_v17  ;;  %5605 = vmatprep.mubr.msk.bf16.mxu0 %vm596_vm0, %v6449_v7  ;;  %v1893_v17 = vsel %vm6210_vm4, %v1888_v16, %v1892_v29  ;;  %v4966_v29 = vcombine.low %v1534_v37, %v1534_v37  ;;  %v4992_v37 = vrot.slane %v2972_v26, 9 }
  0xa0   : > { %5533 = vmatprep.mubr.msk.bf16.mxu1 %vm5998_vm1, %v7547_v1  ;;  %v6472_v4 = vcombine.low %v1893_v17, %v1903_v32  ;;  %v2975_v17 = vld [vmem:[%s6063_s30 + $0x18] sm:$0xe] }
  0xa1   : > { %v2558_v53 = vshll.u32 %v4966_v29, 16  ;;  %v4993_v29 = vrot.slane %v2975_v17, 9 }
  0xa3   : > { %v2560_v14 = vrot.slane %v2558_v53, 1  ;;  %v3094_v56 = vsel %vm6563_vm8, %v4993_v29, %v3093_v30  ;;  %v2984_v30 = vld [vmem:[%s6063_s30 + $0x3c] sm:$0xe] }
  0xa5   : > { %v2561_v16 = vsel %vm2549_vm5, %v2556_v60, %v2560_v14 }
  0xa6   : > { %5606 = vmatmul.mubr.msk.bf16.gmra.mrb[72].mxu0 %vm596_vm0, %v6470_v33 }
  0xa7   : > { %5534 = vmatmul.mubr.msk.bf16.gmra.mrb[72].mxu1 %vm596_vm0, %v6132_v19  ;;  %5609 = vmatprep.mubr.msk.bf16.mxu0 %vm596_vm0, %v6472_v4  ;;  %v2856_v19 = vrot.slane %v2855_v55, 4  ;;  %v3100_v55 = vrot.slane %v2979_v45, 5 }
  0xa8   : > { %5575 = vmatprep.mubr.msk.bf16.mxu1 %vm596_vm0, %v6143_v20 }
  0xa9   : > { %v2861_v10 = vsel %vm6210_vm4, %v2856_v19, %v2860_v51  ;;  %v3107_v19 = vrot.slane %v2982_v41, 5 }
  0xaa   : > { %v6496_v20 = vcombine.low %v2861_v10, %v2871_v12  ;;  %v4994_v12 = vrot.slane %v2978_v40, 9 }
  0xac   : > { %v3101_v26 = vsel %vm6563_vm8, %v4994_v12, %v3100_v55  ;;  %v2994_v12 = vld [vmem:[%s6063_s30 + $0x64] sm:$0xf] }
  0xae   : > { %5610 = vmatmul.mubr.msk.bf16.gmra.mrb[76].mxu0 %vm596_vm0, %v6487_v18 }
  0xaf   : > { %5576 = vmatmul.mubr.msk.bf16.vlgmr.msra.gmra.mrb[76].mxu1 %vm596_vm0, %v5955_v62  ;;  %5677 = vmatprep.mubr.msk.bf16.mxu0 %vm5998_vm1, %v7547_v1 }
  0xb0   : > { %5614 = vmatpush3.bf16.msra.mxu1 %v6303_v42  ;;  %5615 = vmatprep.mubr.msk.bf16.mxu1 %vm5998_vm1, %v7547_v1  ;;  %v2969_v42 = vld [vmem:[%s6063_s30] sm:$0xe] }
  0xb1   : > { %5711 = vmatprep.subr.bf16.mxu1 %v6309_v47 }
  0xb6   : > { %5678 = vmatmul.mubr.msk.bf16.vlgmr.msra.gmra.mrb[80].mxu0 %vm596_vm0, %v2561_v16  ;;  %v3102_v16 = vrot.slane %v3100_v55, 4 }
  0xb7   : > { %5616 = vmatmul.mubr.msk.bf16.vlgmr.msra.gmra.mrb[80].mxu1 %vm596_vm0, %v6248_v52  ;;  %5682 = vmatpush3.bf16.msra.mxu0 %v6309_v47  ;;  %v2970_v52 = vld [vmem:[%s6063_s30 + $0x4] sm:$0xf] }
  0xb8   : > { %5712 = vmatpush3.bf16.msra.mxu1 %v6309_v47  ;;  %5619 = vmatprep.mubr.msk.bf16.mxu1 %vm5998_vm1, %v7547_v1  ;;  %v2971_v47 = vld [vmem:[%s6063_s30 + $0x8] sm:$0x1] }
  0xb9   : > { %5683 = vmatprep.mubr.msk.bf16.mxu0 %vm596_vm0, %v6282_v44  ;;  %5717 = vmatprep.subr.bf16.mxu0 %v5960_v21  ;;  %v3082_v5 = vrot.slane %v2971_v47, 5 }
  0xba   : > { %5751 = vmatprep.subr.bf16.mxu1 %v7547_v1 }
  0xbe   : > { %5684 = vmatmul.mubr.msk.bf16.vlgmr.msra.gmra.mrb[84].mxu0 %vm596_vm0, %v6318_v0 }
  0xbf   : > { %5620 = vmatmul.mubr.msk.bf16.gmra.mrb[84].mxu1 %vm596_vm0, %v6282_v44  ;;  %5687 = vmatprep.mubr.msk.bf16.mxu0 %vm596_vm0, %v6322_v59  ;;  %v3079_v44 = vrot.slane %v2970_v52, 5 }
  0xc0   : > { %5623 = vmatprep.mubr.msk.bf16.mxu1 %vm5998_vm1, %v7547_v1  ;;  %5718 = vmatpush3.bf16.msra.mxu0 %v5960_v21  ;;  %v3103_v21 = vrot.slane %v2980_v61, 5 }
  0xc1   : > { %5813 = vmatprep.subr.bf16.mxu0 %v7547_v1 }
  0xc2   : > { %v3104_v27 = vsel %vm6563_vm8, %v3102_v16, %v3103_v21  ;;  %v2990_v21 = vld [vmem:[%s6063_s30 + $0x54] sm:$0xe] }
  0xc3   : > { %v6679_v29 = vcombine.low %v3101_v26, %v3104_v27  ;;  %v2993_v27 = vld [vmem:[%s6063_s30 + $0x60] sm:$0xe] }
  0xc6   : > { %5688 = vmatmul.mubr.msk.bf16.gmra.mrb[88].mxu0 %vm596_vm0, %v6362_v57 }
  0xc7   : > { %5624 = vmatmul.mubr.msk.bf16.gmra.mrb[88].mxu1 %vm596_vm0, %v6318_v0  ;;  %5691 = vmatprep.mubr.msk.bf16.mxu0 %vm596_vm0, %v6364_v58  ;;  %v2973_v0 = vld [vmem:[%s6063_s30 + $0x10] sm:$0xf] }
  0xc8   : > { %5627 = vmatprep.mubr.msk.bf16.mxu1 %vm5998_vm1, %v7547_v1  ;;  %v3086_v23 = vrot.slane %v2973_v0, 5  ;;  %v4995_v0 = vrot.slane %v2981_v63, 9 }
  0xca   : > { %v3088_v34 = vrot.slane %v3086_v23, 4  ;;  %v3087_v9 = vsel %vm6563_vm8, %v4992_v37, %v3086_v23  ;;  %v2988_v23 = vld [vmem:[%s6063_s30 + $0x4c] sm:$0xf]  ;;  %v3108_v17 = vsel %vm6563_vm8, %v4995_v0, %v3107_v19 }
  0xcc   : > { %v3090_v54 = vsel %vm6563_vm8, %v3088_v34, %v3089_v39  ;;  %v2987_v34 = vld [vmem:[%s6063_s30 + $0x48] sm:$0xe]  ;;  %v2989_v39 = vld [vmem:[%s6063_s30 + $0x50] sm:$0x1] }
  0xcd   : > { %v6625_v8 = vcombine.low %v3087_v9, %v3090_v54 }
  0xce   : > { %5692 = vmatmul.mubr.msk.bf16.gmra.mrb[92].mxu0 %vm596_vm0, %v6370_v2 }
  0xcf   : > { %5628 = vmatmul.mubr.msk.bf16.gmra.mrb[92].mxu1 %vm596_vm0, %v6322_v59  ;;  %5695 = vmatprep.mubr.msk.bf16.mxu0 %vm596_vm0, %v6392_v36  ;;  %v4991_v59 = vrot.slane %v2969_v42, 9 }
  0xd0   : > { %5631 = vmatprep.mubr.msk.bf16.mxu1 %vm5998_vm1, %v7547_v1 }
  0xd1   : > { %v3080_v24 = vsel %vm6563_vm8, %v4991_v59, %v3079_v44  ;;  %v3109_v59 = vrot.slane %v3107_v19, 4 }
  0xd6   : > { %5696 = vmatmul.mubr.msk.bf16.gmra.mrb[96].mxu0 %vm596_vm0, %v6421_v25 }
  0xd7   : > { %5632 = vmatmul.mubr.msk.bf16.gmra.mrb[96].mxu1 %vm596_vm0, %v6362_v57  ;;  %5699 = vmatprep.mubr.msk.bf16.mxu0 %vm596_vm0, %v6423_v28  ;;  %v3081_v57 = vrot.slane %v3079_v44, 4  ;;  %v2985_v44 = vld [vmem:[%s6063_s30 + $0x40] sm:$0xf] }
  0xd8   : > { %5635 = vmatprep.mubr.msk.bf16.mxu1 %vm5998_vm1, %v7547_v1 }
  0xd9   : > { %v3083_v13 = vsel %vm6563_vm8, %v3081_v57, %v3082_v5  ;;  %v3110_v57 = vrot.slane %v2983_v15, 5  ;;  %v6643_v5 = vld [vmem:[%s7542_s2 + $0x28] sm:$0xff]   ;;  %v3124_v15 = vrot.slane %v2989_v39, 5 }
  0xda   : > { %v5007_v38 = vcombine.low %v3080_v24, %v3083_v13  ;;  %v6651_v24 = vld [vmem:[%s7542_s2 + $0x40] sm:$0xff]   ;;  %v3114_v13 = vrot.slane %v2985_v44, 5 }
  0xdc   : > { %v3116_v41 = vrot.slane %v3114_v13, 4 }
  0xde   : > { %5700 = vmatmul.mubr.msk.bf16.gmra.mrb[100].mxu0 %vm596_vm0, %v6447_v3 }
  0xdf   : > { %5636 = vmatmul.mubr.msk.bf16.gmra.mrb[100].mxu1 %vm596_vm0, %v6364_v58  ;;  %5703 = vmatprep.mubr.msk.bf16.mxu0 %vm596_vm0, %v6449_v7 }
  0xe0   : > { %5639 = vmatprep.mubr.msk.bf16.mxu1 %vm5998_vm1, %v7547_v1 }
  0xe6   : > { %5704 = vmatmul.mubr.msk.bf16.gmra.mrb[104].mxu0 %vm596_vm0, %v6470_v33 }
  0xe7   : > { %5640 = vmatmul.mubr.msk.bf16.gmra.mrb[104].mxu1 %vm596_vm0, %v6370_v2  ;;  %5707 = vmatprep.mubr.msk.bf16.mxu0 %vm596_vm0, %v6472_v4  ;;  %v2977_v2 = vld [vmem:[%s6063_s30 + $0x20] sm:$0x1] }
  0xe8   : > { %5643 = vmatprep.mubr.msk.bf16.mxu1 %vm5998_vm1, %v7547_v1  ;;  %v3096_v50 = vrot.slane %v2977_v2, 5  ;;  %v3111_v2 = vsel %vm6563_vm8, %v3109_v59, %v3110_v57  ;;  %v2992_v57 = vld [vmem:[%s6063_s30 + $0x5c] sm:$0x1] }
  0xe9   : > { %v6582_v31 = vpop.f32.mrb[0].mxu0  ;;  %v6687_v40 = vcombine.low %v3108_v17, %v3111_v2 }
  0xea   : > { %v6586_v32 = vpop.f32.mrb[0].mxu1  ;;  %v6588_v35 = vpop.f32.mrb[1].mxu0 }
  0xeb   : > { %7561 = vst [vmem:[#allocation3_spill] sm:$0xff] %v6586_v32  ;;  %v6590_v11 = vpop.f32.mrb[1].mxu1  ;;  %v6592_v43 = vpop.f32.mrb[2].mxu0 }
  0xec   : > { %v6595_v46 = vpop.f32.mrb[2].mxu1  ;;  %v6597_v48 = vpop.f32.mrb[3].mxu0 }
  0xed   : > { %7562 = vst [vmem:[#allocation4_spill] sm:$0xff] %v6595_v46  ;;  %v6599_v51 = vpop.f32.mrb[3].mxu1 }
  0xee   : > { %5708 = vmatmul.mubr.msk.bf16.gmra.mrb[108].mxu0 %vm596_vm0, %v6487_v18 }
  0xef   : > { %5644 = vmatmul.mubr.msk.bf16.gmra.mrb[108].mxu1 %vm596_vm0, %v6392_v36  ;;  %5719 = vmatprep.mubr.msk.bf16.mxu0 %vm596_vm0, %v5007_v38  ;;  %v3097_v36 = vsel %vm6563_vm8, %v3095_v49, %v3096_v50  ;;  %v3121_v38 = vrot.slane %v2988_v23, 5  ;;  %v4996_v50 = vrot.slane %v2984_v30, 9  ;;  %v3135_v23 = vrot.slane %v2994_v12, 5  ;;  %v2995_v30 = vld [vmem:[%s6063_s30 + $0x68] sm:$0x1] }
  0xf0   : > { %5647 = vmatprep.mubr.msk.bf16.mxu1 %vm5998_vm1, %v7547_v1  ;;  %v6631_v14 = vcombine.low %v3094_v56, %v3097_v36  ;;  %v4997_v56 = vrot.slane %v2987_v34, 9  ;;  %v2991_v36 = vld [vmem:[%s6063_s30 + $0x58] sm:$0xf] }
  0xf1   : > { %v6619_v62 = vpop.f32.mrb[4].mxu0  ;;  %v3123_v63 = vrot.slane %v3121_v38, 4  ;;  %v3128_v44 = vrot.slane %v2991_v36, 5  ;;  %v3115_v0 = vsel %vm6563_vm8, %v4996_v50, %v3114_v13  ;;  %v4998_v13 = vrot.slane %v2990_v21, 9 }
  0xf2   : > { %v6623_v53 = vpop.f32.mrb[4].mxu1  ;;  %v6627_v10 = vpop.f32.mrb[5].mxu0  ;;  %v3122_v26 = vsel %vm6563_vm8, %v4997_v56, %v3121_v38  ;;  %v3131_v50 = vrot.slane %v2992_v57, 5  ;;  %v4999_v36 = vrot.slane %v2993_v27, 9 }
  0xf3   : > { %7563 = vst [vmem:[#allocation5_spill] sm:$0xff] %v6623_v53  ;;  %v6629_v60 = vpop.f32.mrb[5].mxu1  ;;  %v6633_v52 = vpop.f32.mrb[6].mxu0  ;;  %v3130_v39 = vrot.slane %v3128_v44, 4  ;;  %v3129_v57 = vsel %vm6563_vm8, %v4998_v13, %v3128_v44  ;;  %v7573_v13 = vmov 0.0  }
  0xf4   : > { %7564 = vst [vmem:[#allocation6_spill] sm:$0xff] %v6629_v60  ;;  %v6636_v42 = vpop.f32.mrb[6].mxu1  ;;  %v6638_v47 = vpop.f32.mrb[7].mxu0 }
  0xf5   : > { %7565 = vst [vmem:[#allocation7_spill] sm:$0xff] %v6636_v42  ;;  %v6645_v22 = vpop.f32.mrb[7].mxu1 }
  0xf6   : > { %7566 = vst [vmem:[#allocation8_spill] sm:$0xff] %v6645_v22  ;;  %5720 = vmatmul.mubr.msk.bf16.vlgmr.msra.gmra.mrb[112].mxu0 %vm596_vm0, %v6625_v8 }
  0xf7   : > { %5648 = vmatmul.mubr.msk.bf16.gmra.mrb[112].mxu1 %vm596_vm0, %v6421_v25  ;;  %5723 = vmatprep.mubr.msk.bf16.mxu0 %vm596_vm0, %v6631_v14  ;;  %v2986_v25 = vld [vmem:[%s6063_s30 + $0x44] sm:$0x1] }
  0xf8   : > { %5651 = vmatprep.mubr.msk.bf16.mxu1 %vm5998_vm1, %v7547_v1  ;;  %5814 = vmatpush3.bf16.msra.mxu0 %v6643_v5  ;;  %v3117_v55 = vrot.slane %v2986_v25, 5 }
  0xf9   : > { %v6673_v37 = vpop.f32.mrb[8].mxu0  ;;  %5819 = vmatprep.subr.bf16.mxu0 %v6651_v24 }
  0xfa   : > { %v6677_v45 = vpop.f32.mrb[8].mxu1  ;;  %v6681_v49 = vpop.f32.mrb[9].mxu0  ;;  %v3118_v59 = vsel %vm6563_vm8, %v3116_v41, %v3117_v55  ;;  %v2997_v41 = vld [vmem:[%s6063_s30 + $0x70] sm:$0xf] }
  0xfb   : > { %7567 = vst [vmem:[#allocation9_spill] sm:$0xff] %v6677_v45  ;;  %v6683_v9 = vpop.f32.mrb[9].mxu1  ;;  %v6685_v54 = vpop.f32.mrb[10].mxu0  ;;  %v6721_v34 = vcombine.low %v3115_v0, %v3118_v59  ;;  %v3000_v0 = vld [vmem:[%s6063_s30 + $0x7c] sm:$0xf]  ;;  %v3142_v27 = vrot.slane %v2997_v41, 5 }
  0xfc   : > { %7568 = vst [vmem:[#allocation10_spill] sm:$0xff] %v6683_v9  ;;  %v6690_v61 = vpop.f32.mrb[10].mxu1  ;;  %v6692_v19 = vpop.f32.mrb[11].mxu0  ;;  %v3149_v44 = vrot.slane %v3000_v0, 5 }
  0xfd   : > { %7569 = vst [vmem:[#allocation11_spill] sm:$0xff] %v6690_v61  ;;  %v6695_v16 = vpop.f32.mrb[11].mxu1 }
  0xfe   : > { %7570 = vst [vmem:[#allocation12_spill] sm:$0xff] %v6695_v16  ;;  %5724 = vmatmul.mubr.msk.bf16.gmra.mrb[116].mxu0 %vm596_vm0, %v6679_v29  ;;  %v3144_v16 = vrot.slane %v3142_v27, 4  ;;  %v3151_v22 = vrot.slane %v3149_v44, 4 }
  0xff   : > { %5652 = vmatmul.mubr.msk.bf16.gmra.mrb[116].mxu1 %vm596_vm0, %v6423_v28  ;;  %5727 = vmatprep.mubr.msk.bf16.mxu0 %vm596_vm0, %v6687_v40  ;;  %v3125_v28 = vsel %vm6563_vm8, %v3123_v63, %v3124_v15  ;;  %v3137_v63 = vrot.slane %v3135_v23, 4  ;;  %v3138_v15 = vrot.slane %v2995_v30, 5  ;;  %v3136_v30 = vsel %vm6563_vm8, %v4999_v36, %v3135_v23 }
 0x100   : > { %5655 = vmatprep.mubr.msk.bf16.mxu1 %vm5998_vm1, %v7547_v1  ;;  %v6728_v56 = vcombine.low %v3122_v26, %v3125_v28  ;;  %v3132_v26 = vsel %vm6563_vm8, %v3130_v39, %v3131_v50  ;;  %v2996_v28 = vld [vmem:[%s6063_s30 + $0x6c] sm:$0xe]  ;;  %v2999_v39 = vld [vmem:[%s6063_s30 + $0x78] sm:$0xe]  ;;  %v3001_v50 = vld [vmem:[%s6063_s30 + $0x80] sm:$0x1] }
 0x101   : > { %v6717_v17 = vpop.f32.mrb[12].mxu0  ;;  %v3139_v1 = vsel %vm6563_vm8, %v3137_v63, %v3138_v15  ;;  %v3003_v15 = vld [vmem:[%s6063_s30 + $0x88] sm:$0xf]  ;;  %v5001_v53 = vrot.slane %v2999_v39, 9  ;;  %v3005_v39 = vld [vmem:[%s6063_s30 + $0x90] sm:$0xe] }
 0x102   : > { %v5473_v2 = vpop.f32.mrb[12].mxu1  ;;  %v6719_v25 = vpop.f32.mrb[13].mxu0  ;;  %v6759_v36 = vcombine.low %v3136_v30, %v3139_v1  ;;  %v3156_v30 = vrot.slane %v3003_v15, 5 }
 0x103   : > { %v6724_v55 = vpop.f32.mrb[13].mxu1  ;;  %v6726_v38 = vpop.f32.mrb[14].mxu0 }
 0x104   : > { %7571 = vst [vmem:[#allocation13_spill] sm:$0xff] %v6724_v55  ;;  %v5474_v12 = vpop.f32.mrb[14].mxu1  ;;  %v6730_v21 = vpop.f32.mrb[15].mxu0  ;;  %v6755_v55 = vcombine.low %v3129_v57, %v3132_v26  ;;  %7576 = vst [vmem:[#allocation17_spill] sm:$0xff] %v6759_v36  ;;  %v3152_v57 = vrot.slane %v3001_v50, 5 }
 0x105   : > { %v6733_v59 = vpop.f32.mrb[15].mxu1 }
 0x106   : > { %7572 = vst [vmem:[#allocation14_spill] sm:$0xff] %v6733_v59  ;;  %5728 = vmatmul.mubr.msk.bf16.gmra.mrb[120].mxu0 %vm596_vm0, %v6721_v34  ;;  %v2998_v59 = vld [vmem:[%s6063_s30 + $0x74] sm:$0x1]  ;;  %7574 = vst [vmem:[#allocation15_spill] sm:$0xff] %v6755_v55 }
 0x107   : > { %5656 = vmatmul.mubr.msk.bf16.gmra.mrb[120].mxu1 %vm596_vm0, %v6447_v3  ;;  %5731 = vmatprep.mubr.msk.bf16.mxu0 %vm596_vm0, %v6728_v56  ;;  %v5000_v3 = vrot.slane %v2996_v28, 9  ;;  %v3145_v63 = vrot.slane %v2998_v59, 5 }
 0x108   : > { %5659 = vmatprep.mubr.msk.bf16.mxu1 %vm5998_vm1, %v7573_v13 }
 0x109   : > { %v1166_v41 = vpop.f32.mrb[16].mxu0 }
 0x10a   : > { %v943_v61 = vpop.f32.mrb[16].mxu1  ;;  %v6757_v45 = vadd.f32 %v5473_v2, %v1166_v41  ;;  %v5541_v23 = vpop.f32.mrb[17].mxu0  ;;  %v3006_v41 = vld [vmem:[%s6063_s30 + $0x94] sm:$0xf] }
 0x10b   : > { %v1062_v0 = vadd.f32 %v943_v61, %v6588_v35  ;;  %v5479_v9 = vpop.f32.mrb[17].mxu1  ;;  %v1169_v42 = vpop.f32.mrb[18].mxu0  ;;  %v3143_v35 = vsel %vm6563_vm8, %v5000_v3, %v3142_v27  ;;  %v3153_v61 = vsel %vm6563_vm8, %v3151_v22, %v3152_v57  ;;  %v3163_v27 = vrot.slane %v3006_v41, 5  ;;  %v6792_v57 = vld [vmem:[%s6063_s30 + $0xa0] sm:$0xf] }
 0x10c   : > { %7575 = vst [vmem:[#allocation16_spill] sm:$0xff] %v6757_v45  ;;  %v946_v26 = vpop.f32.mrb[18].mxu1  ;;  %v6763_v28 = vadd.f32 %v5474_v12, %v1169_v42  ;;  %v5542_v2 = vpop.f32.mrb[19].mxu0  ;;  %v3002_v9 = vld [vmem:[%s6063_s30 + $0x84] sm:$0xe]  ;;  %v3146_v42 = vsel %vm6563_vm8, %v3144_v16, %v3145_v63  ;;  %v3158_v23 = vrot.slane %v3156_v30, 4 }
 0x10d   : > { %v1063_v1 = vadd.f32 %v946_v26, %v6597_v48  ;;  %v5480_v59 = vpop.f32.mrb[19].mxu1  ;;  %v3150_v48 = vsel %vm6563_vm8, %v5001_v53, %v3149_v44  ;;  %v3004_v12 = vld [vmem:[%s6063_s30 + $0x8c] sm:$0x1]  ;;  %v5002_v3 = vrot.slane %v3002_v9, 9  ;;  %v6787_v63 = vcombine.low %v3143_v35, %v3146_v42 }
 0x10e   : > { %7577 = vst [vmem:[#allocation18_spill] sm:$0xff] %v6763_v28  ;;  %5732 = vmatmul.mubr.msk.bf16.gmra.mrb[124].mxu0 %vm596_vm0, %v6755_v55  ;;  %v6789_v53 = vcombine.low %v3150_v48, %v3153_v61  ;;  %v3159_v44 = vrot.slane %v3004_v12, 5  ;;  %v5003_v22 = vrot.slane %v3005_v39, 9  ;;  %v3165_v9 = vrot.slane %v3163_v27, 4  ;;  %v1535_v45 = vld [vmem:[%s6109_s14 + $0xc] sm:$0xf] }
 0x10f   : > { %5660 = vmatmul.mubr.msk.bf16.gmra.mrb[124].mxu1 %vm596_vm0, %v6449_v7  ;;  %5735 = vmatprep.mubr.msk.bf16.mxu0 %vm596_vm0, %v6759_v36  ;;  %v3007_v7 = vld [vmem:[%s6063_s30 + $0x98] sm:$0x1]  ;;  %7578 = vst [vmem:[#allocation19_spill] sm:$0xff] %v6787_v63  ;;  %v3012_v42 = vld [vmem:[%s6063_s30 + $0xac] sm:$0xf] }
 0x110   : > { %5663 = vmatprep.mubr.msk.bf16.mxu1 %vm5998_vm1, %v7573_v13  ;;  %7579 = vst [vmem:[#allocation20_spill] sm:$0xff] %v6789_v53  ;;  %v3166_v28 = vrot.slane %v3007_v7, 5  ;;  %v3157_v7 = vsel %vm6563_vm8, %v5002_v3, %v3156_v30  ;;  %v3010_v3 = vld [vmem:[%s6063_s30 + $0xa4] sm:$0x1]  ;;  %v3015_v55 = vld [vmem:[%s6063_s30 + $0xb8] sm:$0xf] }
 0x111   : > { %v5547_v50 = vpop.f32.mrb[20].mxu0 }
 0x112   : > { %v951_v15 = vpop.f32.mrb[20].mxu1  ;;  %v1248_v16 = vpop.f32.mrb[21].mxu0  ;;  %v3167_v30 = vsel %vm6563_vm8, %v3165_v9, %v3166_v28  ;;  %v3173_v28 = vrot.slane %v3010_v3, 5 }
 0x113   : > { %v1064_v26 = vadd.f32 %v6582_v31, %v951_v15  ;;  %v5483_v2 = vpop.f32.mrb[21].mxu1  ;;  %v6795_v41 = vadd.f32 %v1248_v16, %v1062_v0  ;;  %v5548_v59 = vpop.f32.mrb[22].mxu0  ;;  %v3170_v31 = vrot.slane %v6792_v57, 5  ;;  %v1536_v0 = vld [vmem:[%s6109_s14 + $0x10] sm:$0xf]  ;;  %v3177_v57 = vrot.slane %v3012_v42, 5 }
 0x114   : > { %v954_v60 = vpop.f32.mrb[22].mxu1  ;;  %v1251_v35 = vpop.f32.mrb[23].mxu0  ;;  %v3008_v15 = vld [vmem:[%s6063_s30 + $0x9c] sm:$0xe] }
 0x115   : > { %v6799_v48 = vadd.f32 %v5547_v50, %v1064_v26  ;;  %v1065_v61 = vadd.f32 %v6592_v43, %v954_v60  ;;  %v5484_v12 = vpop.f32.mrb[23].mxu1  ;;  %v6802_v39 = vadd.f32 %v1251_v35, %v1063_v1  ;;  %v3160_v50 = vsel %vm6563_vm8, %v3158_v23, %v3159_v44  ;;  %v3013_v23 = vld [vmem:[%s6063_s30 + $0xb0] sm:$0x1] }
 0x116   : > { %5736 = vmatmul.mubr.msk.bf16.gmra.mrb[128].mxu0 %vm596_vm0, %v6787_v63  ;;  %v2873_v43 = vshrl.u32 %v1535_v45, 16  ;;  %v2876_v60 = vshll.u32 %v1535_v45, 16  ;;  %v3164_v1 = vsel %vm6563_vm8, %v5003_v22, %v3163_v27  ;;  %v3011_v45 = vld [vmem:[%s6063_s30 + $0xa8] sm:$0xe]  ;;  %v2882_v44 = vshll.u32 %v1536_v0, 16 }
 0x117   : > { %v6813_v16 = vadd.f32 %v5548_v59, %v1065_v61  ;;  %5664 = vmatmul.mubr.msk.bf16.gmra.mrb[128].mxu1 %vm596_vm0, %v6470_v33  ;;  %5739 = vmatprep.mubr.msk.bf16.mxu0 %vm596_vm0, %v6789_v53  ;;  %v2886_v26 = vshrl.u32 %v1536_v0, 16  ;;  %v6828_v33 = vcombine.low %v3157_v7, %v3160_v50  ;;  %v5004_v59 = vrot.slane %v3008_v15, 9 }
 0x118   : > { %5667 = vmatprep.mubr.msk.bf16.mxu1 %vm5998_vm1, %v7573_v13  ;;  %v3172_v35 = vrot.slane %v3170_v31, 4  ;;  %v6830_v22 = vcombine.low %v3164_v1, %v3167_v30  ;;  %v2875_v9 = vrot.slane %v2873_v43, 4  ;;  %v2878_v42 = vrot.slane %v2876_v60, 5  ;;  %v1537_v60 = vld [vmem:[%s6109_s14 + $0x14] sm:$0x1] }
 0x119   : > { %v5551_v2 = vpop.f32.mrb[24].mxu0  ;;  %v5005_v46 = vrot.slane %v3011_v45, 9  ;;  %v3179_v0 = vrot.slane %v3177_v57, 4  ;;  %v3180_v32 = vrot.slane %v3013_v23, 5  ;;  %v2884_v15 = vrot.slane %v2882_v44, 5 }
 0x11a   : > { %v959_v61 = vpop.f32.mrb[24].mxu1  ;;  %v1264_v27 = vpop.f32.mrb[25].mxu0  ;;  %v2888_v36 = vrot.slane %v2886_v26, 4  ;;  %v2879_v3 = vor.u32 %v2878_v42, %v2875_v9  ;;  %v3014_v45 = vld [vmem:[%s6063_s30 + $0xb4] sm:$0xe]  ;;  %v3184_v23 = vrot.slane %v3015_v55, 5 }
 0x11b   : > { %v1066_v12 = vadd.f32 %v959_v61, %v6627_v10  ;;  %v5487_v53 = vpop.f32.mrb[25].mxu1  ;;  %v5552_v63 = vpop.f32.mrb[26].mxu0  ;;  %v3171_v10 = vsel %vm6563_vm8, %v5004_v59, %v3170_v31  ;;  %v3178_v31 = vsel %vm6563_vm8, %v5005_v46, %v3177_v57  ;;  %v3181_v44 = vsel %vm6563_vm8, %v3179_v0, %v3180_v32  ;;  %v3016_v59 = vld [vmem:[%s6063_s30 + $0xbc] sm:$0x1]  ;;  %s5130_s30 = sshll.u32 %s7603_s21, 7 }
 0x11c   : > { %v962_v7 = vpop.f32.mrb[26].mxu1  ;;  %v1267_v50 = vpop.f32.mrb[27].mxu0  ;;  %v2889_v26 = vor.u32 %v2888_v36, %v2884_v15  ;;  %v3186_v46 = vrot.slane %v3184_v23, 4  ;;  %v3187_v57 = vrot.slane %v3016_v59, 5  ;;  %v2880_v0 = vrot.slane %v2879_v3, 4  ;;  %s7484_s10 = scalar_lea.vmem %s7546_s6, %s5130_s30 }
 0x11d   : > { %v1067_v1 = vadd.f32 %v962_v7, %v6638_v47  ;;  %v6835_v30 = vadd.f32 %v1264_v27, %v1066_v12  ;;  %v5488_v43 = vpop.f32.mrb[27].mxu1  ;;  %v3174_v47 = vsel %vm6563_vm8, %v3172_v35, %v3173_v28  ;;  %v5006_v28 = vrot.slane %v3014_v45, 9  ;;  %v6892_v45 = vld [vmem:[%s6109_s14 + $0x4] sm:$0xf] }
 0x11e   : > { %5740 = vmatmul.mubr.msk.bf16.gmra.mrb[132].mxu0 %vm596_vm0, %v6828_v33  ;;  %v6860_v12 = vcombine.low %v3171_v10, %v3174_v47  ;;  %v6865_v7 = vcombine.low %v3178_v31, %v3181_v44  ;;  %v3188_v47 = vsel %vm6563_vm8, %v3186_v46, %v3187_v57  ;;  %v6895_v31 = vld [vmem:[%s6109_s14 + $0x8] sm:$0x1] }
 0x11f   : > { %v6842_v53 = vadd.f32 %v1267_v50, %v1067_v1  ;;  %5668 = vmatmul.mubr.msk.bf16.gmra.mrb[132].mxu1 %vm596_vm0, %v6472_v4  ;;  %5743 = vmatprep.mubr.msk.bf16.mxu0 %vm596_vm0, %v6830_v22  ;;  %v2892_v4 = vshll.u32 %v1537_v60, 16  ;;  %v2890_v50 = vrot.slane %v2889_v26, 4 }
 0x120   : > { %5671 = vmatprep.mubr.msk.bf16.mxu1 %vm5998_vm1, %v7573_v13 }
 0x121   : > { %v6858_v61 = vpop.f32.mrb[28].mxu0  ;;  %v2894_v1 = vrot.slane %v2892_v4, 5 }
 0x122   : > { %v967_v27 = vpop.f32.mrb[28].mxu1  ;;  %v1280_v35 = vpop.f32.mrb[29].mxu0 }
 0x123   : > { %v1068_v55 = vadd.f32 %v6619_v62, %v967_v27  ;;  %v5491_v9 = vpop.f32.mrb[29].mxu1  ;;  %v6863_v42 = vpop.f32.mrb[30].mxu0  ;;  %v3185_v62 = vsel %vm6563_vm8, %v5006_v28, %v3184_v23 }
 0x124   : > { %v970_v32 = vpop.f32.mrb[30].mxu1  ;;  %v1283_v36 = vpop.f32.mrb[31].mxu0 }
 0x125   : > { %v1069_v43 = vadd.f32 %v6633_v52, %v970_v32  ;;  %v5492_v60 = vpop.f32.mrb[31].mxu1  ;;  %v6868_v10 = vadd.f32 %v5551_v2, %v1068_v55  ;;  %v2885_v52 = vsel %vm6210_vm4, %v2880_v0, %v2884_v15  ;;  %v6889_v2 = vld [vmem:[%s6109_s14] sm:$0xe]  ;;  %v5059_v15 = vcombine.low %v6895_v31, %v6895_v31 }
 0x126   : > { %5744 = vmatmul.mubr.msk.bf16.gmra.mrb[136].mxu0 %vm596_vm0, %v6860_v12  ;;  %v5058_v6 = vcombine.low %v6889_v2, %v6892_v45 }
 0x127   : > { %5672 = vmatmul.mubr.msk.bf16.gmra.mrb[136].mxu1 %vm596_vm0, %v6487_v18  ;;  %5747 = vmatprep.mubr.msk.bf16.mxu0 %vm596_vm0, %v6865_v7  ;;  %v6880_v3 = vadd.f32 %v5552_v63, %v1069_v43  ;;  %v2895_v18 = vsel %vm6210_vm4, %v2890_v50, %v2894_v1  ;;  %v6899_v63 = vcombine.low %v3185_v62, %v3188_v47  ;;  %v3812_v0 = vrot.slane %v5059_v15, 1 }
 0x128   : > { %5713 = vmatprep.mubr.msk.bf16.mxu1 %vm596_vm0, %v6496_v20  ;;  %v4986_v59 = vcombine.low %v2885_v52, %v2895_v18  ;;  %v3811_v32 = vrot.slane %v5058_v6, 1 }
 0x129   : > { %v6897_v23 = vpop.f32.mrb[32].mxu0 }
 0x12a   : > { %v975_v44 = vpop.f32.mrb[32].mxu1  ;;  %v1296_v26 = vpop.f32.mrb[33].mxu0  ;;  %v3813_v43 = vsel %vm3810_vm9, %v3811_v32, %v3812_v0 }
 0x12b   : > { %v1070_v20 = vadd.f32 %v975_v44, %v6681_v49  ;;  %v5495_v4 = vpop.f32.mrb[33].mxu1  ;;  %v6906_v27 = vpop.f32.mrb[34].mxu0 }
 0x12c   : > { %v978_v28 = vpop.f32.mrb[34].mxu1  ;;  %v1299_v55 = vpop.f32.mrb[35].mxu0 }
 0x12d   : > { %v1071_v9 = vadd.f32 %v978_v28, %v6692_v19  ;;  %v6909_v46 = vadd.f32 %v1280_v35, %v1070_v20  ;;  %v5496_v57 = vpop.f32.mrb[35].mxu1 }
 0x12e   : > { %5748 = vmatmul.mubr.msk.bf16.gmra.mrb[140].mxu0 %vm596_vm0, %v6899_v63 }
 0x12f   : > { %v6913_v49 = vadd.f32 %v1283_v36, %v1071_v9  ;;  %5714 = vmatmul.mubr.msk.bf16.vlgmr.msra.gmra.mrb[140].mxu1 %vm596_vm0, %v4986_v59  ;;  %5815 = vmatprep.mubr.msk.bf16.mxu0 %vm5998_vm1, %v7573_v13 }
 0x130   : > { %5752 = vmatpush3.bf16.msra.mxu1 %v6643_v5  ;;  %5753 = vmatprep.mubr.msk.bf16.mxu1 %vm5998_vm1, %v7573_v13 }
 0x131   : > { %5849 = vmatprep.subr.bf16.mxu1 %v6651_v24  ;;  %v6922_v19 = vpop.f32.mrb[36].mxu0 }
 0x132   : > { %v983_v35 = vpop.f32.mrb[36].mxu1  ;;  %v6924_v36 = vpop.f32.mrb[37].mxu0 }
 0x133   : > { %v1072_v50 = vadd.f32 %v6673_v37, %v983_v35  ;;  %v5499_v1 = vpop.f32.mrb[37].mxu1  ;;  %v6927_v60 = vpop.f32.mrb[38].mxu0 }
 0x134   : > { %v986_v62 = vpop.f32.mrb[38].mxu1  ;;  %v1315_v47 = vpop.f32.mrb[39].mxu0 }
 0x135   : > { %v1073_v5 = vadd.f32 %v6685_v54, %v986_v62  ;;  %v5500_v52 = vpop.f32.mrb[39].mxu1  ;;  %v6931_v18 = vadd.f32 %v6858_v61, %v1072_v50 }
 0x136   : > { %5816 = vmatmul.mubr.msk.bf16.vlgmr.msra.gmra.mrb[144].mxu0 %vm596_vm0, %v3813_v43 }
 0x137   : > { %5754 = vmatmul.mubr.msk.bf16.vlgmr.msra.gmra.mrb[144].mxu1 %vm596_vm0, %v6625_v8  ;;  %5820 = vmatpush3.bf16.msra.mxu0 %v6651_v24  ;;  %v6938_v37 = vadd.f32 %v6863_v42, %v1073_v5 }
 0x138   : > { %5850 = vmatpush3.bf16.msra.mxu1 %v6651_v24  ;;  %5757 = vmatprep.mubr.msk.bf16.mxu1 %vm5998_vm1, %v7573_v13 }
 0x139   : > { %5821 = vmatprep.mubr.msk.bf16.mxu0 %vm596_vm0, %v6631_v14  ;;  %v6945_v54 = vpop.f32.mrb[40].mxu0 }
 0x13a   : > { %v991_v61 = vpop.f32.mrb[40].mxu1  ;;  %v6947_v44 = vpop.f32.mrb[41].mxu0 }
 0x13b   : > { %v1074_v8 = vadd.f32 %v991_v61, %v6719_v25  ;;  %v5503_v20 = vpop.f32.mrb[41].mxu1  ;;  %v6950_v4 = vpop.f32.mrb[42].mxu0 }
 0x13c   : > { %v994_v42 = vpop.f32.mrb[42].mxu1  ;;  %v6952_v59 = vpop.f32.mrb[43].mxu0 }
 0x13d   : > { %v6954_v24 = vadd.f32 %v1296_v26, %v1074_v8  ;;  %v1075_v6 = vadd.f32 %v994_v42, %v6730_v21  ;;  %v5504_v15 = vpop.f32.mrb[43].mxu1 }
 0x13e   : > { %5822 = vmatmul.mubr.msk.bf16.vlgmr.msra.gmra.mrb[148].mxu0 %vm596_vm0, %v6679_v29 }
 0x13f   : > { %v6959_v28 = vadd.f32 %v1299_v55, %v1075_v6  ;;  %5758 = vmatmul.mubr.msk.bf16.gmra.mrb[148].mxu1 %vm596_vm0, %v6631_v14  ;;  %5825 = vmatprep.mubr.msk.bf16.mxu0 %vm596_vm0, %v6687_v40 }
 0x140   : > { %5761 = vmatprep.mubr.msk.bf16.mxu1 %vm5998_vm1, %v7573_v13 }
 0x141   : > { %v6967_v25 = vpop.f32.mrb[44].mxu0 }
 0x142   : > { %v999_v26 = vpop.f32.mrb[44].mxu1  ;;  %v6969_v9 = vpop.f32.mrb[45].mxu0 }
 0x143   : > { %v1076_v21 = vadd.f32 %v6717_v17, %v999_v26  ;;  %v5507_v57 = vpop.f32.mrb[45].mxu1  ;;  %v6972_v32 = vpop.f32.mrb[46].mxu0  ;;  %v7582_v26 = vld [vmem:[#allocation3_spill] sm:$0xff] }
 0x144   : > { %v1002_v55 = vpop.f32.mrb[46].mxu1  ;;  %v6974_v0 = vpop.f32.mrb[47].mxu0 }
 0x145   : > { %v1077_v14 = vadd.f32 %v6726_v38, %v1002_v55  ;;  %v5508_v35 = vpop.f32.mrb[47].mxu1  ;;  %v6978_v50 = vadd.f32 %v6897_v23, %v1076_v21 }
 0x146   : > { %5826 = vmatmul.mubr.msk.bf16.gmra.mrb[152].mxu0 %vm596_vm0, %v6721_v34 }
 0x147   : > { %5762 = vmatmul.mubr.msk.bf16.gmra.mrb[152].mxu1 %vm596_vm0, %v6679_v29  ;;  %5829 = vmatprep.mubr.msk.bf16.mxu0 %vm596_vm0, %v6728_v56  ;;  %v6987_v17 = vadd.f32 %v6906_v27, %v1077_v14 }
 0x148   : > { %5765 = vmatprep.mubr.msk.bf16.mxu1 %vm5998_vm1, %v7573_v13 }
 0x149   : > { %v5583_v38 = vpop.f32.mrb[48].mxu0 }
 0x14a   : > { %v1007_v1 = vpop.f32.mrb[48].mxu1  ;;  %v6992_v23 = vadd.f32 %v5583_v38, %v6799_v48  ;;  %v2096_v43 = vpop.f32.mrb[49].mxu0  ;;  %v7583_v38 = vld [vmem:[#allocation4_spill] sm:$0xff] }
 0x14b   : > { %v1078_v62 = vadd.f32 %v1007_v1, %v6590_v11  ;;  %v5511_v5 = vpop.f32.mrb[49].mxu1  ;;  %v6996_v29 = vadd.f32 %v2096_v43, %v6795_v41  ;;  %v5584_v52 = vpop.f32.mrb[50].mxu0  ;;  %v7580_v11 = vld [vmem:[#allocation15_spill] sm:$0xff]  ;;  %v7581_v41 = vld [vmem:[#allocation17_spill] sm:$0xff] }
 0x14c   : > { %v1010_v61 = vpop.f32.mrb[50].mxu1  ;;  %v6999_v27 = vadd.f32 %v5584_v52, %v6813_v16  ;;  %v2099_v8 = vpop.f32.mrb[51].mxu0  ;;  %v7584_v5 = vld [vmem:[#allocation19_spill] sm:$0xff]  ;;  %v7585_v52 = vld [vmem:[#allocation20_spill] sm:$0xff] }
 0x14d   : > { %v1079_v20 = vadd.f32 %v1010_v61, %v6599_v51  ;;  %v5512_v42 = vpop.f32.mrb[51].mxu1  ;;  %v7003_v6 = vadd.f32 %v2099_v8, %v6802_v39  ;;  %v7006_v48 = vadd.f32 %v6924_v36, %v1078_v62  ;;  %v7586_v8 = vld [vmem:[#allocation6_spill] sm:$0xff] }
 0x14e   : > { %5830 = vmatmul.mubr.msk.bf16.gmra.mrb[156].mxu0 %vm596_vm0, %v7580_v11 }
 0x14f   : > { %5766 = vmatmul.mubr.msk.bf16.gmra.mrb[156].mxu1 %vm596_vm0, %v6687_v40  ;;  %5833 = vmatprep.mubr.msk.bf16.mxu0 %vm596_vm0, %v7581_v41  ;;  %v7014_v16 = vadd.f32 %v1315_v47, %v1079_v20 }
 0x150   : > { %5769 = vmatprep.mubr.msk.bf16.mxu1 %vm5998_vm1, %v7573_v13 }
 0x151   : > { %v5587_v51 = vpop.f32.mrb[52].mxu0 }
 0x152   : > { %v1015_v39 = vpop.f32.mrb[52].mxu1  ;;  %v7019_v15 = vadd.f32 %v5587_v51, %v6868_v10  ;;  %v2112_v36 = vpop.f32.mrb[53].mxu0 }
 0x153   : > { %v1080_v21 = vadd.f32 %v7582_v26, %v1015_v39  ;;  %v5515_v57 = vpop.f32.mrb[53].mxu1  ;;  %v7023_v55 = vadd.f32 %v2112_v36, %v6835_v30  ;;  %v5588_v40 = vpop.f32.mrb[54].mxu0  ;;  %v7587_v26 = vld [vmem:[#allocation8_spill] sm:$0xff] }
 0x154   : > { %v1018_v14 = vpop.f32.mrb[54].mxu1  ;;  %v7026_v47 = vadd.f32 %v5588_v40, %v6880_v3  ;;  %v2115_v35 = vpop.f32.mrb[55].mxu0 }
 0x155   : > { %v1081_v1 = vadd.f32 %v7583_v38, %v1018_v14  ;;  %v5516_v43 = vpop.f32.mrb[55].mxu1  ;;  %v7030_v62 = vadd.f32 %v2115_v35, %v6842_v53  ;;  %v1377_v10 = vadd.f32 %v6922_v19, %v1080_v21  ;;  %v7588_v35 = vld [vmem:[#allocation5_spill] sm:$0xff] }
 0x156   : > { %5834 = vmatmul.mubr.msk.bf16.gmra.mrb[160].mxu0 %vm596_vm0, %v7584_v5 }
 0x157   : > { %5770 = vmatmul.mubr.msk.bf16.gmra.mrb[160].mxu1 %vm596_vm0, %v6721_v34  ;;  %v1378_v30 = vadd.f32 %v6927_v60, %v1081_v1  ;;  %5837 = vmatprep.mubr.msk.bf16.mxu0 %vm596_vm0, %v7585_v52 }
 0x158   : > { %5773 = vmatprep.mubr.msk.bf16.mxu1 %vm5998_vm1, %v7573_v13 }
 0x159   : > { %v5591_v3 = vpop.f32.mrb[56].mxu0 }
 0x15a   : > { %v1023_v61 = vpop.f32.mrb[56].mxu1  ;;  %v7043_v53 = vadd.f32 %v5591_v3, %v6931_v18  ;;  %v2128_v19 = vpop.f32.mrb[57].mxu0 }
 0x15b   : > { %v1082_v20 = vadd.f32 %v1023_v61, %v7586_v8  ;;  %v5519_v42 = vpop.f32.mrb[57].mxu1  ;;  %v7047_v51 = vadd.f32 %v2128_v19, %v6909_v46  ;;  %v5592_v34 = vpop.f32.mrb[58].mxu0  ;;  %v7589_v19 = vld [vmem:[#allocation7_spill] sm:$0xff] }
 0x15c   : > { %v1026_v60 = vpop.f32.mrb[58].mxu1  ;;  %v7050_v39 = vadd.f32 %v5592_v34, %v6938_v37  ;;  %v2131_v36 = vpop.f32.mrb[59].mxu0 }
 0x15d   : > { %v1083_v21 = vadd.f32 %v1026_v60, %v7587_v26  ;;  %v5520_v57 = vpop.f32.mrb[59].mxu1  ;;  %v7054_v40 = vadd.f32 %v2131_v36, %v6913_v49  ;;  %v1379_v18 = vadd.f32 %v6947_v44, %v1082_v20 }
 0x15e   : > { %5838 = vmatmul.mubr.msk.bf16.gmra.mrb[164].mxu0 %vm596_vm0, %v6828_v33 }
 0x15f   : > { %5774 = vmatmul.mubr.msk.bf16.gmra.mrb[164].mxu1 %vm596_vm0, %v6728_v56  ;;  %v1380_v46 = vadd.f32 %v6952_v59, %v1083_v21  ;;  %5841 = vmatprep.mubr.msk.bf16.mxu0 %vm596_vm0, %v6830_v22 }
 0x160   : > { %5777 = vmatprep.mubr.msk.bf16.mxu1 %vm5998_vm1, %v7573_v13 }
 0x161   : > { %v5595_v37 = vpop.f32.mrb[60].mxu0 }
 0x162   : > { %v1031_v14 = vpop.f32.mrb[60].mxu1  ;;  %v7067_v49 = vadd.f32 %v5595_v37, %v6978_v50  ;;  %v2144_v44 = vpop.f32.mrb[61].mxu0 }
 0x163   : > { %v1084_v38 = vadd.f32 %v7588_v35, %v1031_v14  ;;  %v5523_v1 = vpop.f32.mrb[61].mxu1  ;;  %v7071_v43 = vadd.f32 %v2144_v44, %v6954_v24  ;;  %v5596_v56 = vpop.f32.mrb[62].mxu0  ;;  %v7591_v14 = vld [vmem:[#allocation12_spill] sm:$0xff] }
 0x164   : > { %v1034_v59 = vpop.f32.mrb[62].mxu1  ;;  %v7074_v3 = vadd.f32 %v5596_v56, %v6987_v17  ;;  %v2147_v61 = vpop.f32.mrb[63].mxu0 }
 0x165   : > { %v1085_v8 = vadd.f32 %v7589_v19, %v1034_v59  ;;  %v5524_v20 = vpop.f32.mrb[63].mxu1  ;;  %v7078_v42 = vadd.f32 %v2147_v61, %v6959_v28  ;;  %v1381_v50 = vadd.f32 %v6945_v54, %v1084_v38  ;;  %v7590_v54 = vld [vmem:[#allocation10_spill] sm:$0xff] }
 0x166   : > { %5842 = vmatmul.mubr.msk.bf16.gmra.mrb[168].mxu0 %vm596_vm0, %v6860_v12 }
 0x167   : > { %5778 = vmatmul.mubr.msk.bf16.gmra.mrb[168].mxu1 %vm596_vm0, %v7580_v11  ;;  %v1382_v24 = vadd.f32 %v6950_v4, %v1085_v8  ;;  %5845 = vmatprep.mubr.msk.bf16.mxu0 %vm596_vm0, %v6865_v7 }
 0x168   : > { %5781 = vmatprep.mubr.msk.bf16.mxu1 %vm5998_vm1, %v7573_v13 }
 0x169   : > { %v5599_v17 = vpop.f32.mrb[64].mxu0 }
 0x16a   : > { %v1039_v34 = vpop.f32.mrb[64].mxu1  ;;  %v7090_v28 = vadd.f32 %v5599_v17, %v1377_v10  ;;  %v2160_v60 = vpop.f32.mrb[65].mxu0 }
 0x16b   : > { %v1086_v36 = vadd.f32 %v1039_v34, %v7590_v54  ;;  %v5527_v26 = vpop.f32.mrb[65].mxu1  ;;  %v7094_v21 = vadd.f32 %v2160_v60, %v7006_v48  ;;  %v5600_v11 = vpop.f32.mrb[66].mxu0  ;;  %v7593_v34 = vld [vmem:[#allocation11_spill] sm:$0xff] }
 0x16c   : > { %v1042_v57 = vpop.f32.mrb[66].mxu1  ;;  %v7096_v4 = vadd.f32 %v5600_v11, %v1378_v30  ;;  %v2163_v37 = vpop.f32.mrb[67].mxu0 }
 0x16d   : > { %v1087_v44 = vadd.f32 %v1042_v57, %v7591_v14  ;;  %v5528_v35 = vpop.f32.mrb[67].mxu1  ;;  %v7100_v38 = vadd.f32 %v2163_v37, %v7014_v16  ;;  %v1383_v10 = vadd.f32 %v6969_v9, %v1086_v36  ;;  %v7592_v16 = vld [vmem:[#allocation9_spill] sm:$0xff] }
 0x16e   : > { %5846 = vmatmul.mubr.msk.bf16.gmra.mrb[172].mxu0 %vm596_vm0, %v6899_v63  ;;  %v7594_v57 = vld [vmem:[#allocation13_spill] sm:$0xff] }
 0x16f   : > { %5782 = vmatmul.mubr.msk.bf16.gmra.mrb[172].mxu1 %vm596_vm0, %v7581_v41  ;;  %v1384_v48 = vadd.f32 %v6974_v0, %v1087_v44 }
 0x170   : > { %5785 = vmatprep.mubr.msk.bf16.mxu1 %vm5998_vm1, %v7573_v13 }
 0x171   : > { %v5603_v30 = vpop.f32.mrb[68].mxu0 }
 0x172   : > { %v1047_v1 = vpop.f32.mrb[68].mxu1  ;;  %v7110_v56 = vadd.f32 %v5603_v30, %v1381_v50  ;;  %v2176_v59 = vpop.f32.mrb[69].mxu0  ;;  %v7595_v30 = vld [vmem:[#allocation14_spill] sm:$0xff] }
 0x173   : > { %v1088_v61 = vadd.f32 %v7592_v16, %v1047_v1  ;;  %v5531_v19 = vpop.f32.mrb[69].mxu1  ;;  %v7113_v9 = vadd.f32 %v2176_v59, %v1379_v18  ;;  %v5604_v8 = vpop.f32.mrb[70].mxu0  ;;  %v5965_v16 = vld [vmem:[%s7544_s4] sm:$0xff]  }
 0x174   : > { %v1050_v20 = vpop.f32.mrb[70].mxu1  ;;  %v7115_v17 = vadd.f32 %v5604_v8, %v1382_v24  ;;  %v2179_v41 = vpop.f32.mrb[71].mxu0  ;;  %5855 = vmatprep.subr.bf16.mxu0 %v5965_v16  ;;  %v7596_v8 = vld [vmem:[#allocation16_spill] sm:$0xff] }
 0x175   : > { %v1089_v0 = vadd.f32 %v7593_v34, %v1050_v20  ;;  %v5532_v60 = vpop.f32.mrb[71].mxu1  ;;  %v7118_v54 = vadd.f32 %v2179_v41, %v1380_v46  ;;  %v1385_v36 = vadd.f32 %v6967_v25, %v1088_v61  ;;  %5856 = vmatpush3.bf16.msra.mxu0 %v5965_v16  ;;  %v5966_v61 = vld [vmem:[%s7544_s4 + $0x8] sm:$0xff]  }
 0x176   : > { %5857 = vmatprep.subr.bf16.mxu0 %v5966_v61 }
 0x177   : > { %5786 = vmatmul.mubr.msk.bf16.gmra.mrb[176].mxu1 %vm596_vm0, %v7584_v5  ;;  %v1386_v50 = vadd.f32 %v6972_v32, %v1089_v0 }
 0x178   : > { %5789 = vmatprep.mubr.msk.bf16.mxu1 %vm5998_vm1, %v7573_v13 }
 0x179   : > { %v5607_v18 = vpop.f32.mrb[72].mxu0  ;;  %5858 = vmatpush3.bf16.msra.mxu0 %v5966_v61 }
 0x17a   : > { %v1055_v26 = vpop.f32.mrb[72].mxu1  ;;  %v7126_v24 = vadd.f32 %v5607_v18, %v1385_v36  ;;  %v2192_v11 = vpop.f32.mrb[73].mxu0  ;;  %v7597_v36 = vld [vmem:[#allocation18_spill] sm:$0xff] }
 0x17b   : > { %v1090_v37 = vadd.f32 %v1055_v26, %v7594_v57  ;;  %v5535_v14 = vpop.f32.mrb[73].mxu1  ;;  %v7129_v46 = vadd.f32 %v2192_v11, %v1383_v10  ;;  %v5608_v44 = vpop.f32.mrb[74].mxu0  ;;  %v5967_v11 = vld [vmem:[%s7544_s4 + $0x10] sm:$0xff]  }
 0x17c   : > { %v1058_v25 = vpop.f32.mrb[74].mxu1  ;;  %v7131_v35 = vadd.f32 %v5608_v44, %v1386_v50  ;;  %v2195_v5 = vpop.f32.mrb[75].mxu0  ;;  %5859 = vmatprep.subr.bf16.mxu0 %v5967_v11 }
 0x17d   : > { %v1091_v32 = vadd.f32 %v1058_v25, %v7595_v30  ;;  %v5536_v1 = vpop.f32.mrb[75].mxu1  ;;  %v7134_v59 = vadd.f32 %v2195_v5, %v1384_v48  ;;  %5860 = vmatpush3.bf16.msra.mxu0 %v5967_v11  ;;  %v5968_v5 = vld [vmem:[%s7544_s4 + $0x18] sm:$0xff]  }
 0x17e   : > { %5861 = vmatprep.subr.bf16.mxu0 %v5968_v5 }
 0x17f   : > { %5790 = vmatmul.mubr.msk.bf16.gmra.mrb[180].mxu1 %vm596_vm0, %v7585_v52 }
 0x180   : > { %5793 = vmatprep.mubr.msk.bf16.mxu1 %vm5998_vm1, %v7573_v13 }
 0x181   : > { %v5611_v10 = vpop.f32.mrb[76].mxu0  ;;  %5862 = vmatpush3.bf16.msra.mxu0 %v5968_v5 }
 0x182   : > { %v5577_v19 = vpop.f32.mrb[76].mxu1  ;;  %v2208_v48 = vpop.f32.mrb[77].mxu0 }
 0x183   : > { %v1478_v20 = vadd.f32 %v5577_v19, %v7596_v8  ;;  %v1461_v41 = vpop.f32.mrb[77].mxu1  ;;  %v5612_v34 = vpop.f32.mrb[78].mxu0 }
 0x184   : > { %v1476_v0 = vadd.f32 %v1461_v41, %v1090_v37  ;;  %v5578_v60 = vpop.f32.mrb[78].mxu1  ;;  %v2211_v52 = vpop.f32.mrb[79].mxu0  ;;  %v5969_v41 = vld [vmem:[%s7544_s4 + $0x20] sm:$0xff]  }
 0x185   : > { %v1479_v50 = vadd.f32 %v5578_v60, %v7597_v36  ;;  %v2253_v18 = vadd.f32 %v5611_v10, %v1478_v20  ;;  %v1464_v26 = vpop.f32.mrb[79].mxu1  ;;  %5863 = vmatprep.subr.bf16.mxu0 %v5969_v41 }
 0x186   : > { %v1477_v57 = vadd.f32 %v1464_v26, %v1091_v32  ;;  %v7151_v14 = vadd.f32 %v2208_v48, %v1476_v0  ;;  %5864 = vmatpush3.bf16.msra.mxu0 %v5969_v41 }
 0x187   : > { %v2254_v44 = vadd.f32 %v5612_v34, %v1479_v50  ;;  %5794 = vmatmul.mubr.msk.bf16.gmra.mrb[184].mxu1 %vm596_vm0, %v6828_v33  ;;  %v5970_v34 = vld [vmem:[%s7544_s4 + $0x28] sm:$0xff]  }
 0x188   : > { %v7155_v37 = vadd.f32 %v2211_v52, %v1477_v57  ;;  %5797 = vmatprep.mubr.msk.bf16.mxu1 %vm5998_vm1, %v7573_v13  ;;  %5865 = vmatprep.subr.bf16.mxu0 %v5970_v34 }
 0x189   : > { %v2599_v25 = vpop.f32.mrb[80].mxu0 }
 0x18a   : > { %v2360_v30 = vpop.f32.mrb[80].mxu1  ;;  %v7162_v32 = vadd.f32 %v2599_v25, %v2253_v18  ;;  %v5679_v1 = vpop.f32.mrb[81].mxu0  ;;  %5866 = vmatpush3.bf16.msra.mxu0 %v5970_v34  ;;  %v5971_v25 = vld [vmem:[%s7544_s4 + $0x30] sm:$0xff]   ;;  %v4108_v34 = vrot.slane %v6895_v31, 5 }
 0x18b   : > { %v2479_v16 = vadd.f32 %v2360_v30, %v6996_v29  ;;  %v5617_v10 = vpop.f32.mrb[81].mxu1  ;;  %v2602_v33 = vpop.f32.mrb[82].mxu0  ;;  %5867 = vmatprep.subr.bf16.mxu0 %v5971_v25  ;;  %v5972_v30 = vld [vmem:[%s7544_s4 + $0x38] sm:$0xff]  }
 0x18c   : > { %v2363_v61 = vpop.f32.mrb[82].mxu1  ;;  %v7165_v19 = vadd.f32 %v2602_v33, %v2254_v44  ;;  %v5680_v48 = vpop.f32.mrb[83].mxu0 }
 0x18d   : > { %v2480_v8 = vadd.f32 %v2363_v61, %v7003_v6  ;;  %v5618_v20 = vpop.f32.mrb[83].mxu1 }
 0x18e   : > { %5868 = vmatpush3.bf16.msra.mxu0 %v5971_v25 }
 0x18f   : > { %5798 = vmatmul.mubr.msk.bf16.gmra.mrb[188].mxu1 %vm596_vm0, %v6830_v22  ;;  %5869 = vmatprep.subr.bf16.mxu0 %v5972_v30 }
 0x190   : > { %5801 = vmatprep.mubr.msk.bf16.mxu1 %vm5998_vm1, %v7573_v13 }
 0x191   : > { %v5685_v29 = vpop.f32.mrb[84].mxu0 }
 0x192   : > { %v2368_v0 = vpop.f32.mrb[84].mxu1  ;;  %v2681_v6 = vpop.f32.mrb[85].mxu0  ;;  %5870 = vmatpush3.bf16.msra.mxu0 %v5972_v30 }
 0x193   : > { %v2481_v60 = vadd.f32 %v2368_v0, %v6992_v23  ;;  %v5621_v52 = vpop.f32.mrb[85].mxu1  ;;  %v7179_v36 = vadd.f32 %v2681_v6, %v2479_v16  ;;  %v5686_v50 = vpop.f32.mrb[86].mxu0  ;;  %v3021_v0 = vld [vmem:[%s6109_s14 + $0x10] sm:$0xf] }
 0x194   : > { %v2371_v22 = vpop.f32.mrb[86].mxu1  ;;  %v2684_v18 = vpop.f32.mrb[87].mxu0  ;;  %v3020_v52 = vld [vmem:[%s6109_s14 + $0xc] sm:$0xe] }
 0x195   : > { %v7181_v26 = vadd.f32 %v5685_v29, %v2481_v60  ;;  %v2482_v11 = vadd.f32 %v2371_v22, %v6999_v27  ;;  %v5622_v57 = vpop.f32.mrb[87].mxu1  ;;  %v7184_v44 = vadd.f32 %v2684_v18, %v2480_v8  ;;  %v4105_v27 = vrot.slane %v6892_v45, 5 }
 0x196   : > { %v5078_v8 = vrot.slane %v6889_v2, 9  ;;  %v4112_v2 = vrot.slane %v3021_v0, 5 }
 0x197   : > { %v7189_v23 = vadd.f32 %v5686_v50, %v2482_v11  ;;  %5802 = vmatmul.mubr.msk.bf16.gmra.mrb[192].mxu1 %vm596_vm0, %v6860_v12  ;;  %v4107_v29 = vrot.slane %v4105_v27, 4  ;;  %v3022_v50 = vld [vmem:[%s6109_s14 + $0x14] sm:$0x1] }
 0x198   : > { %5805 = vmatprep.mubr.msk.bf16.mxu1 %vm5998_vm1, %v7573_v13 }
 0x199   : > { %v5689_v5 = vpop.f32.mrb[88].mxu0  ;;  %v4109_v60 = vsel %vm6563_vm8, %v4107_v29, %v4108_v34 }
 0x19a   : > { %v2376_v1 = vpop.f32.mrb[88].mxu1  ;;  %v2697_v16 = vpop.f32.mrb[89].mxu0 }
 0x19b   : > { %v2483_v10 = vadd.f32 %v2376_v1, %v7023_v55  ;;  %v5625_v33 = vpop.f32.mrb[89].mxu1  ;;  %v5690_v61 = vpop.f32.mrb[90].mxu0  ;;  %v4114_v1 = vrot.slane %v4112_v2, 4 }
 0x19c   : > { %v2379_v12 = vpop.f32.mrb[90].mxu1  ;;  %v2700_v48 = vpop.f32.mrb[91].mxu0 }
 0x19d   : > { %v2484_v45 = vadd.f32 %v2379_v12, %v7030_v62  ;;  %v7202_v20 = vadd.f32 %v2697_v16, %v2483_v10  ;;  %v5626_v41 = vpop.f32.mrb[91].mxu1  ;;  %v4106_v62 = vsel %vm6563_vm8, %v5078_v8, %v4105_v27  ;;  %v4115_v16 = vrot.slane %v3022_v50, 5 }
 0x19e   : > { %v5080_v30 = vcombine.low %v4106_v62, %v4109_v60 }
 0x19f   : > { %v7206_v55 = vadd.f32 %v2700_v48, %v2484_v45  ;;  %5806 = vmatmul.mubr.msk.bf16.gmra.mrb[196].mxu1 %vm596_vm0, %v6865_v7  ;;  %v4116_v48 = vsel %vm6563_vm8, %v4114_v1, %v4115_v16 }
 0x1a0   : > { %5809 = vmatprep.mubr.msk.bf16.mxu1 %vm5998_vm1, %v7573_v13  ;;  %v5079_v13 = vrot.slane %v3020_v52, 9 }
 0x1a1   : > { %v5693_v6 = vpop.f32.mrb[92].mxu0 }
 0x1a2   : > { %v2384_v31 = vpop.f32.mrb[92].mxu1  ;;  %v2713_v22 = vpop.f32.mrb[93].mxu0 }
 0x1a3   : > { %v2485_v18 = vadd.f32 %v2384_v31, %v7019_v15  ;;  %v5629_v11 = vpop.f32.mrb[93].mxu1  ;;  %v5694_v57 = vpop.f32.mrb[94].mxu0  ;;  %v4113_v15 = vsel %vm6563_vm8, %v5079_v13, %v4112_v2 }
 0x1a4   : > { %v2387_v7 = vpop.f32.mrb[94].mxu1  ;;  %v2716_v25 = vpop.f32.mrb[95].mxu0  ;;  %v5081_v29 = vcombine.low %v4113_v15, %v4116_v48 }
 0x1a5   : > { %v2486_v10 = vadd.f32 %v2387_v7, %v7026_v47  ;;  %v5630_v27 = vpop.f32.mrb[95].mxu1  ;;  %v7220_v33 = vadd.f32 %v5689_v5, %v2485_v18 }
 0x1a7   : > { %5810 = vmatmul.mubr.msk.bf16.gmra.mrb[200].mxu1 %vm596_vm0, %v6899_v63  ;;  %v7224_v12 = vadd.f32 %v5690_v61, %v2486_v10 }
 0x1a8   : > { %5851 = vmatprep.mubr.msk.bf16.mxu1 %vm596_vm0, %v5080_v30 }
 0x1a9   : > { %v5697_v8 = vpop.f32.mrb[96].mxu0 }
 0x1aa   : > { %v2392_v45 = vpop.f32.mrb[96].mxu1  ;;  %v2729_v41 = vpop.f32.mrb[97].mxu0 }
 0x1ab   : > { %v2487_v47 = vadd.f32 %v2392_v45, %v7047_v51  ;;  %v5633_v5 = vpop.f32.mrb[97].mxu1  ;;  %v5698_v34 = vpop.f32.mrb[98].mxu0 }
 0x1ac   : > { %v2395_v0 = vpop.f32.mrb[98].mxu1  ;;  %v2732_v63 = vpop.f32.mrb[99].mxu0 }
 0x1ad   : > { %v2488_v61 = vadd.f32 %v2395_v0, %v7054_v40  ;;  %v7233_v62 = vadd.f32 %v2713_v22, %v2487_v47  ;;  %v5634_v60 = vpop.f32.mrb[99].mxu1 }
 0x1af   : > { %v7235_v52 = vadd.f32 %v2716_v25, %v2488_v61  ;;  %5852 = vmatmul.mubr.msk.bf16.vlgmr.msra.gmra.mrb[204].mxu1 %vm596_vm0, %v5081_v29 }
 0x1b1   : > { %v7238_v58 = vpop.f32.mrb[100].mxu0 }
 0x1b2   : > { %v2400_v2 = vpop.f32.mrb[100].mxu1  ;;  %v2745_v50 = vpop.f32.mrb[101].mxu0 }
 0x1b3   : > { %v2489_v51 = vadd.f32 %v2400_v2, %v7043_v53  ;;  %v5637_v31 = vpop.f32.mrb[101].mxu1  ;;  %v5702_v18 = vpop.f32.mrb[102].mxu0 }
 0x1b4   : > { %v2403_v11 = vpop.f32.mrb[102].mxu1  ;;  %v2748_v7 = vpop.f32.mrb[103].mxu0 }
 0x1b5   : > { %v2490_v30 = vadd.f32 %v2403_v11, %v7050_v39  ;;  %v5638_v40 = vpop.f32.mrb[103].mxu1  ;;  %v2802_v22 = vadd.f32 %v5693_v6, %v2489_v51 }
 0x1b7   : > { %v7242_v13 = vadd.f32 %v5694_v57, %v2490_v30 }
 0x1b9   : > { %v7244_v25 = vpop.f32.mrb[104].mxu0 }
 0x1ba   : > { %v2408_v1 = vpop.f32.mrb[104].mxu1  ;;  %v7246_v16 = vpop.f32.mrb[105].mxu0 }
 0x1bb   : > { %v2491_v10 = vadd.f32 %v2408_v1, %v7071_v43  ;;  %v5641_v27 = vpop.f32.mrb[105].mxu1  ;;  %v7249_v15 = vpop.f32.mrb[106].mxu0 }
 0x1bc   : > { %v2411_v53 = vpop.f32.mrb[106].mxu1  ;;  %v7251_v48 = vpop.f32.mrb[107].mxu0 }
 0x1bd   : > { %v7253_v45 = vadd.f32 %v2729_v41, %v2491_v10  ;;  %v2492_v39 = vadd.f32 %v2411_v53, %v7078_v42  ;;  %v5642_v6 = vpop.f32.mrb[107].mxu1 }
 0x1bf   : > { %v7256_v57 = vadd.f32 %v2732_v63, %v2492_v39 }
 0x1c1   : > { %v7258_v47 = vpop.f32.mrb[108].mxu0 }
 0x1c2   : > { %v2416_v5 = vpop.f32.mrb[108].mxu1  ;;  %v7260_v29 = vpop.f32.mrb[109].mxu0 }
 0x1c3   : > { %v2493_v43 = vadd.f32 %v2416_v5, %v7067_v49  ;;  %v5645_v0 = vpop.f32.mrb[109].mxu1  ;;  %v7263_v61 = vpop.f32.mrb[110].mxu0 }
 0x1c4   : > { %v2419_v60 = vpop.f32.mrb[110].mxu1  ;;  %v7265_v2 = vpop.f32.mrb[111].mxu0 }
 0x1c5   : > { %v2494_v41 = vadd.f32 %v2419_v60, %v7074_v3  ;;  %v5646_v51 = vpop.f32.mrb[111].mxu1  ;;  %v2806_v42 = vadd.f32 %v5697_v8, %v2493_v43 }
 0x1c7   : > { %v2807_v31 = vadd.f32 %v5698_v34, %v2494_v41 }
 0x1c9   : > { %v5721_v63 = vpop.f32.mrb[112].mxu0 }
 0x1ca   : > { %v2424_v11 = vpop.f32.mrb[112].mxu1  ;;  %v7269_v30 = vadd.f32 %v5721_v63, %v7181_v26  ;;  %v3357_v40 = vpop.f32.mrb[113].mxu0 }
 0x1cb   : > { %v2495_v1 = vadd.f32 %v2424_v11, %v7094_v21  ;;  %v5649_v49 = vpop.f32.mrb[113].mxu1  ;;  %v7273_v10 = vadd.f32 %v3357_v40, %v7179_v36  ;;  %v5722_v27 = vpop.f32.mrb[114].mxu0 }
 0x1cc   : > { %v2427_v53 = vpop.f32.mrb[114].mxu1  ;;  %v7276_v39 = vadd.f32 %v5722_v27, %v7189_v23  ;;  %v3360_v3 = vpop.f32.mrb[115].mxu0 }
 0x1cd   : > { %v2496_v8 = vadd.f32 %v2427_v53, %v7100_v38  ;;  %v5650_v34 = vpop.f32.mrb[115].mxu1  ;;  %v7280_v6 = vadd.f32 %v3360_v3, %v7184_v44  ;;  %v2808_v26 = vadd.f32 %v2745_v50, %v2495_v1 }
 0x1cf   : > { %v2809_v5 = vadd.f32 %v2748_v7, %v2496_v8 }
 0x1d1   : > { %v5725_v43 = vpop.f32.mrb[116].mxu0 }
 0x1d2   : > { %v2432_v21 = vpop.f32.mrb[116].mxu1  ;;  %v7283_v0 = vadd.f32 %v5725_v43, %v7220_v33  ;;  %v3373_v36 = vpop.f32.mrb[117].mxu0 }
 0x1d3   : > { %v2497_v60 = vadd.f32 %v2432_v21, %v7090_v28  ;;  %v5653_v41 = vpop.f32.mrb[117].mxu1  ;;  %v7287_v23 = vadd.f32 %v3373_v36, %v7202_v20  ;;  %v5726_v51 = vpop.f32.mrb[118].mxu0 }
 0x1d4   : > { %v2435_v38 = vpop.f32.mrb[118].mxu1  ;;  %v7290_v63 = vadd.f32 %v5726_v51, %v7224_v12  ;;  %v3376_v44 = vpop.f32.mrb[119].mxu0 }
 0x1d5   : > { %v2498_v50 = vadd.f32 %v2435_v38, %v7096_v4  ;;  %v5654_v7 = vpop.f32.mrb[119].mxu1  ;;  %v7294_v11 = vadd.f32 %v3376_v44, %v7206_v55  ;;  %v2810_v33 = vadd.f32 %v7238_v58, %v2497_v60 }
 0x1d7   : > { %v2811_v40 = vadd.f32 %v5702_v18, %v2498_v50 }
 0x1d9   : > { %v5729_v28 = vpop.f32.mrb[120].mxu0 }
 0x1da   : > { %v2440_v1 = vpop.f32.mrb[120].mxu1  ;;  %v7297_v49 = vadd.f32 %v5729_v28, %v2802_v22  ;;  %v3389_v20 = vpop.f32.mrb[121].mxu0 }
 0x1db   : > { %v2499_v27 = vadd.f32 %v2440_v1, %v7113_v9  ;;  %v5657_v53 = vpop.f32.mrb[121].mxu1  ;;  %v7301_v12 = vadd.f32 %v3389_v20, %v7233_v62  ;;  %v5730_v3 = vpop.f32.mrb[122].mxu0 }
 0x1dc   : > { %v2443_v4 = vpop.f32.mrb[122].mxu1  ;;  %v7304_v8 = vadd.f32 %v5730_v3, %v7242_v13  ;;  %v3392_v55 = vpop.f32.mrb[123].mxu0 }
 0x1dd   : > { %v2500_v58 = vadd.f32 %v2443_v4, %v7118_v54  ;;  %v5658_v18 = vpop.f32.mrb[123].mxu1  ;;  %v7308_v34 = vadd.f32 %v3392_v55, %v7235_v52  ;;  %v2812_v22 = vadd.f32 %v7246_v16, %v2499_v27 }
 0x1df   : > { %v2813_v9 = vadd.f32 %v7251_v48, %v2500_v58 }
 0x1e1   : > { %v5733_v43 = vpop.f32.mrb[124].mxu0 }
 0x1e2   : > { %v2448_v21 = vpop.f32.mrb[124].mxu1  ;;  %v7312_v62 = vadd.f32 %v5733_v43, %v2806_v42  ;;  %v3405_v36 = vpop.f32.mrb[125].mxu0 }
 0x1e3   : > { %v2501_v60 = vadd.f32 %v2448_v21, %v7110_v56  ;;  %v5661_v13 = vpop.f32.mrb[125].mxu1  ;;  %v7316_v41 = vadd.f32 %v3405_v36, %v7253_v45  ;;  %v5734_v54 = vpop.f32.mrb[126].mxu0 }
 0x1e4   : > { %v2451_v51 = vpop.f32.mrb[126].mxu1  ;;  %v7318_v38 = vadd.f32 %v5734_v54, %v2807_v31  ;;  %v3408_v52 = vpop.f32.mrb[127].mxu0 }
 0x1e5   : > { %v2502_v16 = vadd.f32 %v2451_v51, %v7115_v17  ;;  %v5662_v44 = vpop.f32.mrb[127].mxu1  ;;  %v7322_v48 = vadd.f32 %v3408_v52, %v7256_v57  ;;  %v2814_v42 = vadd.f32 %v7244_v25, %v2501_v60 }
 0x1e7   : > { %v2815_v50 = vadd.f32 %v7249_v15, %v2502_v16 }
 0x1e9   : > { %v5737_v56 = vpop.f32.mrb[128].mxu0 }
 0x1ea   : > { %v2456_v7 = vpop.f32.mrb[128].mxu1  ;;  %v7326_v28 = vadd.f32 %v5737_v56, %v2810_v33  ;;  %v3421_v45 = vpop.f32.mrb[129].mxu0 }
 0x1eb   : > { %v2503_v1 = vadd.f32 %v2456_v7, %v7129_v46  ;;  %v5665_v31 = vpop.f32.mrb[129].mxu1  ;;  %v7329_v20 = vadd.f32 %v3421_v45, %v2808_v26  ;;  %v5738_v27 = vpop.f32.mrb[130].mxu0 }
 0x1ec   : > { %v2459_v17 = vpop.f32.mrb[130].mxu1  ;;  %v7331_v53 = vadd.f32 %v5738_v27, %v2811_v40  ;;  %v3424_v57 = vpop.f32.mrb[131].mxu0 }
 0x1ed   : > { %v2504_v3 = vadd.f32 %v2459_v17, %v7134_v59  ;;  %v5666_v25 = vpop.f32.mrb[131].mxu1  ;;  %v7334_v4 = vadd.f32 %v3424_v57, %v2809_v5  ;;  %v2816_v15 = vadd.f32 %v7260_v29, %v2503_v1 }
 0x1ef   : > { %v2817_v33 = vadd.f32 %v7265_v2, %v2504_v3 }
 0x1f1   : > { %v5741_v55 = vpop.f32.mrb[132].mxu0 }
 0x1f2   : > { %v2464_v58 = vpop.f32.mrb[132].mxu1  ;;  %v7338_v46 = vadd.f32 %v5741_v55, %v2814_v42  ;;  %v3437_v26 = vpop.f32.mrb[133].mxu0 }
 0x1f3   : > { %v2505_v18 = vadd.f32 %v2464_v58, %v7126_v24  ;;  %v5669_v43 = vpop.f32.mrb[133].mxu1  ;;  %v7341_v40 = vadd.f32 %v3437_v26, %v2812_v22  ;;  %v5742_v21 = vpop.f32.mrb[134].mxu0 }
 0x1f4   : > { %v2467_v36 = vpop.f32.mrb[134].mxu1  ;;  %v7343_v59 = vadd.f32 %v5742_v21, %v2815_v50  ;;  %v3440_v5 = vpop.f32.mrb[135].mxu0 }
 0x1f5   : > { %v2506_v60 = vadd.f32 %v2467_v36, %v7131_v35  ;;  %v5670_v29 = vpop.f32.mrb[135].mxu1  ;;  %v7346_v13 = vadd.f32 %v3440_v5, %v2813_v9  ;;  %v2818_v2 = vadd.f32 %v7258_v47, %v2505_v18 }
 0x1f7   : > { %v2819_v54 = vadd.f32 %v7263_v61, %v2506_v60 }
 0x1f9   : > { %v5745_v51 = vpop.f32.mrb[136].mxu0 }
 0x1fa   : > { %v2472_v52 = vpop.f32.mrb[136].mxu1  ;;  %v7350_v24 = vadd.f32 %v5745_v51, %v2818_v2  ;;  %v3453_v22 = vpop.f32.mrb[137].mxu0 }
 0x1fb   : > { %v2507_v16 = vadd.f32 %v2472_v52, %v7151_v14  ;;  %v5673_v44 = vpop.f32.mrb[137].mxu1  ;;  %v7353_v42 = vadd.f32 %v3453_v22, %v2816_v15  ;;  %v5746_v50 = vpop.f32.mrb[138].mxu0 }
 0x1fc   : > { %v2475_v56 = vpop.f32.mrb[138].mxu1  ;;  %v7355_v35 = vadd.f32 %v5746_v50, %v2819_v54  ;;  %v3456_v9 = vpop.f32.mrb[139].mxu0  ;;  %v7375_v44 = vld [vmem:[%s7543_s3] ss:$0 sm:$0xff] }
 0x1fd   : > { %v2508_v7 = vadd.f32 %v2475_v56, %v7155_v37  ;;  %v5674_v47 = vpop.f32.mrb[139].mxu1  ;;  %v7358_v45 = vadd.f32 %v3456_v9, %v2817_v33 }
 0x201   : > { %v5749_v61 = vpop.f32.mrb[140].mxu0 }
 0x202   : > { %v5715_v1 = vpop.f32.mrb[140].mxu1  ;;  %v3469_v31 = vpop.f32.mrb[141].mxu0 }
 0x203   : > { %v2963_v27 = vadd.f32 %v5715_v1, %v7162_v32  ;;  %v2946_v17 = vpop.f32.mrb[141].mxu1  ;;  %v5750_v14 = vpop.f32.mrb[142].mxu0 }
 0x204   : > { %v2961_v57 = vadd.f32 %v2946_v17, %v2507_v16  ;;  %v5716_v3 = vpop.f32.mrb[142].mxu1  ;;  %v3472_v25 = vpop.f32.mrb[143].mxu0 }
 0x205   : > { %v2964_v15 = vadd.f32 %v5716_v3, %v7165_v19  ;;  %v3514_v55 = vadd.f32 %v5749_v61, %v2963_v27  ;;  %v2949_v58 = vpop.f32.mrb[143].mxu1 }
 0x206   : > { %v2962_v26 = vadd.f32 %v2949_v58, %v2508_v7  ;;  %v7362_v18 = vadd.f32 %v3469_v31, %v2961_v57 }
 0x207   : > { %v3515_v37 = vadd.f32 %v5750_v14, %v2964_v15 }
 0x208   : > { %v7364_v33 = vadd.f32 %v3472_v25, %v2962_v26 }
 0x209   : > { %v3851_v43 = vpop.f32.mrb[144].mxu0 }
 0x20a   : > { %v3621_v21 = vpop.f32.mrb[144].mxu1  ;;  %v7366_v36 = vadd.f32 %v3851_v43, %v3514_v55  ;;  %v5817_v32 = vpop.f32.mrb[145].mxu0 }
 0x20b   : > { %v3740_v5 = vadd.f32 %v3621_v21, %v7273_v10  ;;  %v5755_v60 = vpop.f32.mrb[145].mxu1  ;;  %v3854_v29 = vpop.f32.mrb[146].mxu0 }
 0x20c   : > { %v3624_v2 = vpop.f32.mrb[146].mxu1  ;;  %v7369_v54 = vadd.f32 %v3854_v29, %v3515_v37  ;;  %v5818_v19 = vpop.f32.mrb[147].mxu0 }
 0x20d   : > { %v3741_v51 = vadd.f32 %v3624_v2, %v7280_v6  ;;  %v5756_v52 = vpop.f32.mrb[147].mxu1 }
 0x211   : > { %v5823_v22 = vpop.f32.mrb[148].mxu0 }
 0x212   : > { %v3629_v16 = vpop.f32.mrb[148].mxu1  ;;  %v3933_v50 = vpop.f32.mrb[149].mxu0 }
 0x213   : > { %v3742_v56 = vadd.f32 %v3629_v16, %v7269_v30  ;;  %v5759_v10 = vpop.f32.mrb[149].mxu1  ;;  %v4044_v9 = vadd.f32 %v3933_v50, %v3740_v5  ;;  %v5824_v7 = vpop.f32.mrb[150].mxu0 }
 0x214   : > { %v3632_v47 = vpop.f32.mrb[150].mxu1  ;;  %v3936_v61 = vpop.f32.mrb[151].mxu0 }
 0x215   : > { %v4046_v1 = vadd.f32 %v5823_v22, %v3742_v56  ;;  %v4232_v31 = vadd.f32 %v7375_v44, %v4044_v9  ;;  %v3743_v6 = vadd.f32 %v3632_v47, %v7276_v39  ;;  %v5760_v27 = vpop.f32.mrb[151].mxu1  ;;  %v4045_v17 = vadd.f32 %v3936_v61, %v3741_v51 }
 0x217   : > { %v4234_v14 = vadd.f32 %v7375_v44, %v4046_v1  ;;  %v4047_v57 = vadd.f32 %v5824_v7, %v3743_v6  ;;  %v4233_v3 = vadd.f32 %v7375_v44, %v4045_v17  ;;  %v4264_v25 = vmax.f32 %v4232_v31, 0.0 }
 0x219   : > { %v4235_v30 = vadd.f32 %v7375_v44, %v4047_v57  ;;  %v4265_v15 = vmax.f32 %v4233_v3, 0.0  ;;  %v5827_v55 = vpop.f32.mrb[152].mxu0  ;;  %v4266_v37 = vmax.f32 %v4234_v14, 0.0 }
 0x21a   : > { %v3637_v58 = vpop.f32.mrb[152].mxu1  ;;  %v3949_v26 = vpop.f32.mrb[153].mxu0 }
 0x21b   : > { %v4267_v43 = vmax.f32 %v4235_v30, 0.0  ;;  %v3744_v21 = vadd.f32 %v3637_v58, %v7287_v23  ;;  %v5763_v32 = vpop.f32.mrb[153].mxu1  ;;  %v5828_v39 = vpop.f32.mrb[154].mxu0  ;;  %v4296_v5 = vpack.c.bf16 %v4265_v15, %v4264_v25 }
 0x21c   : > { %v3640_v60 = vpop.f32.mrb[154].mxu1  ;;  %v3952_v29 = vpop.f32.mrb[155].mxu0 }
 0x21d   : > { %v4297_v2 = vpack.c.bf16 %v4267_v43, %v4266_v37  ;;  %v3745_v19 = vadd.f32 %v3640_v60, %v7294_v11  ;;  %v4048_v51 = vadd.f32 %v3949_v26, %v3744_v21  ;;  %v5764_v52 = vpop.f32.mrb[155].mxu1  ;;  %5871 = vmatprep.mubr.bf16.mxu0 %v4296_v5 }
 0x21f   : > { %v4236_v22 = vadd.f32 %v7375_v44, %v4048_v51  ;;  %v4049_v16 = vadd.f32 %v3952_v29, %v3745_v19  ;;  %5872 = vmatmul.mubr.bf16.vlgmr.msra.gmra.mrb[176].mxu0 %v4297_v2 }
 0x221   : > { %v4237_v50 = vadd.f32 %v7375_v44, %v4049_v16  ;;  %v5831_v56 = vpop.f32.mrb[156].mxu0  ;;  %v4268_v9 = vmax.f32 %v4236_v22, 0.0 }
 0x222   : > { %v3645_v10 = vpop.f32.mrb[156].mxu1  ;;  %v3965_v23 = vpop.f32.mrb[157].mxu0 }
 0x223   : > { %v4269_v7 = vmax.f32 %v4237_v50, 0.0  ;;  %v3746_v47 = vadd.f32 %v3645_v10, %v7283_v0  ;;  %v5767_v61 = vpop.f32.mrb[157].mxu1  ;;  %v5832_v1 = vpop.f32.mrb[158].mxu0 }
 0x224   : > { %v3648_v31 = vpop.f32.mrb[158].mxu1  ;;  %v3968_v11 = vpop.f32.mrb[159].mxu0 }
 0x225   : > { %v4050_v6 = vadd.f32 %v5827_v55, %v3746_v47  ;;  %v3747_v27 = vadd.f32 %v3648_v31, %v7290_v63  ;;  %v5768_v17 = vpop.f32.mrb[159].mxu1  ;;  %v4298_v14 = vpack.c.bf16 %v4269_v7, %v4268_v9 }
 0x227   : > { %v4238_v57 = vadd.f32 %v7375_v44, %v4050_v6  ;;  %v4051_v3 = vadd.f32 %v5828_v39, %v3747_v27  ;;  %5875 = vmatprep.mubr.bf16.mxu0 %v4298_v14 }
 0x229   : > { %v4239_v25 = vadd.f32 %v7375_v44, %v4051_v3  ;;  %v7391_v30 = vpop.f32.mrb[160].mxu0  ;;  %v4270_v0 = vmax.f32 %v4238_v57, 0.0 }
 0x22a   : > { %v3653_v15 = vpop.f32.mrb[160].mxu1  ;;  %v3981_v58 = vpop.f32.mrb[161].mxu0 }
 0x22b   : > { %v4271_v26 = vmax.f32 %v4239_v25, 0.0  ;;  %v3748_v37 = vadd.f32 %v3653_v15, %v7301_v12  ;;  %v5771_v43 = vpop.f32.mrb[161].mxu1  ;;  %v5836_v55 = vpop.f32.mrb[162].mxu0 }
 0x22c   : > { %v3656_v21 = vpop.f32.mrb[162].mxu1  ;;  %v3984_v63 = vpop.f32.mrb[163].mxu0 }
 0x22d   : > { %v3749_v32 = vadd.f32 %v3656_v21, %v7308_v34  ;;  %v4052_v5 = vadd.f32 %v3965_v23, %v3748_v37  ;;  %v5772_v60 = vpop.f32.mrb[163].mxu1  ;;  %v4299_v39 = vpack.c.bf16 %v4271_v26, %v4270_v0 }
 0x22f   : > { %v4240_v29 = vadd.f32 %v7375_v44, %v4052_v5  ;;  %v4053_v2 = vadd.f32 %v3968_v11, %v3749_v32  ;;  %5876 = vmatmul.mubr.bf16.gmra.mrb[180].mxu0 %v4299_v39 }
 0x231   : > { %v4241_v19 = vadd.f32 %v7375_v44, %v4053_v2  ;;  %v7397_v51 = vpop.f32.mrb[164].mxu0  ;;  %v4272_v12 = vmax.f32 %v4240_v29, 0.0 }
 0x232   : > { %v3661_v52 = vpop.f32.mrb[164].mxu1  ;;  %v3997_v22 = vpop.f32.mrb[165].mxu0 }
 0x233   : > { %v4273_v16 = vmax.f32 %v4241_v19, 0.0  ;;  %v3750_v50 = vadd.f32 %v3661_v52, %v7297_v49  ;;  %v5775_v10 = vpop.f32.mrb[165].mxu1  ;;  %v7400_v9 = vpop.f32.mrb[166].mxu0 }
 0x234   : > { %v3664_v34 = vpop.f32.mrb[166].mxu1  ;;  %v4000_v23 = vpop.f32.mrb[167].mxu0 }
 0x235   : > { %v4054_v7 = vadd.f32 %v5831_v56, %v3750_v50  ;;  %v3751_v47 = vadd.f32 %v3664_v34, %v7304_v8  ;;  %v5776_v61 = vpop.f32.mrb[167].mxu1  ;;  %v4300_v31 = vpack.c.bf16 %v4273_v16, %v4272_v12 }
 0x237   : > { %v4242_v11 = vadd.f32 %v7375_v44, %v4054_v7  ;;  %v4055_v6 = vadd.f32 %v5832_v1, %v3751_v47  ;;  %5879 = vmatprep.mubr.bf16.mxu0 %v4300_v31 }
 0x239   : > { %v4243_v27 = vadd.f32 %v7375_v44, %v4055_v6  ;;  %v7405_v17 = vpop.f32.mrb[168].mxu0  ;;  %v4274_v57 = vmax.f32 %v4242_v11, 0.0 }
 0x23a   : > { %v3669_v14 = vpop.f32.mrb[168].mxu1  ;;  %v7407_v49 = vpop.f32.mrb[169].mxu0 }
 0x23b   : > { %v4275_v3 = vmax.f32 %v4243_v27, 0.0  ;;  %v3752_v25 = vadd.f32 %v3669_v14, %v7316_v41  ;;  %v5779_v56 = vpop.f32.mrb[169].mxu1  ;;  %v7410_v15 = vpop.f32.mrb[170].mxu0 }
 0x23c   : > { %v3672_v8 = vpop.f32.mrb[170].mxu1  ;;  %v7412_v0 = vpop.f32.mrb[171].mxu0 }
 0x23d   : > { %v3753_v1 = vadd.f32 %v3672_v8, %v7322_v48  ;;  %v4056_v26 = vadd.f32 %v3981_v58, %v3752_v25  ;;  %v5780_v37 = vpop.f32.mrb[171].mxu1  ;;  %v4301_v43 = vpack.c.bf16 %v4275_v3, %v4274_v57 }
 0x23f   : > { %v4244_v21 = vadd.f32 %v7375_v44, %v4056_v26  ;;  %v4057_v32 = vadd.f32 %v3984_v63, %v3753_v1  ;;  %5880 = vmatmul.mubr.bf16.gmra.mrb[184].mxu0 %v4301_v43 }
 0x241   : > { %v4245_v5 = vadd.f32 %v7375_v44, %v4057_v32  ;;  %v7417_v60 = vpop.f32.mrb[172].mxu0  ;;  %v4276_v29 = vmax.f32 %v4244_v21, 0.0 }
 0x242   : > { %v3677_v41 = vpop.f32.mrb[172].mxu1  ;;  %v7419_v39 = vpop.f32.mrb[173].mxu0 }
 0x243   : > { %v4277_v2 = vmax.f32 %v4245_v5, 0.0  ;;  %v3754_v19 = vadd.f32 %v3677_v41, %v7312_v62  ;;  %v5783_v52 = vpop.f32.mrb[173].mxu1  ;;  %v7422_v48 = vpop.f32.mrb[174].mxu0 }
 0x244   : > { %v3680_v58 = vpop.f32.mrb[174].mxu1  ;;  %v7424_v12 = vpop.f32.mrb[175].mxu0 }
 0x245   : > { %v4058_v63 = vadd.f32 %v7391_v30, %v3754_v19  ;;  %v3755_v16 = vadd.f32 %v3680_v58, %v7318_v38  ;;  %v5784_v50 = vpop.f32.mrb[175].mxu1  ;;  %v4302_v10 = vpack.c.bf16 %v4277_v2, %v4276_v29 }
 0x247   : > { %v4246_v34 = vadd.f32 %v7375_v44, %v4058_v63  ;;  %v4059_v7 = vadd.f32 %v5836_v55, %v3755_v16  ;;  %5883 = vmatprep.mubr.bf16.mxu0 %v4302_v10 }
 0x249   : > { %v4247_v47 = vadd.f32 %v7375_v44, %v4059_v7  ;;  %v4278_v62 = vmax.f32 %v4246_v34, 0.0 }
 0x24a   : > { %v3685_v61 = vpop.f32.mrb[176].mxu1 }
 0x24b   : > { %v4279_v31 = vmax.f32 %v4247_v47, 0.0  ;;  %v3756_v11 = vadd.f32 %v3685_v61, %v7329_v20  ;;  %v5787_v6 = vpop.f32.mrb[177].mxu1 }
 0x24c   : > { %v3688_v27 = vpop.f32.mrb[178].mxu1 }
 0x24d   : > { %v3757_v14 = vadd.f32 %v3688_v27, %v7334_v4  ;;  %v4060_v30 = vadd.f32 %v3997_v22, %v3756_v11  ;;  %v5788_v57 = vpop.f32.mrb[179].mxu1  ;;  %v4303_v38 = vpack.c.bf16 %v4279_v31, %v4278_v62 }
 0x24f   : > { %v4248_v3 = vadd.f32 %v7375_v44, %v4060_v30  ;;  %v4061_v25 = vadd.f32 %v4000_v23, %v3757_v14  ;;  %5884 = vmatmul.mubr.bf16.gmra.mrb[188].mxu0 %v4303_v38 }
 0x251   : > { %v4249_v55 = vadd.f32 %v7375_v44, %v4061_v25  ;;  %v4280_v8 = vmax.f32 %v4248_v3, 0.0 }
 0x252   : > { %v3693_v56 = vpop.f32.mrb[180].mxu1 }
 0x253   : > { %v4281_v1 = vmax.f32 %v4249_v55, 0.0  ;;  %v3758_v26 = vadd.f32 %v3693_v56, %v7326_v28  ;;  %v5791_v37 = vpop.f32.mrb[181].mxu1 }
 0x254   : > { %v3696_v20 = vpop.f32.mrb[182].mxu1 }
 0x255   : > { %v4062_v43 = vadd.f32 %v7397_v51, %v3758_v26  ;;  %v3759_v4 = vadd.f32 %v3696_v20, %v7331_v53  ;;  %v5792_v22 = vpop.f32.mrb[183].mxu1  ;;  %v4304_v21 = vpack.c.bf16 %v4281_v1, %v4280_v8 }
 0x257   : > { %v4250_v32 = vadd.f32 %v7375_v44, %v4062_v43  ;;  %v4063_v23 = vadd.f32 %v7400_v9, %v3759_v4  ;;  %5887 = vmatprep.mubr.bf16.mxu0 %v4304_v21 }
 0x259   : > { %v4251_v5 = vadd.f32 %v7375_v44, %v4063_v23  ;;  %v4282_v29 = vmax.f32 %v4250_v32, 0.0 }
 0x25a   : > { %v3701_v41 = vpop.f32.mrb[184].mxu1 }
 0x25b   : > { %v4283_v2 = vmax.f32 %v4251_v5, 0.0  ;;  %v3760_v28 = vadd.f32 %v3701_v41, %v7341_v40  ;;  %v5795_v19 = vpop.f32.mrb[185].mxu1 }
 0x25c   : > { %v3704_v52 = vpop.f32.mrb[186].mxu1 }
 0x25d   : > { %v3761_v51 = vadd.f32 %v3704_v52, %v7346_v13  ;;  %v4064_v53 = vadd.f32 %v7407_v49, %v3760_v28  ;;  %v5796_v58 = vpop.f32.mrb[187].mxu1  ;;  %v4305_v63 = vpack.c.bf16 %v4283_v2, %v4282_v29 }
 0x25f   : > { %v4252_v16 = vadd.f32 %v7375_v44, %v4064_v53  ;;  %v4065_v9 = vadd.f32 %v7412_v0, %v3761_v51  ;;  %5888 = vmatmul.mubr.bf16.gmra.mrb[192].mxu0 %v4305_v63 }
 0x261   : > { %v4253_v50 = vadd.f32 %v7375_v44, %v4065_v9  ;;  %v4284_v34 = vmax.f32 %v4252_v16, 0.0 }
 0x262   : > { %v3709_v10 = vpop.f32.mrb[188].mxu1 }
 0x263   : > { %v4285_v7 = vmax.f32 %v4253_v50, 0.0  ;;  %v3762_v40 = vadd.f32 %v3709_v10, %v7338_v46  ;;  %v5799_v47 = vpop.f32.mrb[189].mxu1 }
 0x264   : > { %v3712_v61 = vpop.f32.mrb[190].mxu1 }
 0x265   : > { %v4066_v13 = vadd.f32 %v7405_v17, %v3762_v40  ;;  %v3763_v49 = vadd.f32 %v3712_v61, %v7343_v59  ;;  %v5800_v62 = vpop.f32.mrb[191].mxu1  ;;  %v4306_v31 = vpack.c.bf16 %v4285_v7, %v4284_v34 }
 0x267   : > { %v4254_v11 = vadd.f32 %v7375_v44, %v4066_v13  ;;  %v4067_v0 = vadd.f32 %v7410_v15, %v3763_v49  ;;  %5891 = vmatprep.mubr.bf16.mxu0 %v4306_v31 }
 0x269   : > { %v4255_v6 = vadd.f32 %v7375_v44, %v4067_v0  ;;  %v4286_v14 = vmax.f32 %v4254_v11, 0.0 }
 0x26a   : > { %v3717_v27 = vpop.f32.mrb[192].mxu1 }
 0x26b   : > { %v4287_v30 = vmax.f32 %v4255_v6, 0.0  ;;  %v3764_v46 = vadd.f32 %v3717_v27, %v7353_v42  ;;  %v5803_v57 = vpop.f32.mrb[193].mxu1 }
 0x26c   : > { %v3720_v38 = vpop.f32.mrb[194].mxu1 }
 0x26d   : > { %v3765_v17 = vadd.f32 %v3720_v38, %v7358_v45  ;;  %v4068_v59 = vadd.f32 %v7419_v39, %v3764_v46  ;;  %v5804_v3 = vpop.f32.mrb[195].mxu1  ;;  %v4307_v25 = vpack.c.bf16 %v4287_v30, %v4286_v14 }
 0x26f   : > { %v4256_v55 = vadd.f32 %v7375_v44, %v4068_v59  ;;  %v4069_v15 = vadd.f32 %v7424_v12, %v3765_v17  ;;  %5892 = vmatmul.mubr.bf16.gmra.mrb[196].mxu0 %v4307_v25 }
 0x271   : > { %v4257_v56 = vadd.f32 %v7375_v44, %v4069_v15  ;;  %v4288_v1 = vmax.f32 %v4256_v55, 0.0 }
 0x272   : > { %v3725_v8 = vpop.f32.mrb[196].mxu1 }
 0x273   : > { %v4289_v26 = vmax.f32 %v4257_v56, 0.0  ;;  %v3766_v42 = vadd.f32 %v3725_v8, %v7350_v24  ;;  %v5807_v37 = vpop.f32.mrb[197].mxu1 }
 0x274   : > { %v3728_v20 = vpop.f32.mrb[198].mxu1 }
 0x275   : > { %v4070_v45 = vadd.f32 %v7417_v60, %v3766_v42  ;;  %v3767_v39 = vadd.f32 %v3728_v20, %v7355_v35  ;;  %v5808_v43 = vpop.f32.mrb[199].mxu1  ;;  %v4308_v4 = vpack.c.bf16 %v4289_v26, %v4288_v1 }
 0x277   : > { %v4258_v22 = vadd.f32 %v7375_v44, %v4070_v45  ;;  %v4071_v12 = vadd.f32 %v7422_v48, %v3767_v39  ;;  %5895 = vmatprep.mubr.bf16.mxu0 %v4308_v4 }
 0x279   : > { %v4259_v21 = vadd.f32 %v7375_v44, %v4071_v12  ;;  %v4290_v23 = vmax.f32 %v4258_v22, 0.0 }
 0x27a   : > { %v3733_v32 = vpop.f32.mrb[200].mxu1 }
 0x27b   : > { %v4291_v5 = vmax.f32 %v4259_v21, 0.0  ;;  %v3768_v24 = vadd.f32 %v3733_v32, %v7362_v18  ;;  %v5811_v41 = vpop.f32.mrb[201].mxu1 }
 0x27c   : > { %v3736_v29 = vpop.f32.mrb[202].mxu1 }
 0x27d   : > { %v3769_v60 = vadd.f32 %v3736_v29, %v7364_v33  ;;  %v5812_v2 = vpop.f32.mrb[203].mxu1  ;;  %v4309_v35 = vpack.c.bf16 %v4291_v5, %v4290_v23 }
 0x27f   : > { %5896 = vmatmul.mubr.bf16.gmra.mrb[200].mxu0 %v4309_v35 }
 0x282   : > { %v5853_v28 = vpop.f32.mrb[204].mxu1 }
 0x283   : > { %v4184_v19 = vadd.f32 %v5853_v28, %v7366_v36  ;;  %v4167_v52 = vpop.f32.mrb[205].mxu1 }
 0x284   : > { %v4182_v48 = vadd.f32 %v4167_v52, %v3768_v24  ;;  %v5854_v51 = vpop.f32.mrb[206].mxu1 }
 0x285   : > { %v4262_v53 = vadd.f32 %v7375_v44, %v4184_v19  ;;  %v4185_v58 = vadd.f32 %v5854_v51, %v7369_v54  ;;  %v4170_v63 = vpop.f32.mrb[207].mxu1  ;;  %v7475_v54 = vld [vmem:[%s7545_s5] ss:$0 sm:$0xff] }
 0x286   : > { %v4260_v18 = vadd.f32 %v7375_v44, %v4182_v48  ;;  %v4183_v16 = vadd.f32 %v4170_v63, %v3769_v60 }
 0x287   : > { %v4263_v33 = vadd.f32 %v7375_v44, %v4185_v58  ;;  %v4294_v50 = vmax.f32 %v4262_v53, 0.0 }
 0x288   : > { %v4261_v9 = vadd.f32 %v7375_v44, %v4183_v16  ;;  %v4292_v34 = vmax.f32 %v4260_v18, 0.0 }
 0x289   : > { %v4295_v10 = vmax.f32 %v4263_v33, 0.0 }
 0x28a   : > { %v4293_v36 = vmax.f32 %v4261_v9, 0.0 }
 0x28b   : > { %v4311_v7 = vpack.c.bf16 %v4295_v10, %v4294_v50 }
 0x28c   : > { %v4310_v40 = vpack.c.bf16 %v4293_v36, %v4292_v34 }
 0x28e   : > { %5899 = vmatprep.mubr.bf16.mxu0 %v4310_v40 }
 0x28f   : > { %5900 = vmatmul.mubr.bf16.gmra.mrb[204].mxu0 %v4311_v7 }
 0x2f2   : > { %v5873_v47 = vpop.f32.mrb[176].mxu0 }
 0x2f3   : > { %v4417_v61 = vpop.f32.mrb[177].mxu0  ;;  %v4426_v49 = vadd.f32 %v5873_v47, %v7475_v54 }
 0x2f4   : > { %v5874_v13 = vpop.f32.mrb[178].mxu0  ;;  %v4418_v31 = vadd.f32 %v7475_v54, %v4417_v61 }
 0x2f5   : > { %v4429_v44 = vadd.f32 %v5874_v13, %v7475_v54  ;;  %v4420_v62 = vpop.f32.mrb[179].mxu0 }
 0x2f6   : > { %v4421_v11 = vadd.f32 %v7475_v54, %v4420_v62 }
 0x2f7   : > { %v5171_v0 = vpack.c.bf16 %v4429_v44, %v4426_v49 }
 0x2f8   : > { %v5166_v6 = vpack.c.bf16 %v4421_v11, %v4418_v31 }
 0x2f9   : > { %5243 = vst [vmem:[%s7484_s10 + $0x8] sm:$0xff] %v5171_v0  }
 0x2fa   : > { %5167 = vst [vmem:[%s7484_s10] sm:$0xff] %v5166_v6  }
 0x302   : > { %v5877_v27 = vpop.f32.mrb[180].mxu0 }
 0x303   : > { %v4433_v14 = vpop.f32.mrb[181].mxu0  ;;  %v4442_v46 = vadd.f32 %v5877_v27, %v7475_v54 }
 0x304   : > { %v5878_v30 = vpop.f32.mrb[182].mxu0  ;;  %v4434_v17 = vadd.f32 %v7475_v54, %v4433_v14 }
 0x305   : > { %v4445_v57 = vadd.f32 %v5878_v30, %v7475_v54  ;;  %v4436_v38 = vpop.f32.mrb[183].mxu0 }
 0x306   : > { %v4437_v59 = vadd.f32 %v7475_v54, %v4436_v38 }
 0x307   : > { %v5181_v3 = vpack.c.bf16 %v4445_v57, %v4442_v46 }
 0x308   : > { %v5176_v25 = vpack.c.bf16 %v4437_v59, %v4434_v17 }
 0x309   : > { %5245 = vst [vmem:[%s7484_s10 + $0x18] sm:$0xff] %v5181_v3  }
 0x30a   : > { %5244 = vst [vmem:[%s7484_s10 + $0x10] sm:$0xff] %v5176_v25  }
 0x312   : > { %v5881_v55 = vpop.f32.mrb[184].mxu0 }
 0x313   : > { %v4449_v15 = vpop.f32.mrb[185].mxu0  ;;  %v4458_v8 = vadd.f32 %v5881_v55, %v7475_v54 }
 0x314   : > { %v5882_v56 = vpop.f32.mrb[186].mxu0  ;;  %v4450_v42 = vadd.f32 %v7475_v54, %v4449_v15 }
 0x315   : > { %v4461_v1 = vadd.f32 %v5882_v56, %v7475_v54  ;;  %v4452_v26 = vpop.f32.mrb[187].mxu0 }
 0x316   : > { %v4453_v37 = vadd.f32 %v7475_v54, %v4452_v26 }
 0x317   : > { %v5191_v20 = vpack.c.bf16 %v4461_v1, %v4458_v8 }
 0x318   : > { %v5186_v45 = vpack.c.bf16 %v4453_v37, %v4450_v42 }
 0x319   : > { %5247 = vst [vmem:[%s7484_s10 + $0x28] sm:$0xff] %v5191_v20  }
 0x31a   : > { %5246 = vst [vmem:[%s7484_s10 + $0x20] sm:$0xff] %v5186_v45  }
 0x322   : > { %v5885_v39 = vpop.f32.mrb[188].mxu0 }
 0x323   : > { %v4465_v43 = vpop.f32.mrb[189].mxu0  ;;  %v4474_v22 = vadd.f32 %v5885_v39, %v7475_v54 }
 0x324   : > { %v5886_v4 = vpop.f32.mrb[190].mxu0  ;;  %v4466_v32 = vadd.f32 %v7475_v54, %v4465_v43 }
 0x325   : > { %v4477_v12 = vadd.f32 %v5886_v4, %v7475_v54  ;;  %v4468_v21 = vpop.f32.mrb[191].mxu0 }
 0x326   : > { %v4469_v23 = vadd.f32 %v7475_v54, %v4468_v21 }
 0x327   : > { %v5201_v5 = vpack.c.bf16 %v4477_v12, %v4474_v22 }
 0x328   : > { %v5196_v24 = vpack.c.bf16 %v4469_v23, %v4466_v32 }
 0x329   : > { %5249 = vst [vmem:[%s7484_s10 + $0x38] sm:$0xff] %v5201_v5  }
 0x32a   : > { %5248 = vst [vmem:[%s7484_s10 + $0x30] sm:$0xff] %v5196_v24  }
 0x332   : > { %v5889_v41 = vpop.f32.mrb[192].mxu0 }
 0x333   : > { %v4481_v29 = vpop.f32.mrb[193].mxu0  ;;  %v4490_v2 = vadd.f32 %v5889_v41, %v7475_v54 }
 0x334   : > { %v5890_v60 = vpop.f32.mrb[194].mxu0  ;;  %v4482_v19 = vadd.f32 %v7475_v54, %v4481_v29 }
 0x335   : > { %v4493_v35 = vadd.f32 %v5890_v60, %v7475_v54  ;;  %v4484_v28 = vpop.f32.mrb[195].mxu0 }
 0x336   : > { %v4485_v52 = vadd.f32 %v7475_v54, %v4484_v28 }
 0x337   : > { %v5211_v48 = vpack.c.bf16 %v4493_v35, %v4490_v2 }
 0x338   : > { %v5206_v51 = vpack.c.bf16 %v4485_v52, %v4482_v19 }
 0x339   : > { %5251 = vst [vmem:[%s7484_s10 + $0x48] sm:$0xff] %v5211_v48  }
 0x33a   : > { %5250 = vst [vmem:[%s7484_s10 + $0x40] sm:$0xff] %v5206_v51  }
 0x342   : > { %v5893_v53 = vpop.f32.mrb[196].mxu0 }
 0x343   : > { %v4497_v58 = vpop.f32.mrb[197].mxu0  ;;  %v4506_v18 = vadd.f32 %v5893_v53, %v7475_v54 }
 0x344   : > { %v5894_v63 = vpop.f32.mrb[198].mxu0  ;;  %v4498_v9 = vadd.f32 %v7475_v54, %v4497_v58 }
 0x345   : > { %v4509_v16 = vadd.f32 %v5894_v63, %v7475_v54  ;;  %v4500_v33 = vpop.f32.mrb[199].mxu0 }
 0x346   : > { %v4501_v50 = vadd.f32 %v7475_v54, %v4500_v33 }
 0x347   : > { %v5221_v10 = vpack.c.bf16 %v4509_v16, %v4506_v18 }
 0x348   : > { %v5216_v34 = vpack.c.bf16 %v4501_v50, %v4498_v9 }
 0x349   : > { %5253 = vst [vmem:[%s7484_s10 + $0x58] sm:$0xff] %v5221_v10  }
 0x34a   : > { %5252 = vst [vmem:[%s7484_s10 + $0x50] sm:$0xff] %v5216_v34  }
 0x352   : > { %v5897_v36 = vpop.f32.mrb[200].mxu0 }
 0x353   : > { %v4513_v7 = vpop.f32.mrb[201].mxu0  ;;  %v4522_v47 = vadd.f32 %v5897_v36, %v7475_v54 }
 0x354   : > { %v5898_v40 = vpop.f32.mrb[202].mxu0  ;;  %v4514_v49 = vadd.f32 %v7475_v54, %v4513_v7 }
 0x355   : > { %v4525_v61 = vadd.f32 %v5898_v40, %v7475_v54  ;;  %v4516_v13 = vpop.f32.mrb[203].mxu0 }
 0x356   : > { %v4517_v44 = vadd.f32 %v7475_v54, %v4516_v13 }
 0x357   : > { %v5231_v62 = vpack.c.bf16 %v4525_v61, %v4522_v47 }
 0x358   : > { %v5226_v31 = vpack.c.bf16 %v4517_v44, %v4514_v49 }
 0x359   : > { %5255 = vst [vmem:[%s7484_s10 + $0x68] sm:$0xff] %v5231_v62  }
 0x35a   : > { %5254 = vst [vmem:[%s7484_s10 + $0x60] sm:$0xff] %v5226_v31  }
 0x362   : > { %v5901_v11 = vpop.f32.mrb[204].mxu0 }
 0x363   : > { %v4529_v0 = vpop.f32.mrb[205].mxu0  ;;  %v4538_v27 = vadd.f32 %v5901_v11, %v7475_v54 }
 0x364   : > { %v5902_v6 = vpop.f32.mrb[206].mxu0  ;;  %v4530_v46 = vadd.f32 %v7475_v54, %v4529_v0 }
 0x365   : > { %v4541_v14 = vadd.f32 %v5902_v6, %v7475_v54  ;;  %v4532_v30 = vpop.f32.mrb[207].mxu0 }
 0x366   : > { %v4533_v57 = vadd.f32 %v7475_v54, %v4532_v30 }
 0x367   : > { %v5241_v38 = vpack.c.bf16 %v4541_v14, %v4538_v27 }
 0x368   : > { %v5236_v17 = vpack.c.bf16 %v4533_v57, %v4530_v46 }
 0x369   : > { %5257 = vst [vmem:[%s7484_s10 + $0x78] sm:$0xff] %v5241_v38  }
 0x36a   : > { %5256 = vst [vmem:[%s7484_s10 + $0x70] sm:$0xff] %v5236_v17  }
 0x36b PF: > { %s16_s23 = sadd.s32 1, %s5995_s23   ;;  %s7598_s21 = smov %s5991_s22 }
 0x36c   : > { %p13_p5 = scmp.ge.s32.totalorder %s16_s23, 4   ;;  %s7599_s22 = smov %s7601_s24 }
 0x36e   :  { %15 = sbr.rel (!%p13_p5) target bundleno = 2 (0x2), region = 93 }

</bundles_post_ra>
